<compile_context>
chip_gen: v7x
topology: tpu7x:2x2x1
jax: 0.10.0
libtpu: 0.0.40
codegen_flags: <defaults>
</compile_context>

<pallas_src>
import functools
import math

import jax
import jax.numpy as jnp
from jax.experimental import pallas as pl
from jax.experimental.pallas import tpu as pltpu


# ----------------------------------------------------------------------------
# helpers
# ----------------------------------------------------------------------------
def _round_up(x, m):
    return ((x + m - 1) // m) * m


def _pick_tile(dim, align, candidates):
    """Pick the largest candidate tile dividing `dim` rounded up to `align`."""
    padded = _round_up(dim, align)
    for c in candidates:
        if c <= padded and padded % c == 0:
            return c, padded
    return padded, padded


def _seq_tile(seq_len):
    """Sequence tile used for attention / padded sequence length."""
    return seq_len if seq_len <= 256 else 256


def _gelu_exact(x):
    # GELU(approximate='none') == 0.5 * x * (1 + erf(x / sqrt(2)))
    return 0.5 * x * (1.0 + jax.lax.erf(x * (1.0 / math.sqrt(2.0))))


_VMEM_LIMIT = 32 * 1024 * 1024   # explicit scoped-VMEM budget (safe on v5e/v6e/v7x)


# ----------------------------------------------------------------------------
# Tiled matmul (+bias, +GELU, +fused residual) kernel
# ----------------------------------------------------------------------------
def linear(x2d, w, b=None, activation=None, residual=None, *,
           out_dtype=jnp.bfloat16, tm=512):
    """x2d: (M, K), w: (K, N).  Optional bias (N,), exact-GELU, and fused residual
    add of a (M, N) tensor in the last-k epilogue.  bf16 operands, f32 accumulator."""
    M, K = x2d.shape
    N = w.shape[1]

    tm = min(tm, _round_up(M, 8))
    Mp = _round_up(M, tm)
    tk, Kp = _pick_tile(K, 128, (512, 256, 128))
    tn, Np = _pick_tile(N, 128, (512, 256, 128))

    x = x2d.astype(jnp.bfloat16)
    if (Mp, Kp) != (M, K):
        x = jnp.pad(x, ((0, Mp - M), (0, Kp - K)))

    wp = w.astype(jnp.bfloat16)
    if (Kp, Np) != (K, N):
        wp = jnp.pad(wp, ((0, Kp - K), (0, Np - N)))

    use_bias = b is not None
    has_res = residual is not None

    args = [x, wp]
    in_specs = [pl.BlockSpec((tm, tk), lambda i, j, k: (i, k)),
                pl.BlockSpec((tk, tn), lambda i, j, k: (k, j))]
    if use_bias:
        bp = b.astype(jnp.float32).reshape(1, N)
        if Np != N:
            bp = jnp.pad(bp, ((0, 0), (0, Np - N)))
        args.append(bp)
        in_specs.append(pl.BlockSpec((1, tn), lambda i, j, k: (0, j)))
    if has_res:
        r = residual.astype(jnp.bfloat16)
        if (Mp, Np) != r.shape:
            r = jnp.pad(r, ((0, Mp - r.shape[0]), (0, Np - r.shape[1])))
        args.append(r)
        in_specs.append(pl.BlockSpec((tm, tn), lambda i, j, k: (i, j)))

    def kernel(*refs):
        x_ref, w_ref = refs[0], refs[1]
        idx = 2
        b_ref = None
        r_ref = None
        if use_bias:
            b_ref = refs[idx]; idx += 1
        if has_res:
            r_ref = refs[idx]; idx += 1
        o_ref, acc_ref = refs[idx], refs[idx + 1]

        @pl.when(pl.program_id(2) == 0)
        def _():
            acc_ref[...] = jnp.zeros_like(acc_ref)

        acc_ref[...] += jnp.dot(x_ref[...], w_ref[...],
                                preferred_element_type=jnp.float32)

        @pl.when(pl.program_id(2) == pl.num_programs(2) - 1)
        def _():
            acc = acc_ref[...]
            if use_bias:
                acc = acc + b_ref[...].astype(jnp.float32)
            if activation == "gelu":
                acc = _gelu_exact(acc)
            if has_res:
                acc = acc + r_ref[...].astype(jnp.float32)
            o_ref[...] = acc.astype(o_ref.dtype)

    out = pl.pallas_call(
        kernel,
        out_shape=jax.ShapeDtypeStruct((Mp, Np), out_dtype),
        grid=(Mp // tm, Np // tn, Kp // tk),
        in_specs=in_specs,
        out_specs=pl.BlockSpec((tm, tn), lambda i, j, k: (i, j)),
        scratch_shapes=[pltpu.VMEM((tm, tn), jnp.float32)],
        compiler_params=pltpu.CompilerParams(
            dimension_semantics=("parallel", "parallel", "arbitrary"),
            vmem_limit_bytes=_VMEM_LIMIT),
    )(*args)

    if (Mp, Np) != (M, N):
        out = out[:M, :N]
    return out


# ----------------------------------------------------------------------------
# Tied-logits kernel: activation resident in VMEM, embedding table streamed once.
# ----------------------------------------------------------------------------
def tied_logits(x2d, emb, *, out_dtype=jnp.float32):
    """x2d: (M, D).  emb: (Vp, D) with Vp a multiple of 128.  Returns (M, Vp) logits.

    The whole (padded-M, D) activation stays resident (same block index on every grid
    step -> one DMA); only the vocab axis is tiled, so the embedding table makes a
    single pass through HBM.  Contraction is over the last dims of both operands, so
    no transposed copy of the table is ever materialized.
    # TODO(synk): for very large B*T, add an M grid axis (activation no longer fits).
    """
    M, D = x2d.shape
    Vp = emb.shape[0]
    Mp = _round_up(M, 8)
    x = x2d.astype(jnp.bfloat16)
    if Mp != M:
        x = jnp.pad(x, ((0, Mp - M), (0, 0)))
    tn, Np = _pick_tile(Vp, 128, (512, 256, 128))   # Vp padded at init -> Np == Vp

    def kernel(x_ref, w_ref, o_ref):
        # TODO(synk): if Mosaic inserts an XLU transpose here, pre-transpose the
        # table to (D, Vp) at init (cheap on v6e/v7x HBM) and use the normal path.
        o_ref[...] = jax.lax.dot_general(
            x_ref[...], w_ref[...], (((1,), (1,)), ((), ())),
            preferred_element_type=jnp.float32).astype(o_ref.dtype)

    out = pl.pallas_call(
        kernel,
        out_shape=jax.ShapeDtypeStruct((Mp, Np), out_dtype),
        grid=(Np // tn,),
        in_specs=[pl.BlockSpec((Mp, D), lambda j: (0, 0)),
                  pl.BlockSpec((tn, D), lambda j: (j, 0))],
        out_specs=pl.BlockSpec((Mp, tn), lambda j: (0, j)),
        compiler_params=pltpu.CompilerParams(
            dimension_semantics=("parallel",),
            vmem_limit_bytes=_VMEM_LIMIT),
    )(x, emb.astype(jnp.bfloat16))
    return out[:M]


# ----------------------------------------------------------------------------
# LayerNorm kernel (row-tiled)
# ----------------------------------------------------------------------------
def _layernorm_kernel(x_ref, g_ref, b_ref, o_ref):
    x = x_ref[...].astype(jnp.float32)
    mu = jnp.mean(x, axis=-1, keepdims=True)
    var = jnp.mean(jnp.square(x - mu), axis=-1, keepdims=True)
    y = (x - mu) * jax.lax.rsqrt(var + 1e-5)
    y = y * g_ref[...].astype(jnp.float32) + b_ref[...].astype(jnp.float32)
    o_ref[...] = y.astype(o_ref.dtype)


def layer_norm(x2d, g, b, *, tm=256, out_dtype=jnp.bfloat16):
    M, D = x2d.shape
    tm = min(tm, _round_up(M, 8))
    Mp = _round_up(M, tm)
    x = x2d.astype(jnp.bfloat16)
    if Mp != M:
        x = jnp.pad(x, ((0, Mp - M), (0, 0)))
    out = pl.pallas_call(
        _layernorm_kernel,
        out_shape=jax.ShapeDtypeStruct((Mp, D), out_dtype),
        grid=(Mp // tm,),
        in_specs=[
            pl.BlockSpec((tm, D), lambda i: (i, 0)),
            pl.BlockSpec((1, D), lambda i: (0, 0)),
            pl.BlockSpec((1, D), lambda i: (0, 0)),
        ],
        out_specs=pl.BlockSpec((tm, D), lambda i: (i, 0)),
        compiler_params=pltpu.CompilerParams(dimension_semantics=("parallel",)),
    )(x, g.reshape(1, D).astype(jnp.bfloat16), b.reshape(1, D).astype(jnp.bfloat16))
    if Mp != M:
        out = out[:M]
    return out


# ----------------------------------------------------------------------------
# Flash attention kernel (online softmax, heads packed, lane-dense output)
# ----------------------------------------------------------------------------
def flash_attention(q3, kv3, *, n_head, causal=False, kv_len=None):
    """q3: (B, Tq, D) bf16 (already scaled -- scale folded into wq at init).
    kv3: (B, Tk, 2D) bf16, K packed in columns [0, D) and V in [D, 2D).
    kv_len: number of valid key positions (<= Tk); positions beyond it are masked.
    causal: apply the causal mask (generated in-kernel, no mask DMA).
    Output: (B, Tq, D) bf16, lane-dense (last dim = D)."""
    B, Tq, D = q3.shape
    S = kv3.shape[1]
    assert kv3.shape[2] == 2 * D
    dh = D // n_head
    if kv_len is None:
        kv_len = S
    tq = _seq_tile(Tq)
    tk = _seq_tile(S)
    assert Tq % tq == 0 and S % tk == 0
    nq, nk = Tq // tq, S // tk
    need_kv_mask = kv_len < S
    NEG = -1e30  # finite "-inf": exp(NEG - finite) underflows to 0, no NaNs

    def kernel(q_ref, kv_ref, o_ref, m_scr, l_scr, acc_scr):
        ki = pl.program_id(2)

        @pl.when(ki == 0)
        def _():
            m_scr[...] = jnp.full_like(m_scr, NEG)
            l_scr[...] = jnp.zeros_like(l_scr)
            acc_scr[...] = jnp.zeros_like(acc_scr)

        q_start = pl.program_id(1) * tq
        k_start = ki * tk

        def body():
            valid = None
            if causal or need_kv_mask:
                rows = q_start + jax.lax.broadcasted_iota(jnp.int32, (tq, tk), 0)
                cols = k_start + jax.lax.broadcasted_iota(jnp.int32, (tq, tk), 1)
                if causal:
                    valid = cols <= rows
                if need_kv_mask:
                    kvm = cols < kv_len
                    valid = kvm if valid is None else jnp.logical_and(valid, kvm)
            for h in range(n_head):  # static unroll; per-head column slices of the blocks
                lo = h * dh
                q_h = q_ref[:, lo:lo + dh]
                k_h = kv_ref[:, lo:lo + dh]
                v_h = kv_ref[:, D + lo:D + lo + dh]
                s = jax.lax.dot_general(
                    q_h, k_h, (((1,), (1,)), ((), ())),
                    preferred_element_type=jnp.float32)           # (tq, tk)
                if valid is not None:
                    s = jnp.where(valid, s, NEG)
                m_prev = m_scr[:, h:h + 1]
                l_prev = l_scr[:, h:h + 1]
                m_new = jnp.maximum(m_prev, jnp.max(s, axis=-1, keepdims=True))
                alpha = jnp.exp(m_prev - m_new)
                p = jnp.exp(s - m_new)
                l_scr[:, h:h + 1] = alpha * l_prev + jnp.sum(p, axis=-1, keepdims=True)
                m_scr[:, h:h + 1] = m_new
                pv = jnp.dot(p.astype(v_h.dtype), v_h,
                             preferred_element_type=jnp.float32)  # (tq, dh)
                acc_scr[:, lo:lo + dh] = alpha * acc_scr[:, lo:lo + dh] + pv

        if causal:
            # Skip KV tiles that are entirely in the causally-masked future.
            @pl.when(k_start <= q_start + (tq - 1))
            def _():
                body()
        else:
            body()

        @pl.when(ki == nk - 1)
        def _():
            for h in range(n_head):
                lo = h * dh
                inv = pl.reciprocal(l_scr[:, h:h + 1], approx=True)
                acc_scr[:, lo:lo + dh] = acc_scr[:, lo:lo + dh] * inv
            o_ref[...] = acc_scr[...].astype(o_ref.dtype)

    return pl.pallas_call(
        kernel,
        out_shape=jax.ShapeDtypeStruct((B, Tq, D), jnp.bfloat16),
        grid=(B, nq, nk),
        in_specs=[
            pl.BlockSpec((None, tq, D), lambda b, qi, ki: (b, qi, 0)),
            pl.BlockSpec((None, tk, 2 * D), lambda b, qi, ki: (b, ki, 0)),
        ],
        out_specs=pl.BlockSpec((None, tq, D), lambda b, qi, ki: (b, qi, 0)),
        scratch_shapes=[
            pltpu.VMEM((tq, n_head), jnp.float32),   # running max per head
            pltpu.VMEM((tq, n_head), jnp.float32),   # running denom per head
            pltpu.VMEM((tq, D), jnp.float32),        # lane-dense accumulator
        ],
        compiler_params=pltpu.CompilerParams(
            dimension_semantics=("parallel", "parallel", "arbitrary"),
            vmem_limit_bytes=_VMEM_LIMIT),
    )(q3.astype(jnp.bfloat16), kv3.astype(jnp.bfloat16))


# ----------------------------------------------------------------------------
# Model components (glue around the kernels)
# ----------------------------------------------------------------------------
def conv1d_gelu(x_nlc, w, b, stride):
    """Conv1d(kernel=3, padding=1) + exact GELU.  x_nlc: (B, T, Cin) bf16,
    w: (Cout, Cin, 3) (PyTorch layout), b: (Cout,)."""
    # TODO(synk): accumulate the 3 taps inside the matmul kernel (shifted index maps)
    # instead of this im2col gather, to remove the ~3x duplicated activation traffic.
    B, T, Cin = x_nlc.shape
    Cout, _, K = w.shape
    x_pad = jnp.pad(x_nlc, ((0, 0), (1, 1), (0, 0)))
    T_out = (T + 2 - K) // stride + 1
    cols = jnp.stack(
        [x_pad[:, k: k + stride * (T_out - 1) + 1: stride, :] for k in range(K)],
        axis=2,
    ).reshape(B * T_out, K * Cin)
    w2 = jnp.transpose(w, (2, 1, 0)).reshape(K * Cin, Cout)   # [k*Cin+c, o] = w[o,c,k]
    y = linear(cols, w2, b, activation="gelu")
    return y.reshape(B, T_out, Cout)


def mha(p, n_head, x, residual2d, xa=None, causal=False, kv_len=None):
    """x: (B, Tp, D) normalized input.  residual2d: (B*Tp, D) residual stream.
    Returns the new residual stream (B*Tp, D) with the output projection's residual
    add fused into the matmul epilogue."""
    B, T, D = x.shape
    src = x if xa is None else xa
    S = src.shape[1]
    q = linear(x.reshape(B * T, D), p["wq"], p["bq"])           # scale folded into wq
    kv = linear(src.reshape(B * S, D), p["wkv"], p["bkv"])      # fused K/V projection
    o = flash_attention(q.reshape(B, T, D), kv.reshape(B, S, 2 * D),
                        n_head=n_head, causal=causal, kv_len=kv_len)
    return linear(o.reshape(B * T, D), p["wo"], p["bo"], residual=residual2d)


def residual_block(p, n_head, x, xa=None, causal=False, self_kv_len=None, xa_len=None):
    B, T, D = x.shape
    x2 = x.reshape(B * T, D)
    h = layer_norm(x2, p["attn_ln_g"], p["attn_ln_b"]).reshape(B, T, D)
    x2 = mha(p["attn"], n_head, h, x2, causal=causal, kv_len=self_kv_len)
    if ("cross_attn" in p) and (xa is not None):
        h = layer_norm(x2, p["cross_ln_g"], p["cross_ln_b"]).reshape(B, T, D)
        x2 = mha(p["cross_attn"], n_head, h, x2, xa=xa, kv_len=xa_len)
    h = layer_norm(x2, p["mlp_ln_g"], p["mlp_ln_b"])
    h = linear(h, p["mlp_w1"], p["mlp_b1"], activation="gelu")
    x2 = linear(h, p["mlp_w2"], p["mlp_b2"], residual=x2)       # fused residual add
    return x2.reshape(B, T, D)


def encoder_forward(p, dims, audio_ncl):
    # audio_ncl: (B, n_mels, T_audio)  — PyTorch NCL convention
    x = jnp.transpose(audio_ncl, (0, 2, 1)).astype(jnp.bfloat16)   # -> NLC, bf16 stream
    x = conv1d_gelu(x, p["conv1_w"], p["conv1_b"], stride=1)
    x = conv1d_gelu(x, p["conv2_w"], p["conv2_b"], stride=2)       # (B, T//2, D), NLC
    seq_len = x.shape[1]
    max_pos = p["pos_emb"].shape[0]
    if seq_len > max_pos:
        x = x[:, :max_pos, :]
        seq_len = max_pos
    x = x + p["pos_emb"][:seq_len][None]
    # Pad the sequence once and keep it padded for the whole stack; padded key
    # positions are masked inside the attention kernel (kv_len=seq_len).
    Tp = _round_up(seq_len, _seq_tile(seq_len))
    if Tp != seq_len:
        x = jnp.pad(x, ((0, 0), (0, Tp - seq_len), (0, 0)))
    for blk in p["blocks"]:
        x = residual_block(blk, dims["n_audio_head"], x, self_kv_len=seq_len)
    B, T, D = x.shape
    x = layer_norm(x.reshape(B * T, D), p["ln_post_g"], p["ln_post_b"]).reshape(B, T, D)
    return x, seq_len   # padded features + true length (for cross-attn key masking)


def decoder_forward(p, dims, tokens, xa, xa_len, mask=None):
    x = jnp.take(p["tok_emb"], tokens, axis=0)                     # (B, T, D) bf16 gather
    T = x.shape[1]
    x = x + p["pos_emb"][:T][None]
    # The reference passes an additive causal (-inf upper-triangular) mask; we
    # regenerate it in-kernel via iota instead of DMAing it.
    # TODO(synk): arbitrary non-causal additive masks are not supported by this path.
    causal = mask is not None
    Tp = _round_up(T, _seq_tile(T))
    if Tp != T:
        x = jnp.pad(x, ((0, 0), (0, Tp - T), (0, 0)))
    for blk in p["blocks"]:
        x = residual_block(blk, dims["n_text_head"], x, xa=xa, causal=causal,
                           self_kv_len=T, xa_len=xa_len)
    B, Tp_, D = x.shape
    x2 = layer_norm(x.reshape(B * Tp_, D), p["ln_g"], p["ln_b"])
    # Tied output projection: single pass over the (vocab_padded, D) table.
    logits = tied_logits(x2, p["tok_emb"], out_dtype=jnp.float32)
    return logits.reshape(B, Tp_, -1)[:, :T, : dims["n_vocab"]]


def whisper_forward(params, dims, audio, tokens, mask=None):
    audio_features, feat_len = encoder_forward(params["encoder"], dims, audio)
    return decoder_forward(params["decoder"], dims, tokens, audio_features, feat_len,
                           mask=mask)


def get_causal_mask(seq_len):
    # Kept for API compatibility with the reference; the kernel regenerates the
    # causal mask internally whenever a mask is supplied.
    return jnp.triu(jnp.full((seq_len, seq_len), -jnp.inf, dtype=jnp.float32), k=1)


# ----------------------------------------------------------------------------
# Deterministic parameter initialization (synthetic, shapes match the module)
# ----------------------------------------------------------------------------
def _dense(key, fan_in, fan_out, scale=0.02):
    return (scale * jax.random.normal(key, (fan_in, fan_out), jnp.float32)).astype(jnp.bfloat16)


def init_mha(key, D, n_head):
    ks = jax.random.split(key, 4)
    # Fold the 1/sqrt(head_dim) attention scale into the query projection (do the
    # same when importing real checkpoints: wq *= scale, bq *= scale).
    scale = (D // n_head) ** -0.5
    wq = (0.02 * scale * jax.random.normal(ks[0], (D, D), jnp.float32)).astype(jnp.bfloat16)
    wk = _dense(ks[1], D, D)     # key projection: no bias (nn.Linear(bias=False))
    wv = _dense(ks[2], D, D)
    return {
        "wq": wq, "bq": jnp.zeros((D,), jnp.bfloat16),
        "wkv": jnp.concatenate([wk, wv], axis=1),                 # fused (D, 2D)
        "bkv": jnp.zeros((2 * D,), jnp.bfloat16),                 # key half must stay zero
        "wo": _dense(ks[3], D, D), "bo": jnp.zeros((D,), jnp.bfloat16),
    }


def init_block(key, D, n_head, cross):
    ks = jax.random.split(key, 4)
    p = {
        "attn": init_mha(ks[0], D, n_head),
        "attn_ln_g": jnp.ones((D,), jnp.bfloat16), "attn_ln_b": jnp.zeros((D,), jnp.bfloat16),
        "mlp_w1": _dense(ks[1], D, 4 * D), "mlp_b1": jnp.zeros((4 * D,), jnp.bfloat16),
        "mlp_w2": _dense(ks[2], 4 * D, D), "mlp_b2": jnp.zeros((D,), jnp.bfloat16),
        "mlp_ln_g": jnp.ones((D,), jnp.bfloat16), "mlp_ln_b": jnp.zeros((D,), jnp.bfloat16),
    }
    if cross:
        p["cross_attn"] = init_mha(ks[3], D, n_head)
        p["cross_ln_g"] = jnp.ones((D,), jnp.bfloat16)
        p["cross_ln_b"] = jnp.zeros((D,), jnp.bfloat16)
    return p


def init_encoder(key, dims):
    D, Cin = dims["n_audio_state"], dims["n_mels"]
    ks = jax.random.split(key, 3 + dims["n_audio_layer"])
    return {
        "conv1_w": (0.02 * jax.random.normal(ks[0], (D, Cin, 3), jnp.float32)).astype(jnp.bfloat16),
        "conv1_b": jnp.zeros((D,), jnp.bfloat16),
        "conv2_w": (0.02 * jax.random.normal(ks[1], (D, D, 3), jnp.float32)).astype(jnp.bfloat16),
        "conv2_b": jnp.zeros((D,), jnp.bfloat16),
        "pos_emb": (0.01 * jax.random.normal(ks[2], (dims["n_audio_ctx"], D), jnp.float32)).astype(jnp.bfloat16),
        "blocks": [init_block(ks[3 + i], D, dims["n_audio_head"], cross=False)
                   for i in range(dims["n_audio_layer"])],
        "ln_post_g": jnp.ones((D,), jnp.bfloat16), "ln_post_b": jnp.zeros((D,), jnp.bfloat16),
    }


def init_decoder(key, dims):
    D = dims["n_text_state"]
    V = dims["n_vocab"]
    Vp = _round_up(V, 128)   # pad vocab rows once at init so the logits matmul tiles cleanly
    ks = jax.random.split(key, 2 + dims["n_text_layer"])
    tok = 0.02 * jax.random.normal(ks[0], (V, D), jnp.float32)
    tok = jnp.pad(tok, ((0, Vp - V), (0, 0))).astype(jnp.bfloat16)
    return {
        "tok_emb": tok,
        "pos_emb": (0.01 * jax.random.normal(ks[1], (dims["n_text_ctx"], D), jnp.float32)).astype(jnp.bfloat16),
        "blocks": [init_block(ks[2 + i], D, dims["n_text_head"], cross=True)
                   for i in range(dims["n_text_layer"])],
        "ln_g": jnp.ones((D,), jnp.bfloat16), "ln_b": jnp.zeros((D,), jnp.bfloat16),
    }


# TODO(synk): `generate()` (host-side autoregressive loop with argmax/top-k printing)
# is control flow outside the forward pass and is not implemented as a kernel.

if __name__ == "__main__":
    dims = dict(
        n_mels=8, n_audio_ctx=16, n_audio_state=32, n_audio_head=4, n_audio_layer=2,
        n_text_ctx=8, n_text_state=32, n_text_head=4, n_text_layer=2, n_vocab=64,
    )
    key = jax.random.PRNGKey(0)
    k_enc, k_dec, k_audio, k_tok = jax.random.split(key, 4)
    params = {"encoder": init_encoder(k_enc, dims), "decoder": init_decoder(k_dec, dims)}

    B = 2
    T_audio = 2 * dims["n_audio_ctx"]  # stride-2 conv halves time -> n_audio_ctx
    audio = jax.random.normal(k_audio, (B, dims["n_mels"], T_audio), jnp.float32)  # NCL
    tokens = jax.random.randint(k_tok, (B, dims["n_text_ctx"]), 0, dims["n_vocab"])
    mask = get_causal_mask(dims["n_text_ctx"])

    fwd = jax.jit(lambda p, a, t, m: whisper_forward(p, dims, a, t, m))
    logits = fwd(params, audio, tokens, mask)
    logits = jax.block_until_ready(logits)

    assert logits.shape == (B, dims["n_text_ctx"], dims["n_vocab"]), logits.shape
    assert bool(jnp.all(jnp.isfinite(logits)))
    print("KERNEL_OK")
</pallas_src>

<mosaic_0001>
module attributes {stable_mosaic.version = 11 : i64} {
  func.func @kernel(%arg0: i32, %arg1: i32, %arg2: i32, %arg3: memref<64x128xbf16, #tpu.memory_space<vmem>>, %arg4: memref<128x128xbf16, #tpu.memory_space<vmem>>, %arg5: memref<1x128xf32, #tpu.memory_space<vmem>>, %arg6: memref<64x128xbf16, #tpu.memory_space<vmem>>, %arg7: memref<64x128xf32, #tpu.memory_space<vmem>>) attributes {dimension_semantics = [#tpu.dimension_semantics<parallel>, #tpu.dimension_semantics<parallel>, #tpu.dimension_semantics<arbitrary>], iteration_bounds = array<i64: 1, 1, 1>, scalar_prefetch = 0 : i64, scratch_operands = 1 : i64, tpu.core_type = #tpu.core_type<tc>, window_params = [{transform_indices = @transform_0, window_bounds = array<i64: 64, 128>}, {transform_indices = @transform_1, window_bounds = array<i64: 128, 128>}, {transform_indices = @transform_2, window_bounds = array<i64: 1, 128>}, {transform_indices = @transform_3, window_bounds = array<i64: 64, 128>}]} {
    %c0_i32 = arith.constant 0 : i32
    %0 = arith.cmpi eq, %arg2, %c0_i32 : i32
    %1 = arith.extui %0 : i1 to i32
    %c0_i32_0 = arith.constant 0 : i32
    %2 = arith.cmpi ne, %1, %c0_i32_0 : i32
    scf.if %2 {
      %cst_10 = arith.constant 0.000000e+00 : f32
      %12 = vector.broadcast %cst_10 : f32 to vector<64x128xf32>
      %c0_11 = arith.constant 0 : index
      %c0_12 = arith.constant 0 : index
      %13 = vector.load %arg7[%c0_11, %c0_12] : memref<64x128xf32, #tpu.memory_space<vmem>>, vector<64x128xf32>
      tpu.vector_store %arg7[%c0_11, %c0_12], %12 {strides = array<i32>} : memref<64x128xf32, #tpu.memory_space<vmem>>, vector<64x128xf32>,
    } else {
    }
    %c0 = arith.constant 0 : index
    %c0_1 = arith.constant 0 : index
    %3 = vector.load %arg7[%c0, %c0_1] : memref<64x128xf32, #tpu.memory_space<vmem>>, vector<64x128xf32>
    %c0_2 = arith.constant 0 : index
    %c0_3 = arith.constant 0 : index
    %4 = vector.load %arg3[%c0_2, %c0_3] : memref<64x128xbf16, #tpu.memory_space<vmem>>, vector<64x128xbf16>
    %c0_4 = arith.constant 0 : index
    %c0_5 = arith.constant 0 : index
    %5 = vector.load %arg4[%c0_4, %c0_5] : memref<128x128xbf16, #tpu.memory_space<vmem>>, vector<128x128xbf16>
    %cst = arith.constant dense<0.000000e+00> : vector<64x128xf32>
    %6 = tpu.matmul %4, %5, %cst {dimension_numbers = #tpu.dot_dimension_numbers<[1], [0], [0], [1], [0, 0, 1, 1], [], []>} : vector<64x128xbf16>, vector<128x128xbf16>, vector<64x128xf32> -> vector<64x128xf32>
    %7 = arith.addf %3, %6 : vector<64x128xf32>
    %c0_6 = arith.constant 0 : index
    %c0_7 = arith.constant 0 : index
    %8 = vector.load %arg7[%c0_6, %c0_7] : memref<64x128xf32, #tpu.memory_space<vmem>>, vector<64x128xf32>
    tpu.vector_store %arg7[%c0_6, %c0_7], %7 {strides = array<i32>} : memref<64x128xf32, #tpu.memory_space<vmem>>, vector<64x128xf32>,
    %c0_i32_8 = arith.constant 0 : i32
    %9 = arith.cmpi eq, %arg2, %c0_i32_8 : i32
    %10 = arith.extui %9 : i1 to i32
    %c0_i32_9 = arith.constant 0 : i32
    %11 = arith.cmpi ne, %10, %c0_i32_9 : i32
    scf.if %11 {
      %c0_10 = arith.constant 0 : index
      %c0_11 = arith.constant 0 : index
      %12 = vector.load %arg7[%c0_10, %c0_11] : memref<64x128xf32, #tpu.memory_space<vmem>>, vector<64x128xf32>
      %c0_12 = arith.constant 0 : index
      %c0_13 = arith.constant 0 : index
      %13 = vector.load %arg5[%c0_12, %c0_13] : memref<1x128xf32, #tpu.memory_space<vmem>>, vector<1x128xf32>
      %14 = vector.broadcast %13 : vector<1x128xf32> to vector<64x128xf32>
      %15 = arith.addf %12, %14 : vector<64x128xf32>
      %cst_14 = arith.constant 5.000000e-01 : f32
      %16 = vector.broadcast %cst_14 : f32 to vector<64x128xf32>
      %17 = arith.mulf %16, %15 : vector<64x128xf32>
      %cst_15 = arith.constant 0.707106769 : f32
      %18 = vector.broadcast %cst_15 : f32 to vector<64x128xf32>
      %19 = arith.mulf %15, %18 : vector<64x128xf32>
      %20 = math.erf %19 : vector<64x128xf32>
      %cst_16 = arith.constant 1.000000e+00 : f32
      %21 = vector.broadcast %cst_16 : f32 to vector<64x128xf32>
      %22 = arith.addf %21, %20 : vector<64x128xf32>
      %23 = arith.mulf %17, %22 : vector<64x128xf32>
      %24 = arith.truncf %23 : vector<64x128xf32> to vector<64x128xbf16>
      %c0_17 = arith.constant 0 : index
      %c0_18 = arith.constant 0 : index
      %25 = vector.load %arg6[%c0_17, %c0_18] : memref<64x128xbf16, #tpu.memory_space<vmem>>, vector<64x128xbf16>
      tpu.vector_store %arg6[%c0_17, %c0_18], %24 {strides = array<i32>} : memref<64x128xbf16, #tpu.memory_space<vmem>>, vector<64x128xbf16>,
    } else {
    }
    return
  }
  func.func @transform_0(%arg0: i32, %arg1: i32, %arg2: i32) -> (i32, i32) {
    %c0_i32 = arith.constant 0 : i32
    return %arg0, %arg2 : i32, i32
  }
  func.func @transform_1(%arg0: i32, %arg1: i32, %arg2: i32) -> (i32, i32) {
    %c0_i32 = arith.constant 0 : i32
    return %arg2, %arg1 : i32, i32
  }
  func.func @transform_2(%arg0: i32, %arg1: i32, %arg2: i32) -> (i32, i32) {
    %c0_i32 = arith.constant 0 : i32
    %c0_i32_0 = arith.constant 0 : i32
    return %c0_i32, %arg1 : i32, i32
  }
  func.func @transform_3(%arg0: i32, %arg1: i32, %arg2: i32) -> (i32, i32) {
    %c0_i32 = arith.constant 0 : i32
    return %arg0, %arg1 : i32, i32
  }
}

module attributes {stable_mosaic.version = 11 : i64} {
  func.func @kernel(%arg0: i32, %arg1: i32, %arg2: i32, %arg3: memref<32x128xbf16, #tpu.memory_space<vmem>>, %arg4: memref<128x128xbf16, #tpu.memory_space<vmem>>, %arg5: memref<1x128xf32, #tpu.memory_space<vmem>>, %arg6: memref<32x128xbf16, #tpu.memory_space<vmem>>, %arg7: memref<32x128xf32, #tpu.memory_space<vmem>>) attributes {dimension_semantics = [#tpu.dimension_semantics<parallel>, #tpu.dimension_semantics<parallel>, #tpu.dimension_semantics<arbitrary>], iteration_bounds = array<i64: 1, 1, 1>, scalar_prefetch = 0 : i64, scratch_operands = 1 : i64, tpu.core_type = #tpu.core_type<tc>, window_params = [{transform_indices = @transform_0, window_bounds = array<i64: 32, 128>}, {transform_indices = @transform_1, window_bounds = array<i64: 128, 128>}, {transform_indices = @transform_2, window_bounds = array<i64: 1, 128>}, {transform_indices = @transform_3, window_bounds = array<i64: 32, 128>}]} {
    %c0_i32 = arith.constant 0 : i32
    %0 = arith.cmpi eq, %arg2, %c0_i32 : i32
    %1 = arith.extui %0 : i1 to i32
    %c0_i32_0 = arith.constant 0 : i32
    %2 = arith.cmpi ne, %1, %c0_i32_0 : i32
    scf.if %2 {
      %cst_10 = arith.constant 0.000000e+00 : f32
      %12 = vector.broadcast %cst_10 : f32 to vector<32x128xf32>
      %c0_11 = arith.constant 0 : index
      %c0_12 = arith.constant 0 : index
      %13 = vector.load %arg7[%c0_11, %c0_12] : memref<32x128xf32, #tpu.memory_space<vmem>>, vector<32x128xf32>
      tpu.vector_store %arg7[%c0_11, %c0_12], %12 {strides = array<i32>} : memref<32x128xf32, #tpu.memory_space<vmem>>, vector<32x128xf32>,
    } else {
    }
    %c0 = arith.constant 0 : index
    %c0_1 = arith.constant 0 : index
    %3 = vector.load %arg7[%c0, %c0_1] : memref<32x128xf32, #tpu.memory_space<vmem>>, vector<32x128xf32>
    %c0_2 = arith.constant 0 : index
    %c0_3 = arith.constant 0 : index
    %4 = vector.load %arg3[%c0_2, %c0_3] : memref<32x128xbf16, #tpu.memory_space<vmem>>, vector<32x128xbf16>
    %c0_4 = arith.constant 0 : index
    %c0_5 = arith.constant 0 : index
    %5 = vector.load %arg4[%c0_4, %c0_5] : memref<128x128xbf16, #tpu.memory_space<vmem>>, vector<128x128xbf16>
    %cst = arith.constant dense<0.000000e+00> : vector<32x128xf32>
    %6 = tpu.matmul %4, %5, %cst {dimension_numbers = #tpu.dot_dimension_numbers<[1], [0], [0], [1], [0, 0, 1, 1], [], []>} : vector<32x128xbf16>, vector<128x128xbf16>, vector<32x128xf32> -> vector<32x128xf32>
    %7 = arith.addf %3, %6 : vector<32x128xf32>
    %c0_6 = arith.constant 0 : index
    %c0_7 = arith.constant 0 : index
    %8 = vector.load %arg7[%c0_6, %c0_7] : memref<32x128xf32, #tpu.memory_space<vmem>>, vector<32x128xf32>
    tpu.vector_store %arg7[%c0_6, %c0_7], %7 {strides = array<i32>} : memref<32x128xf32, #tpu.memory_space<vmem>>, vector<32x128xf32>,
    %c0_i32_8 = arith.constant 0 : i32
    %9 = arith.cmpi eq, %arg2, %c0_i32_8 : i32
    %10 = arith.extui %9 : i1 to i32
    %c0_i32_9 = arith.constant 0 : i32
    %11 = arith.cmpi ne, %10, %c0_i32_9 : i32
    scf.if %11 {
      %c0_10 = arith.constant 0 : index
      %c0_11 = arith.constant 0 : index
      %12 = vector.load %arg7[%c0_10, %c0_11] : memref<32x128xf32, #tpu.memory_space<vmem>>, vector<32x128xf32>
      %c0_12 = arith.constant 0 : index
      %c0_13 = arith.constant 0 : index
      %13 = vector.load %arg5[%c0_12, %c0_13] : memref<1x128xf32, #tpu.memory_space<vmem>>, vector<1x128xf32>
      %14 = vector.broadcast %13 : vector<1x128xf32> to vector<32x128xf32>
      %15 = arith.addf %12, %14 : vector<32x128xf32>
      %cst_14 = arith.constant 5.000000e-01 : f32
      %16 = vector.broadcast %cst_14 : f32 to vector<32x128xf32>
      %17 = arith.mulf %16, %15 : vector<32x128xf32>
      %cst_15 = arith.constant 0.707106769 : f32
      %18 = vector.broadcast %cst_15 : f32 to vector<32x128xf32>
      %19 = arith.mulf %15, %18 : vector<32x128xf32>
      %20 = math.erf %19 : vector<32x128xf32>
      %cst_16 = arith.constant 1.000000e+00 : f32
      %21 = vector.broadcast %cst_16 : f32 to vector<32x128xf32>
      %22 = arith.addf %21, %20 : vector<32x128xf32>
      %23 = arith.mulf %17, %22 : vector<32x128xf32>
      %24 = arith.truncf %23 : vector<32x128xf32> to vector<32x128xbf16>
      %c0_17 = arith.constant 0 : index
      %c0_18 = arith.constant 0 : index
      %25 = vector.load %arg6[%c0_17, %c0_18] : memref<32x128xbf16, #tpu.memory_space<vmem>>, vector<32x128xbf16>
      tpu.vector_store %arg6[%c0_17, %c0_18], %24 {strides = array<i32>} : memref<32x128xbf16, #tpu.memory_space<vmem>>, vector<32x128xbf16>,
    } else {
    }
    return
  }
  func.func @transform_0(%arg0: i32, %arg1: i32, %arg2: i32) -> (i32, i32) {
    %c0_i32 = arith.constant 0 : i32
    return %arg0, %arg2 : i32, i32
  }
  func.func @transform_1(%arg0: i32, %arg1: i32, %arg2: i32) -> (i32, i32) {
    %c0_i32 = arith.constant 0 : i32
    return %arg2, %arg1 : i32, i32
  }
  func.func @transform_2(%arg0: i32, %arg1: i32, %arg2: i32) -> (i32, i32) {
    %c0_i32 = arith.constant 0 : i32
    %c0_i32_0 = arith.constant 0 : i32
    return %c0_i32, %arg1 : i32, i32
  }
  func.func @transform_3(%arg0: i32, %arg1: i32, %arg2: i32) -> (i32, i32) {
    %c0_i32 = arith.constant 0 : i32
    return %arg0, %arg1 : i32, i32
  }
}

module attributes {stable_mosaic.version = 11 : i64} {
  func.func @_layernorm_kernel(%arg0: i32, %arg1: memref<32x32xbf16, #tpu.memory_space<vmem>>, %arg2: memref<1x32xbf16, #tpu.memory_space<vmem>>, %arg3: memref<1x32xbf16, #tpu.memory_space<vmem>>, %arg4: memref<32x32xbf16, #tpu.memory_space<vmem>>) attributes {dimension_semantics = [#tpu.dimension_semantics<parallel>], iteration_bounds = array<i64: 1>, scalar_prefetch = 0 : i64, scratch_operands = 0 : i64, tpu.core_type = #tpu.core_type<tc>, window_params = [{transform_indices = @transform_0, window_bounds = array<i64: 32, 32>}, {pipeline_mode = #tpu.pipeline_mode<synchronous>, transform_indices = @transform_1, window_bounds = array<i64: 1, 32>}, {pipeline_mode = #tpu.pipeline_mode<synchronous>, transform_indices = @transform_2, window_bounds = array<i64: 1, 32>}, {transform_indices = @transform_3, window_bounds = array<i64: 32, 32>}]} {
    %c0 = arith.constant 0 : index
    %c0_0 = arith.constant 0 : index
    %0 = vector.load %arg1[%c0, %c0_0] : memref<32x32xbf16, #tpu.memory_space<vmem>>, vector<32x32xbf16>
    %1 = arith.extf %0 : vector<32x32xbf16> to vector<32x32xf32>
    %cst = arith.constant dense<0.000000e+00> : vector<32xf32>
    %2 = vector.multi_reduction <add>, %1, %cst [1] : vector<32x32xf32> to vector<32xf32>
    %3 = vector.shape_cast %2 : vector<32xf32> to vector<32x1xf32>
    %cst_1 = arith.constant 3.200000e+01 : f32
    %4 = vector.broadcast %cst_1 : f32 to vector<32x1xf32>
    %5 = arith.divf %3, %4 : vector<32x1xf32>
    %6 = vector.broadcast %5 : vector<32x1xf32> to vector<32x32xf32>
    %7 = arith.subf %1, %6 : vector<32x32xf32>
    %8 = arith.mulf %7, %7 : vector<32x32xf32>
    %cst_2 = arith.constant dense<0.000000e+00> : vector<32xf32>
    %9 = vector.multi_reduction <add>, %8, %cst_2 [1] : vector<32x32xf32> to vector<32xf32>
    %10 = vector.shape_cast %9 : vector<32xf32> to vector<32x1xf32>
    %cst_3 = arith.constant 3.200000e+01 : f32
    %11 = vector.broadcast %cst_3 : f32 to vector<32x1xf32>
    %12 = arith.divf %10, %11 : vector<32x1xf32>
    %13 = vector.broadcast %5 : vector<32x1xf32> to vector<32x32xf32>
    %14 = arith.subf %1, %13 : vector<32x32xf32>
    %cst_4 = arith.constant 9.99999974E-6 : f32
    %15 = vector.broadcast %cst_4 : f32 to vector<32x1xf32>
    %16 = arith.addf %12, %15 : vector<32x1xf32>
    %17 = math.rsqrt %16 : vector<32x1xf32>
    %18 = vector.broadcast %17 : vector<32x1xf32> to vector<32x32xf32>
    %19 = arith.mulf %14, %18 : vector<32x32xf32>
    %c0_5 = arith.constant 0 : index
    %c0_6 = arith.constant 0 : index
    %20 = vector.load %arg2[%c0_5, %c0_6] : memref<1x32xbf16, #tpu.memory_space<vmem>>, vector<1x32xbf16>
    %21 = arith.extf %20 : vector<1x32xbf16> to vector<1x32xf32>
    %22 = vector.broadcast %21 : vector<1x32xf32> to vector<32x32xf32>
    %23 = arith.mulf %19, %22 : vector<32x32xf32>
    %c0_7 = arith.constant 0 : index
    %c0_8 = arith.constant 0 : index
    %24 = vector.load %arg3[%c0_7, %c0_8] : memref<1x32xbf16, #tpu.memory_space<vmem>>, vector<1x32xbf16>
    %25 = arith.extf %24 : vector<1x32xbf16> to vector<1x32xf32>
    %26 = vector.broadcast %25 : vector<1x32xf32> to vector<32x32xf32>
    %27 = arith.addf %23, %26 : vector<32x32xf32>
    %28 = arith.truncf %27 : vector<32x32xf32> to vector<32x32xbf16>
    %c0_9 = arith.constant 0 : index
    %c0_10 = arith.constant 0 : index
    %29 = vector.load %arg4[%c0_9, %c0_10] : memref<32x32xbf16, #tpu.memory_space<vmem>>, vector<32x32xbf16>
    tpu.vector_store %arg4[%c0_9, %c0_10], %28 {strides = array<i32>} : memref<32x32xbf16, #tpu.memory_space<vmem>>, vector<32x32xbf16>,
    return
  }
  func.func @transform_0(%arg0: i32) -> (i32, i32) {
    %c0_i32 = arith.constant 0 : i32
    %c0_i32_0 = arith.constant 0 : i32
    return %arg0, %c0_i32 : i32, i32
  }
  func.func @transform_1(%arg0: i32) -> (i32, i32) {
    %c0_i32 = arith.constant 0 : i32
    %c0_i32_0 = arith.constant 0 : i32
    %c0_i32_1 = arith.constant 0 : i32
    return %c0_i32, %c0_i32_0 : i32, i32
  }
  func.func @transform_2(%arg0: i32) -> (i32, i32) {
    %c0_i32 = arith.constant 0 : i32
    %c0_i32_0 = arith.constant 0 : i32
    %c0_i32_1 = arith.constant 0 : i32
    return %c0_i32, %c0_i32_0 : i32, i32
  }
  func.func @transform_3(%arg0: i32) -> (i32, i32) {
    %c0_i32 = arith.constant 0 : i32
    %c0_i32_0 = arith.constant 0 : i32
    return %arg0, %c0_i32 : i32, i32
  }
}

module attributes {stable_mosaic.version = 11 : i64} {
  func.func @kernel(%arg0: i32, %arg1: i32, %arg2: i32, %arg3: memref<32x128xbf16, #tpu.memory_space<vmem>>, %arg4: memref<128x128xbf16, #tpu.memory_space<vmem>>, %arg5: memref<1x128xf32, #tpu.memory_space<vmem>>, %arg6: memref<32x128xbf16, #tpu.memory_space<vmem>>, %arg7: memref<32x128xf32, #tpu.memory_space<vmem>>) attributes {dimension_semantics = [#tpu.dimension_semantics<parallel>, #tpu.dimension_semantics<parallel>, #tpu.dimension_semantics<arbitrary>], iteration_bounds = array<i64: 1, 1, 1>, scalar_prefetch = 0 : i64, scratch_operands = 1 : i64, tpu.core_type = #tpu.core_type<tc>, window_params = [{transform_indices = @transform_0, window_bounds = array<i64: 32, 128>}, {transform_indices = @transform_1, window_bounds = array<i64: 128, 128>}, {transform_indices = @transform_2, window_bounds = array<i64: 1, 128>}, {transform_indices = @transform_3, window_bounds = array<i64: 32, 128>}]} {
    %c0_i32 = arith.constant 0 : i32
    %0 = arith.cmpi eq, %arg2, %c0_i32 : i32
    %1 = arith.extui %0 : i1 to i32
    %c0_i32_0 = arith.constant 0 : i32
    %2 = arith.cmpi ne, %1, %c0_i32_0 : i32
    scf.if %2 {
      %cst_10 = arith.constant 0.000000e+00 : f32
      %12 = vector.broadcast %cst_10 : f32 to vector<32x128xf32>
      %c0_11 = arith.constant 0 : index
      %c0_12 = arith.constant 0 : index
      %13 = vector.load %arg7[%c0_11, %c0_12] : memref<32x128xf32, #tpu.memory_space<vmem>>, vector<32x128xf32>
      tpu.vector_store %arg7[%c0_11, %c0_12], %12 {strides = array<i32>} : memref<32x128xf32, #tpu.memory_space<vmem>>, vector<32x128xf32>,
    } else {
    }
    %c0 = arith.constant 0 : index
    %c0_1 = arith.constant 0 : index
    %3 = vector.load %arg7[%c0, %c0_1] : memref<32x128xf32, #tpu.memory_space<vmem>>, vector<32x128xf32>
    %c0_2 = arith.constant 0 : index
    %c0_3 = arith.constant 0 : index
    %4 = vector.load %arg3[%c0_2, %c0_3] : memref<32x128xbf16, #tpu.memory_space<vmem>>, vector<32x128xbf16>
    %c0_4 = arith.constant 0 : index
    %c0_5 = arith.constant 0 : index
    %5 = vector.load %arg4[%c0_4, %c0_5] : memref<128x128xbf16, #tpu.memory_space<vmem>>, vector<128x128xbf16>
    %cst = arith.constant dense<0.000000e+00> : vector<32x128xf32>
    %6 = tpu.matmul %4, %5, %cst {dimension_numbers = #tpu.dot_dimension_numbers<[1], [0], [0], [1], [0, 0, 1, 1], [], []>} : vector<32x128xbf16>, vector<128x128xbf16>, vector<32x128xf32> -> vector<32x128xf32>
    %7 = arith.addf %3, %6 : vector<32x128xf32>
    %c0_6 = arith.constant 0 : index
    %c0_7 = arith.constant 0 : index
    %8 = vector.load %arg7[%c0_6, %c0_7] : memref<32x128xf32, #tpu.memory_space<vmem>>, vector<32x128xf32>
    tpu.vector_store %arg7[%c0_6, %c0_7], %7 {strides = array<i32>} : memref<32x128xf32, #tpu.memory_space<vmem>>, vector<32x128xf32>,
    %c0_i32_8 = arith.constant 0 : i32
    %9 = arith.cmpi eq, %arg2, %c0_i32_8 : i32
    %10 = arith.extui %9 : i1 to i32
    %c0_i32_9 = arith.constant 0 : i32
    %11 = arith.cmpi ne, %10, %c0_i32_9 : i32
    scf.if %11 {
      %c0_10 = arith.constant 0 : index
      %c0_11 = arith.constant 0 : index
      %12 = vector.load %arg7[%c0_10, %c0_11] : memref<32x128xf32, #tpu.memory_space<vmem>>, vector<32x128xf32>
      %c0_12 = arith.constant 0 : index
      %c0_13 = arith.constant 0 : index
      %13 = vector.load %arg5[%c0_12, %c0_13] : memref<1x128xf32, #tpu.memory_space<vmem>>, vector<1x128xf32>
      %14 = vector.broadcast %13 : vector<1x128xf32> to vector<32x128xf32>
      %15 = arith.addf %12, %14 : vector<32x128xf32>
      %16 = arith.truncf %15 : vector<32x128xf32> to vector<32x128xbf16>
      %c0_14 = arith.constant 0 : index
      %c0_15 = arith.constant 0 : index
      %17 = vector.load %arg6[%c0_14, %c0_15] : memref<32x128xbf16, #tpu.memory_space<vmem>>, vector<32x128xbf16>
      tpu.vector_store %arg6[%c0_14, %c0_15], %16 {strides = array<i32>} : memref<32x128xbf16, #tpu.memory_space<vmem>>, vector<32x128xbf16>,
    } else {
    }
    return
  }
  func.func @transform_0(%arg0: i32, %arg1: i32, %arg2: i32) -> (i32, i32) {
    %c0_i32 = arith.constant 0 : i32
    return %arg0, %arg2 : i32, i32
  }
  func.func @transform_1(%arg0: i32, %arg1: i32, %arg2: i32) -> (i32, i32) {
    %c0_i32 = arith.constant 0 : i32
    return %arg2, %arg1 : i32, i32
  }
  func.func @transform_2(%arg0: i32, %arg1: i32, %arg2: i32) -> (i32, i32) {
    %c0_i32 = arith.constant 0 : i32
    %c0_i32_0 = arith.constant 0 : i32
    return %c0_i32, %arg1 : i32, i32
  }
  func.func @transform_3(%arg0: i32, %arg1: i32, %arg2: i32) -> (i32, i32) {
    %c0_i32 = arith.constant 0 : i32
    return %arg0, %arg1 : i32, i32
  }
}

module attributes {stable_mosaic.version = 11 : i64} {
  func.func @kernel(%arg0: i32, %arg1: i32, %arg2: i32, %arg3: memref<32x128xbf16, #tpu.memory_space<vmem>>, %arg4: memref<128x128xbf16, #tpu.memory_space<vmem>>, %arg5: memref<1x128xf32, #tpu.memory_space<vmem>>, %arg6: memref<32x128xbf16, #tpu.memory_space<vmem>>, %arg7: memref<32x128xbf16, #tpu.memory_space<vmem>>, %arg8: memref<32x128xf32, #tpu.memory_space<vmem>>) attributes {dimension_semantics = [#tpu.dimension_semantics<parallel>, #tpu.dimension_semantics<parallel>, #tpu.dimension_semantics<arbitrary>], iteration_bounds = array<i64: 1, 1, 1>, scalar_prefetch = 0 : i64, scratch_operands = 1 : i64, tpu.core_type = #tpu.core_type<tc>, window_params = [{transform_indices = @transform_0, window_bounds = array<i64: 32, 128>}, {transform_indices = @transform_1, window_bounds = array<i64: 128, 128>}, {transform_indices = @transform_2, window_bounds = array<i64: 1, 128>}, {transform_indices = @transform_3, window_bounds = array<i64: 32, 128>}, {transform_indices = @transform_4, window_bounds = array<i64: 32, 128>}]} {
    %c0_i32 = arith.constant 0 : i32
    %0 = arith.cmpi eq, %arg2, %c0_i32 : i32
    %1 = arith.extui %0 : i1 to i32
    %c0_i32_0 = arith.constant 0 : i32
    %2 = arith.cmpi ne, %1, %c0_i32_0 : i32
    scf.if %2 {
      %cst_10 = arith.constant 0.000000e+00 : f32
      %12 = vector.broadcast %cst_10 : f32 to vector<32x128xf32>
      %c0_11 = arith.constant 0 : index
      %c0_12 = arith.constant 0 : index
      %13 = vector.load %arg8[%c0_11, %c0_12] : memref<32x128xf32, #tpu.memory_space<vmem>>, vector<32x128xf32>
      tpu.vector_store %arg8[%c0_11, %c0_12], %12 {strides = array<i32>} : memref<32x128xf32, #tpu.memory_space<vmem>>, vector<32x128xf32>,
    } else {
    }
    %c0 = arith.constant 0 : index
    %c0_1 = arith.constant 0 : index
    %3 = vector.load %arg8[%c0, %c0_1] : memref<32x128xf32, #tpu.memory_space<vmem>>, vector<32x128xf32>
    %c0_2 = arith.constant 0 : index
    %c0_3 = arith.constant 0 : index
    %4 = vector.load %arg3[%c0_2, %c0_3] : memref<32x128xbf16, #tpu.memory_space<vmem>>, vector<32x128xbf16>
    %c0_4 = arith.constant 0 : index
    %c0_5 = arith.constant 0 : index
    %5 = vector.load %arg4[%c0_4, %c0_5] : memref<128x128xbf16, #tpu.memory_space<vmem>>, vector<128x128xbf16>
    %cst = arith.constant dense<0.000000e+00> : vector<32x128xf32>
    %6 = tpu.matmul %4, %5, %cst {dimension_numbers = #tpu.dot_dimension_numbers<[1], [0], [0], [1], [0, 0, 1, 1], [], []>} : vector<32x128xbf16>, vector<128x128xbf16>, vector<32x128xf32> -> vector<32x128xf32>
    %7 = arith.addf %3, %6 : vector<32x128xf32>
    %c0_6 = arith.constant 0 : index
    %c0_7 = arith.constant 0 : index
    %8 = vector.load %arg8[%c0_6, %c0_7] : memref<32x128xf32, #tpu.memory_space<vmem>>, vector<32x128xf32>
    tpu.vector_store %arg8[%c0_6, %c0_7], %7 {strides = array<i32>} : memref<32x128xf32, #tpu.memory_space<vmem>>, vector<32x128xf32>,
    %c0_i32_8 = arith.constant 0 : i32
    %9 = arith.cmpi eq, %arg2, %c0_i32_8 : i32
    %10 = arith.extui %9 : i1 to i32
    %c0_i32_9 = arith.constant 0 : i32
    %11 = arith.cmpi ne, %10, %c0_i32_9 : i32
    scf.if %11 {
      %c0_10 = arith.constant 0 : index
      %c0_11 = arith.constant 0 : index
      %12 = vector.load %arg8[%c0_10, %c0_11] : memref<32x128xf32, #tpu.memory_space<vmem>>, vector<32x128xf32>
      %c0_12 = arith.constant 0 : index
      %c0_13 = arith.constant 0 : index
      %13 = vector.load %arg5[%c0_12, %c0_13] : memref<1x128xf32, #tpu.memory_space<vmem>>, vector<1x128xf32>
      %14 = vector.broadcast %13 : vector<1x128xf32> to vector<32x128xf32>
      %15 = arith.addf %12, %14 : vector<32x128xf32>
      %c0_14 = arith.constant 0 : index
      %c0_15 = arith.constant 0 : index
      %16 = vector.load %arg6[%c0_14, %c0_15] : memref<32x128xbf16, #tpu.memory_space<vmem>>, vector<32x128xbf16>
      %17 = arith.extf %16 : vector<32x128xbf16> to vector<32x128xf32>
      %18 = arith.addf %15, %17 : vector<32x128xf32>
      %19 = arith.truncf %18 : vector<32x128xf32> to vector<32x128xbf16>
      %c0_16 = arith.constant 0 : index
      %c0_17 = arith.constant 0 : index
      %20 = vector.load %arg7[%c0_16, %c0_17] : memref<32x128xbf16, #tpu.memory_space<vmem>>, vector<32x128xbf16>
      tpu.vector_store %arg7[%c0_16, %c0_17], %19 {strides = array<i32>} : memref<32x128xbf16, #tpu.memory_space<vmem>>, vector<32x128xbf16>,
    } else {
    }
    return
  }
  func.func @transform_0(%arg0: i32, %arg1: i32, %arg2: i32) -> (i32, i32) {
    %c0_i32 = arith.constant 0 : i32
    return %arg0, %arg2 : i32, i32
  }
  func.func @transform_1(%arg0: i32, %arg1: i32, %arg2: i32) -> (i32, i32) {
    %c0_i32 = arith.constant 0 : i32
    return %arg2, %arg1 : i32, i32
  }
  func.func @transform_2(%arg0: i32, %arg1: i32, %arg2: i32) -> (i32, i32) {
    %c0_i32 = arith.constant 0 : i32
    %c0_i32_0 = arith.constant 0 : i32
    return %c0_i32, %arg1 : i32, i32
  }
  func.func @transform_3(%arg0: i32, %arg1: i32, %arg2: i32) -> (i32, i32) {
    %c0_i32 = arith.constant 0 : i32
    return %arg0, %arg1 : i32, i32
  }
  func.func @transform_4(%arg0: i32, %arg1: i32, %arg2: i32) -> (i32, i32) {
    %c0_i32 = arith.constant 0 : i32
    return %arg0, %arg1 : i32, i32
  }
}

module attributes {stable_mosaic.version = 11 : i64} {
  func.func @kernel(%arg0: i32, %arg1: i32, %arg2: i32, %arg3: memref<1x16x32xbf16, #tpu.memory_space<vmem>>, %arg4: memref<1x16x64xbf16, #tpu.memory_space<vmem>>, %arg5: memref<1x16x32xbf16, #tpu.memory_space<vmem>>, %arg6: memref<16x4xf32, #tpu.memory_space<vmem>>, %arg7: memref<16x4xf32, #tpu.memory_space<vmem>>, %arg8: memref<16x32xf32, #tpu.memory_space<vmem>>) attributes {dimension_semantics = [#tpu.dimension_semantics<parallel>, #tpu.dimension_semantics<parallel>, #tpu.dimension_semantics<arbitrary>], iteration_bounds = array<i64: 2, 1, 1>, scalar_prefetch = 0 : i64, scratch_operands = 3 : i64, tpu.core_type = #tpu.core_type<tc>, window_params = [{transform_indices = @transform_0, window_bounds = array<i64: 1, 16, 32>}, {transform_indices = @transform_1, window_bounds = array<i64: 1, 16, 64>}, {transform_indices = @transform_2, window_bounds = array<i64: 1, 16, 32>}]} {
    %c0_i32 = arith.constant 0 : i32
    %0 = arith.cmpi eq, %arg2, %c0_i32 : i32
    %1 = arith.extui %0 : i1 to i32
    %c0_i32_0 = arith.constant 0 : i32
    %2 = arith.cmpi ne, %1, %c0_i32_0 : i32
    scf.if %2 {
      %cst_91 = arith.constant -1.000000e+30 : f32
      %126 = vector.broadcast %cst_91 : f32 to vector<16x4xf32>
      %c0_92 = arith.constant 0 : index
      %c0_93 = arith.constant 0 : index
      %127 = vector.load %arg6[%c0_92, %c0_93] : memref<16x4xf32, #tpu.memory_space<vmem>>, vector<16x4xf32>
      tpu.vector_store %arg6[%c0_92, %c0_93], %126 {strides = array<i32>} : memref<16x4xf32, #tpu.memory_space<vmem>>, vector<16x4xf32>,
      %cst_94 = arith.constant 0.000000e+00 : f32
      %128 = vector.broadcast %cst_94 : f32 to vector<16x4xf32>
      %c0_95 = arith.constant 0 : index
      %c0_96 = arith.constant 0 : index
      %129 = vector.load %arg7[%c0_95, %c0_96] : memref<16x4xf32, #tpu.memory_space<vmem>>, vector<16x4xf32>
      tpu.vector_store %arg7[%c0_95, %c0_96], %128 {strides = array<i32>} : memref<16x4xf32, #tpu.memory_space<vmem>>, vector<16x4xf32>,
      %cst_97 = arith.constant 0.000000e+00 : f32
      %130 = vector.broadcast %cst_97 : f32 to vector<16x32xf32>
      %c0_98 = arith.constant 0 : index
      %c0_99 = arith.constant 0 : index
      %131 = vector.load %arg8[%c0_98, %c0_99] : memref<16x32xf32, #tpu.memory_space<vmem>>, vector<16x32xf32>
      tpu.vector_store %arg8[%c0_98, %c0_99], %130 {strides = array<i32>} : memref<16x32xf32, #tpu.memory_space<vmem>>, vector<16x32xf32>,
    } else {
    }
    %c0 = arith.constant 0 : index
    %c0_1 = arith.constant 0 : index
    %c0_2 = arith.constant 0 : index
    %3 = vector.load %arg3[%c0, %c0_1, %c0_2] : memref<1x16x32xbf16, #tpu.memory_space<vmem>>, vector<1x16x8xbf16>
    %4 = vector.shape_cast %3 : vector<1x16x8xbf16> to vector<16x8xbf16>
    %c0_3 = arith.constant 0 : index
    %c0_4 = arith.constant 0 : index
    %c0_5 = arith.constant 0 : index
    %5 = vector.load %arg4[%c0_3, %c0_4, %c0_5] : memref<1x16x64xbf16, #tpu.memory_space<vmem>>, vector<1x16x8xbf16>
    %6 = vector.shape_cast %5 : vector<1x16x8xbf16> to vector<16x8xbf16>
    %c0_6 = arith.constant 0 : index
    %c0_7 = arith.constant 0 : index
    %c32 = arith.constant 32 : index
    %7 = vector.load %arg4[%c0_6, %c0_7, %c32] : memref<1x16x64xbf16, #tpu.memory_space<vmem>>, vector<1x16x8xbf16>
    %8 = vector.shape_cast %7 : vector<1x16x8xbf16> to vector<16x8xbf16>
    %cst = arith.constant dense<0.000000e+00> : vector<16x16xf32>
    %9 = tpu.matmul %4, %6, %cst {dimension_numbers = #tpu.dot_dimension_numbers<[1], [1], [0], [0], [0, 0, 1, 0], [], []>} : vector<16x8xbf16>, vector<16x8xbf16>, vector<16x16xf32> -> vector<16x16xf32>
    %c0_8 = arith.constant 0 : index
    %c0_9 = arith.constant 0 : index
    %10 = vector.load %arg6[%c0_8, %c0_9] : memref<16x4xf32, #tpu.memory_space<vmem>>, vector<16x1xf32>
    %c0_10 = arith.constant 0 : index
    %c0_11 = arith.constant 0 : index
    %11 = vector.load %arg7[%c0_10, %c0_11] : memref<16x4xf32, #tpu.memory_space<vmem>>, vector<16x1xf32>
    %cst_12 = arith.constant dense<0xFF800000> : vector<16xf32>
    %12 = vector.multi_reduction <maximumf>, %9, %cst_12 [1] : vector<16x16xf32> to vector<16xf32>
    %13 = vector.shape_cast %12 : vector<16xf32> to vector<16x1xf32>
    %14 = arith.maximumf %10, %13 : vector<16x1xf32>
    %15 = arith.subf %10, %14 : vector<16x1xf32>
    %16 = math.exp %15 : vector<16x1xf32>
    %17 = vector.broadcast %14 : vector<16x1xf32> to vector<16x16xf32>
    %18 = arith.subf %9, %17 : vector<16x16xf32>
    %19 = math.exp %18 : vector<16x16xf32>
    %20 = arith.mulf %16, %11 : vector<16x1xf32>
    %cst_13 = arith.constant dense<0.000000e+00> : vector<16xf32>
    %21 = vector.multi_reduction <add>, %19, %cst_13 [1] : vector<16x16xf32> to vector<16xf32>
    %22 = vector.shape_cast %21 : vector<16xf32> to vector<16x1xf32>
    %23 = arith.addf %20, %22 : vector<16x1xf32>
    %c0_14 = arith.constant 0 : index
    %c0_15 = arith.constant 0 : index
    %24 = vector.load %arg7[%c0_14, %c0_15] : memref<16x4xf32, #tpu.memory_space<vmem>>, vector<16x1xf32>
    tpu.vector_store %arg7[%c0_14, %c0_15], %23 {strides = array<i32>} : memref<16x4xf32, #tpu.memory_space<vmem>>, vector<16x1xf32>,
    %c0_16 = arith.constant 0 : index
    %c0_17 = arith.constant 0 : index
    %25 = vector.load %arg6[%c0_16, %c0_17] : memref<16x4xf32, #tpu.memory_space<vmem>>, vector<16x1xf32>
    tpu.vector_store %arg6[%c0_16, %c0_17], %14 {strides = array<i32>} : memref<16x4xf32, #tpu.memory_space<vmem>>, vector<16x1xf32>,
    %26 = arith.truncf %19 : vector<16x16xf32> to vector<16x16xbf16>
    %cst_18 = arith.constant dense<0.000000e+00> : vector<16x8xf32>
    %27 = tpu.matmul %26, %8, %cst_18 {dimension_numbers = #tpu.dot_dimension_numbers<[1], [0], [0], [1], [0, 0, 1, 1], [], []>} : vector<16x16xbf16>, vector<16x8xbf16>, vector<16x8xf32> -> vector<16x8xf32>
    %c0_19 = arith.constant 0 : index
    %c0_20 = arith.constant 0 : index
    %28 = vector.load %arg8[%c0_19, %c0_20] : memref<16x32xf32, #tpu.memory_space<vmem>>, vector<16x8xf32>
    %29 = vector.broadcast %16 : vector<16x1xf32> to vector<16x8xf32>
    %30 = arith.mulf %29, %28 : vector<16x8xf32>
    %31 = arith.addf %30, %27 : vector<16x8xf32>
    %c0_21 = arith.constant 0 : index
    %c0_22 = arith.constant 0 : index
    %32 = vector.load %arg8[%c0_21, %c0_22] : memref<16x32xf32, #tpu.memory_space<vmem>>, vector<16x8xf32>
    tpu.vector_store %arg8[%c0_21, %c0_22], %31 {strides = array<i32>} : memref<16x32xf32, #tpu.memory_space<vmem>>, vector<16x8xf32>,
    %c0_23 = arith.constant 0 : index
    %c0_24 = arith.constant 0 : index
    %c8 = arith.constant 8 : index
    %33 = vector.load %arg3[%c0_23, %c0_24, %c8] : memref<1x16x32xbf16, #tpu.memory_space<vmem>>, vector<1x16x8xbf16>
    %34 = vector.shape_cast %33 : vector<1x16x8xbf16> to vector<16x8xbf16>
    %c0_25 = arith.constant 0 : index
    %c0_26 = arith.constant 0 : index
    %c8_27 = arith.constant 8 : index
    %35 = vector.load %arg4[%c0_25, %c0_26, %c8_27] : memref<1x16x64xbf16, #tpu.memory_space<vmem>>, vector<1x16x8xbf16>
    %36 = vector.shape_cast %35 : vector<1x16x8xbf16> to vector<16x8xbf16>
    %c0_28 = arith.constant 0 : index
    %c0_29 = arith.constant 0 : index
    %c40 = arith.constant 40 : index
    %37 = vector.load %arg4[%c0_28, %c0_29, %c40] : memref<1x16x64xbf16, #tpu.memory_space<vmem>>, vector<1x16x8xbf16>
    %38 = vector.shape_cast %37 : vector<1x16x8xbf16> to vector<16x8xbf16>
    %cst_30 = arith.constant dense<0.000000e+00> : vector<16x16xf32>
    %39 = tpu.matmul %34, %36, %cst_30 {dimension_numbers = #tpu.dot_dimension_numbers<[1], [1], [0], [0], [0, 0, 1, 0], [], []>} : vector<16x8xbf16>, vector<16x8xbf16>, vector<16x16xf32> -> vector<16x16xf32>
    %c0_31 = arith.constant 0 : index
    %c1 = arith.constant 1 : index
    %40 = vector.load %arg6[%c0_31, %c1] : memref<16x4xf32, #tpu.memory_space<vmem>>, vector<16x1xf32>
    %c0_32 = arith.constant 0 : index
    %c1_33 = arith.constant 1 : index
    %41 = vector.load %arg7[%c0_32, %c1_33] : memref<16x4xf32, #tpu.memory_space<vmem>>, vector<16x1xf32>
    %cst_34 = arith.constant dense<0xFF800000> : vector<16xf32>
    %42 = vector.multi_reduction <maximumf>, %39, %cst_34 [1] : vector<16x16xf32> to vector<16xf32>
    %43 = vector.shape_cast %42 : vector<16xf32> to vector<16x1xf32>
    %44 = arith.maximumf %40, %43 : vector<16x1xf32>
    %45 = arith.subf %40, %44 : vector<16x1xf32>
    %46 = math.exp %45 : vector<16x1xf32>
    %47 = vector.broadcast %44 : vector<16x1xf32> to vector<16x16xf32>
    %48 = arith.subf %39, %47 : vector<16x16xf32>
    %49 = math.exp %48 : vector<16x16xf32>
    %50 = arith.mulf %46, %41 : vector<16x1xf32>
    %cst_35 = arith.constant dense<0.000000e+00> : vector<16xf32>
    %51 = vector.multi_reduction <add>, %49, %cst_35 [1] : vector<16x16xf32> to vector<16xf32>
    %52 = vector.shape_cast %51 : vector<16xf32> to vector<16x1xf32>
    %53 = arith.addf %50, %52 : vector<16x1xf32>
    %c0_36 = arith.constant 0 : index
    %c1_37 = arith.constant 1 : index
    %54 = vector.load %arg7[%c0_36, %c1_37] : memref<16x4xf32, #tpu.memory_space<vmem>>, vector<16x1xf32>
    tpu.vector_store %arg7[%c0_36, %c1_37], %53 {strides = array<i32>} : memref<16x4xf32, #tpu.memory_space<vmem>>, vector<16x1xf32>,
    %c0_38 = arith.constant 0 : index
    %c1_39 = arith.constant 1 : index
    %55 = vector.load %arg6[%c0_38, %c1_39] : memref<16x4xf32, #tpu.memory_space<vmem>>, vector<16x1xf32>
    tpu.vector_store %arg6[%c0_38, %c1_39], %44 {strides = array<i32>} : memref<16x4xf32, #tpu.memory_space<vmem>>, vector<16x1xf32>,
    %56 = arith.truncf %49 : vector<16x16xf32> to vector<16x16xbf16>
    %cst_40 = arith.constant dense<0.000000e+00> : vector<16x8xf32>
    %57 = tpu.matmul %56, %38, %cst_40 {dimension_numbers = #tpu.dot_dimension_numbers<[1], [0], [0], [1], [0, 0, 1, 1], [], []>} : vector<16x16xbf16>, vector<16x8xbf16>, vector<16x8xf32> -> vector<16x8xf32>
    %c0_41 = arith.constant 0 : index
    %c8_42 = arith.constant 8 : index
    %58 = vector.load %arg8[%c0_41, %c8_42] : memref<16x32xf32, #tpu.memory_space<vmem>>, vector<16x8xf32>
    %59 = vector.broadcast %46 : vector<16x1xf32> to vector<16x8xf32>
    %60 = arith.mulf %59, %58 : vector<16x8xf32>
    %61 = arith.addf %60, %57 : vector<16x8xf32>
    %c0_43 = arith.constant 0 : index
    %c8_44 = arith.constant 8 : index
    %62 = vector.load %arg8[%c0_43, %c8_44] : memref<16x32xf32, #tpu.memory_space<vmem>>, vector<16x8xf32>
    tpu.vector_store %arg8[%c0_43, %c8_44], %61 {strides = array<i32>} : memref<16x32xf32, #tpu.memory_space<vmem>>, vector<16x8xf32>,
    %c0_45 = arith.constant 0 : index
    %c0_46 = arith.constant 0 : index
    %c16 = arith.constant 16 : index
    %63 = vector.load %arg3[%c0_45, %c0_46, %c16] : memref<1x16x32xbf16, #tpu.memory_space<vmem>>, vector<1x16x8xbf16>
    %64 = vector.shape_cast %63 : vector<1x16x8xbf16> to vector<16x8xbf16>
    %c0_47 = arith.constant 0 : index
    %c0_48 = arith.constant 0 : index
    %c16_49 = arith.constant 16 : index
    %65 = vector.load %arg4[%c0_47, %c0_48, %c16_49] : memref<1x16x64xbf16, #tpu.memory_space<vmem>>, vector<1x16x8xbf16>
    %66 = vector.shape_cast %65 : vector<1x16x8xbf16> to vector<16x8xbf16>
    %c0_50 = arith.constant 0 : index
    %c0_51 = arith.constant 0 : index
    %c48 = arith.constant 48 : index
    %67 = vector.load %arg4[%c0_50, %c0_51, %c48] : memref<1x16x64xbf16, #tpu.memory_space<vmem>>, vector<1x16x8xbf16>
    %68 = vector.shape_cast %67 : vector<1x16x8xbf16> to vector<16x8xbf16>
    %cst_52 = arith.constant dense<0.000000e+00> : vector<16x16xf32>
    %69 = tpu.matmul %64, %66, %cst_52 {dimension_numbers = #tpu.dot_dimension_numbers<[1], [1], [0], [0], [0, 0, 1, 0], [], []>} : vector<16x8xbf16>, vector<16x8xbf16>, vector<16x16xf32> -> vector<16x16xf32>
    %c0_53 = arith.constant 0 : index
    %c2 = arith.constant 2 : index
    %70 = vector.load %arg6[%c0_53, %c2] : memref<16x4xf32, #tpu.memory_space<vmem>>, vector<16x1xf32>
    %c0_54 = arith.constant 0 : index
    %c2_55 = arith.constant 2 : index
    %71 = vector.load %arg7[%c0_54, %c2_55] : memref<16x4xf32, #tpu.memory_space<vmem>>, vector<16x1xf32>
    %cst_56 = arith.constant dense<0xFF800000> : vector<16xf32>
    %72 = vector.multi_reduction <maximumf>, %69, %cst_56 [1] : vector<16x16xf32> to vector<16xf32>
    %73 = vector.shape_cast %72 : vector<16xf32> to vector<16x1xf32>
    %74 = arith.maximumf %70, %73 : vector<16x1xf32>
    %75 = arith.subf %70, %74 : vector<16x1xf32>
    %76 = math.exp %75 : vector<16x1xf32>
    %77 = vector.broadcast %74 : vector<16x1xf32> to vector<16x16xf32>
    %78 = arith.subf %69, %77 : vector<16x16xf32>
    %79 = math.exp %78 : vector<16x16xf32>
    %80 = arith.mulf %76, %71 : vector<16x1xf32>
    %cst_57 = arith.constant dense<0.000000e+00> : vector<16xf32>
    %81 = vector.multi_reduction <add>, %79, %cst_57 [1] : vector<16x16xf32> to vector<16xf32>
    %82 = vector.shape_cast %81 : vector<16xf32> to vector<16x1xf32>
    %83 = arith.addf %80, %82 : vector<16x1xf32>
    %c0_58 = arith.constant 0 : index
    %c2_59 = arith.constant 2 : index
    %84 = vector.load %arg7[%c0_58, %c2_59] : memref<16x4xf32, #tpu.memory_space<vmem>>, vector<16x1xf32>
    tpu.vector_store %arg7[%c0_58, %c2_59], %83 {strides = array<i32>} : memref<16x4xf32, #tpu.memory_space<vmem>>, vector<16x1xf32>,
    %c0_60 = arith.constant 0 : index
    %c2_61 = arith.constant 2 : index
    %85 = vector.load %arg6[%c0_60, %c2_61] : memref<16x4xf32, #tpu.memory_space<vmem>>, vector<16x1xf32>
    tpu.vector_store %arg6[%c0_60, %c2_61], %74 {strides = array<i32>} : memref<16x4xf32, #tpu.memory_space<vmem>>, vector<16x1xf32>,
    %86 = arith.truncf %79 : vector<16x16xf32> to vector<16x16xbf16>
    %cst_62 = arith.constant dense<0.000000e+00> : vector<16x8xf32>
    %87 = tpu.matmul %86, %68, %cst_62 {dimension_numbers = #tpu.dot_dimension_numbers<[1], [0], [0], [1], [0, 0, 1, 1], [], []>} : vector<16x16xbf16>, vector<16x8xbf16>, vector<16x8xf32> -> vector<16x8xf32>
    %c0_63 = arith.constant 0 : index
    %c16_64 = arith.constant 16 : index
    %88 = vector.load %arg8[%c0_63, %c16_64] : memref<16x32xf32, #tpu.memory_space<vmem>>, vector<16x8xf32>
    %89 = vector.broadcast %76 : vector<16x1xf32> to vector<16x8xf32>
    %90 = arith.mulf %89, %88 : vector<16x8xf32>
    %91 = arith.addf %90, %87 : vector<16x8xf32>
    %c0_65 = arith.constant 0 : index
    %c16_66 = arith.constant 16 : index
    %92 = vector.load %arg8[%c0_65, %c16_66] : memref<16x32xf32, #tpu.memory_space<vmem>>, vector<16x8xf32>
    tpu.vector_store %arg8[%c0_65, %c16_66], %91 {strides = array<i32>} : memref<16x32xf32, #tpu.memory_space<vmem>>, vector<16x8xf32>,
    %c0_67 = arith.constant 0 : index
    %c0_68 = arith.constant 0 : index
    %c24 = arith.constant 24 : index
    %93 = vector.load %arg3[%c0_67, %c0_68, %c24] : memref<1x16x32xbf16, #tpu.memory_space<vmem>>, vector<1x16x8xbf16>
    %94 = vector.shape_cast %93 : vector<1x16x8xbf16> to vector<16x8xbf16>
    %c0_69 = arith.constant 0 : index
    %c0_70 = arith.constant 0 : index
    %c24_71 = arith.constant 24 : index
    %95 = vector.load %arg4[%c0_69, %c0_70, %c24_71] : memref<1x16x64xbf16, #tpu.memory_space<vmem>>, vector<1x16x8xbf16>
    %96 = vector.shape_cast %95 : vector<1x16x8xbf16> to vector<16x8xbf16>
    %c0_72 = arith.constant 0 : index
    %c0_73 = arith.constant 0 : index
    %c56 = arith.constant 56 : index
    %97 = vector.load %arg4[%c0_72, %c0_73, %c56] : memref<1x16x64xbf16, #tpu.memory_space<vmem>>, vector<1x16x8xbf16>
    %98 = vector.shape_cast %97 : vector<1x16x8xbf16> to vector<16x8xbf16>
    %cst_74 = arith.constant dense<0.000000e+00> : vector<16x16xf32>
    %99 = tpu.matmul %94, %96, %cst_74 {dimension_numbers = #tpu.dot_dimension_numbers<[1], [1], [0], [0], [0, 0, 1, 0], [], []>} : vector<16x8xbf16>, vector<16x8xbf16>, vector<16x16xf32> -> vector<16x16xf32>
    %c0_75 = arith.constant 0 : index
    %c3 = arith.constant 3 : index
    %100 = vector.load %arg6[%c0_75, %c3] : memref<16x4xf32, #tpu.memory_space<vmem>>, vector<16x1xf32>
    %c0_76 = arith.constant 0 : index
    %c3_77 = arith.constant 3 : index
    %101 = vector.load %arg7[%c0_76, %c3_77] : memref<16x4xf32, #tpu.memory_space<vmem>>, vector<16x1xf32>
    %cst_78 = arith.constant dense<0xFF800000> : vector<16xf32>
    %102 = vector.multi_reduction <maximumf>, %99, %cst_78 [1] : vector<16x16xf32> to vector<16xf32>
    %103 = vector.shape_cast %102 : vector<16xf32> to vector<16x1xf32>
    %104 = arith.maximumf %100, %103 : vector<16x1xf32>
    %105 = arith.subf %100, %104 : vector<16x1xf32>
    %106 = math.exp %105 : vector<16x1xf32>
    %107 = vector.broadcast %104 : vector<16x1xf32> to vector<16x16xf32>
    %108 = arith.subf %99, %107 : vector<16x16xf32>
    %109 = math.exp %108 : vector<16x16xf32>
    %110 = arith.mulf %106, %101 : vector<16x1xf32>
    %cst_79 = arith.constant dense<0.000000e+00> : vector<16xf32>
    %111 = vector.multi_reduction <add>, %109, %cst_79 [1] : vector<16x16xf32> to vector<16xf32>
    %112 = vector.shape_cast %111 : vector<16xf32> to vector<16x1xf32>
    %113 = arith.addf %110, %112 : vector<16x1xf32>
    %c0_80 = arith.constant 0 : index
    %c3_81 = arith.constant 3 : index
    %114 = vector.load %arg7[%c0_80, %c3_81] : memref<16x4xf32, #tpu.memory_space<vmem>>, vector<16x1xf32>
    tpu.vector_store %arg7[%c0_80, %c3_81], %113 {strides = array<i32>} : memref<16x4xf32, #tpu.memory_space<vmem>>, vector<16x1xf32>,
    %c0_82 = arith.constant 0 : index
    %c3_83 = arith.constant 3 : index
    %115 = vector.load %arg6[%c0_82, %c3_83] : memref<16x4xf32, #tpu.memory_space<vmem>>, vector<16x1xf32>
    tpu.vector_store %arg6[%c0_82, %c3_83], %104 {strides = array<i32>} : memref<16x4xf32, #tpu.memory_space<vmem>>, vector<16x1xf32>,
    %116 = arith.truncf %109 : vector<16x16xf32> to vector<16x16xbf16>
    %cst_84 = arith.constant dense<0.000000e+00> : vector<16x8xf32>
    %117 = tpu.matmul %116, %98, %cst_84 {dimension_numbers = #tpu.dot_dimension_numbers<[1], [0], [0], [1], [0, 0, 1, 1], [], []>} : vector<16x16xbf16>, vector<16x8xbf16>, vector<16x8xf32> -> vector<16x8xf32>
    %c0_85 = arith.constant 0 : index
    %c24_86 = arith.constant 24 : index
    %118 = vector.load %arg8[%c0_85, %c24_86] : memref<16x32xf32, #tpu.memory_space<vmem>>, vector<16x8xf32>
    %119 = vector.broadcast %106 : vector<16x1xf32> to vector<16x8xf32>
    %120 = arith.mulf %119, %118 : vector<16x8xf32>
    %121 = arith.addf %120, %117 : vector<16x8xf32>
    %c0_87 = arith.constant 0 : index
    %c24_88 = arith.constant 24 : index
    %122 = vector.load %arg8[%c0_87, %c24_88] : memref<16x32xf32, #tpu.memory_space<vmem>>, vector<16x8xf32>
    tpu.vector_store %arg8[%c0_87, %c24_88], %121 {strides = array<i32>} : memref<16x32xf32, #tpu.memory_space<vmem>>, vector<16x8xf32>,
    %c0_i32_89 = arith.constant 0 : i32
    %123 = arith.cmpi eq, %arg2, %c0_i32_89 : i32
    %124 = arith.extui %123 : i1 to i32
    %c0_i32_90 = arith.constant 0 : i32
    %125 = arith.cmpi ne, %124, %c0_i32_90 : i32
    scf.if %125 {
      %c0_91 = arith.constant 0 : index
      %c0_92 = arith.constant 0 : index
      %126 = vector.load %arg7[%c0_91, %c0_92] : memref<16x4xf32, #tpu.memory_space<vmem>>, vector<16x1xf32>
      %127 = tpu.reciprocal %126 {approx = true} : vector<16x1xf32> -> vector<16x1xf32>
      %c0_93 = arith.constant 0 : index
      %c0_94 = arith.constant 0 : index
      %128 = vector.load %arg8[%c0_93, %c0_94] : memref<16x32xf32, #tpu.memory_space<vmem>>, vector<16x8xf32>
      %129 = vector.broadcast %127 : vector<16x1xf32> to vector<16x8xf32>
      %130 = arith.mulf %128, %129 : vector<16x8xf32>
      %c0_95 = arith.constant 0 : index
      %c0_96 = arith.constant 0 : index
      %131 = vector.load %arg8[%c0_95, %c0_96] : memref<16x32xf32, #tpu.memory_space<vmem>>, vector<16x8xf32>
      tpu.vector_store %arg8[%c0_95, %c0_96], %130 {strides = array<i32>} : memref<16x32xf32, #tpu.memory_space<vmem>>, vector<16x8xf32>,
      %c0_97 = arith.constant 0 : index
      %c1_98 = arith.constant 1 : index
      %132 = vector.load %arg7[%c0_97, %c1_98] : memref<16x4xf32, #tpu.memory_space<vmem>>, vector<16x1xf32>
      %133 = tpu.reciprocal %132 {approx = true} : vector<16x1xf32> -> vector<16x1xf32>
      %c0_99 = arith.constant 0 : index
      %c8_100 = arith.constant 8 : index
      %134 = vector.load %arg8[%c0_99, %c8_100] : memref<16x32xf32, #tpu.memory_space<vmem>>, vector<16x8xf32>
      %135 = vector.broadcast %133 : vector<16x1xf32> to vector<16x8xf32>
      %136 = arith.mulf %134, %135 : vector<16x8xf32>
      %c0_101 = arith.constant 0 : index
      %c8_102 = arith.constant 8 : index
      %137 = vector.load %arg8[%c0_101, %c8_102] : memref<16x32xf32, #tpu.memory_space<vmem>>, vector<16x8xf32>
      tpu.vector_store %arg8[%c0_101, %c8_102], %136 {strides = array<i32>} : memref<16x32xf32, #tpu.memory_space<vmem>>, vector<16x8xf32>,
      %c0_103 = arith.constant 0 : index
      %c2_104 = arith.constant 2 : index
      %138 = vector.load %arg7[%c0_103, %c2_104] : memref<16x4xf32, #tpu.memory_space<vmem>>, vector<16x1xf32>
      %139 = tpu.reciprocal %138 {approx = true} : vector<16x1xf32> -> vector<16x1xf32>
      %c0_105 = arith.constant 0 : index
      %c16_106 = arith.constant 16 : index
      %140 = vector.load %arg8[%c0_105, %c16_106] : memref<16x32xf32, #tpu.memory_space<vmem>>, vector<16x8xf32>
      %141 = vector.broadcast %139 : vector<16x1xf32> to vector<16x8xf32>
      %142 = arith.mulf %140, %141 : vector<16x8xf32>
      %c0_107 = arith.constant 0 : index
      %c16_108 = arith.constant 16 : index
      %143 = vector.load %arg8[%c0_107, %c16_108] : memref<16x32xf32, #tpu.memory_space<vmem>>, vector<16x8xf32>
      tpu.vector_store %arg8[%c0_107, %c16_108], %142 {strides = array<i32>} : memref<16x32xf32, #tpu.memory_space<vmem>>, vector<16x8xf32>,
      %c0_109 = arith.constant 0 : index
      %c3_110 = arith.constant 3 : index
      %144 = vector.load %arg7[%c0_109, %c3_110] : memref<16x4xf32, #tpu.memory_space<vmem>>, vector<16x1xf32>
      %145 = tpu.reciprocal %144 {approx = true} : vector<16x1xf32> -> vector<16x1xf32>
      %c0_111 = arith.constant 0 : index
      %c24_112 = arith.constant 24 : index
      %146 = vector.load %arg8[%c0_111, %c24_112] : memref<16x32xf32, #tpu.memory_space<vmem>>, vector<16x8xf32>
      %147 = vector.broadcast %145 : vector<16x1xf32> to vector<16x8xf32>
      %148 = arith.mulf %146, %147 : vector<16x8xf32>
      %c0_113 = arith.constant 0 : index
      %c24_114 = arith.constant 24 : index
      %149 = vector.load %arg8[%c0_113, %c24_114] : memref<16x32xf32, #tpu.memory_space<vmem>>, vector<16x8xf32>
      tpu.vector_store %arg8[%c0_113, %c24_114], %148 {strides = array<i32>} : memref<16x32xf32, #tpu.memory_space<vmem>>, vector<16x8xf32>,
      %c0_115 = arith.constant 0 : index
      %c0_116 = arith.constant 0 : index
      %150 = vector.load %arg8[%c0_115, %c0_116] : memref<16x32xf32, #tpu.memory_space<vmem>>, vector<16x32xf32>
      %151 = arith.truncf %150 : vector<16x32xf32> to vector<16x32xbf16>
      %c0_117 = arith.constant 0 : index
      %c0_118 = arith.constant 0 : index
      %c0_119 = arith.constant 0 : index
      %152 = vector.load %arg5[%c0_117, %c0_118, %c0_119] : memref<1x16x32xbf16, #tpu.memory_space<vmem>>, vector<1x16x32xbf16>
      %153 = vector.shape_cast %152 : vector<1x16x32xbf16> to vector<16x32xbf16>
      %154 = vector.shape_cast %151 : vector<16x32xbf16> to vector<1x16x32xbf16>
      tpu.vector_store %arg5[%c0_117, %c0_118, %c0_119], %154 {strides = array<i32>} : memref<1x16x32xbf16, #tpu.memory_space<vmem>>, vector<1x16x32xbf16>,
    } else {
    }
    return
  }
  func.func @transform_0(%arg0: i32, %arg1: i32, %arg2: i32) -> (i32, i32, i32) {
    %c0_i32 = arith.constant 0 : i32
    %c0_i32_0 = arith.constant 0 : i32
    return %arg0, %arg1, %c0_i32 : i32, i32, i32
  }
  func.func @transform_1(%arg0: i32, %arg1: i32, %arg2: i32) -> (i32, i32, i32) {
    %c0_i32 = arith.constant 0 : i32
    %c0_i32_0 = arith.constant 0 : i32
    return %arg0, %arg2, %c0_i32 : i32, i32, i32
  }
  func.func @transform_2(%arg0: i32, %arg1: i32, %arg2: i32) -> (i32, i32, i32) {
    %c0_i32 = arith.constant 0 : i32
    %c0_i32_0 = arith.constant 0 : i32
    return %arg0, %arg1, %c0_i32 : i32, i32, i32
  }
}

module attributes {stable_mosaic.version = 11 : i64} {
  func.func @_layernorm_kernel(%arg0: i32, %arg1: memref<16x32xbf16, #tpu.memory_space<vmem>>, %arg2: memref<1x32xbf16, #tpu.memory_space<vmem>>, %arg3: memref<1x32xbf16, #tpu.memory_space<vmem>>, %arg4: memref<16x32xbf16, #tpu.memory_space<vmem>>) attributes {dimension_semantics = [#tpu.dimension_semantics<parallel>], iteration_bounds = array<i64: 1>, scalar_prefetch = 0 : i64, scratch_operands = 0 : i64, tpu.core_type = #tpu.core_type<tc>, window_params = [{transform_indices = @transform_0, window_bounds = array<i64: 16, 32>}, {pipeline_mode = #tpu.pipeline_mode<synchronous>, transform_indices = @transform_1, window_bounds = array<i64: 1, 32>}, {pipeline_mode = #tpu.pipeline_mode<synchronous>, transform_indices = @transform_2, window_bounds = array<i64: 1, 32>}, {transform_indices = @transform_3, window_bounds = array<i64: 16, 32>}]} {
    %c0 = arith.constant 0 : index
    %c0_0 = arith.constant 0 : index
    %0 = vector.load %arg1[%c0, %c0_0] : memref<16x32xbf16, #tpu.memory_space<vmem>>, vector<16x32xbf16>
    %1 = arith.extf %0 : vector<16x32xbf16> to vector<16x32xf32>
    %cst = arith.constant dense<0.000000e+00> : vector<16xf32>
    %2 = vector.multi_reduction <add>, %1, %cst [1] : vector<16x32xf32> to vector<16xf32>
    %3 = vector.shape_cast %2 : vector<16xf32> to vector<16x1xf32>
    %cst_1 = arith.constant 3.200000e+01 : f32
    %4 = vector.broadcast %cst_1 : f32 to vector<16x1xf32>
    %5 = arith.divf %3, %4 : vector<16x1xf32>
    %6 = vector.broadcast %5 : vector<16x1xf32> to vector<16x32xf32>
    %7 = arith.subf %1, %6 : vector<16x32xf32>
    %8 = arith.mulf %7, %7 : vector<16x32xf32>
    %cst_2 = arith.constant dense<0.000000e+00> : vector<16xf32>
    %9 = vector.multi_reduction <add>, %8, %cst_2 [1] : vector<16x32xf32> to vector<16xf32>
    %10 = vector.shape_cast %9 : vector<16xf32> to vector<16x1xf32>
    %cst_3 = arith.constant 3.200000e+01 : f32
    %11 = vector.broadcast %cst_3 : f32 to vector<16x1xf32>
    %12 = arith.divf %10, %11 : vector<16x1xf32>
    %13 = vector.broadcast %5 : vector<16x1xf32> to vector<16x32xf32>
    %14 = arith.subf %1, %13 : vector<16x32xf32>
    %cst_4 = arith.constant 9.99999974E-6 : f32
    %15 = vector.broadcast %cst_4 : f32 to vector<16x1xf32>
    %16 = arith.addf %12, %15 : vector<16x1xf32>
    %17 = math.rsqrt %16 : vector<16x1xf32>
    %18 = vector.broadcast %17 : vector<16x1xf32> to vector<16x32xf32>
    %19 = arith.mulf %14, %18 : vector<16x32xf32>
    %c0_5 = arith.constant 0 : index
    %c0_6 = arith.constant 0 : index
    %20 = vector.load %arg2[%c0_5, %c0_6] : memref<1x32xbf16, #tpu.memory_space<vmem>>, vector<1x32xbf16>
    %21 = arith.extf %20 : vector<1x32xbf16> to vector<1x32xf32>
    %22 = vector.broadcast %21 : vector<1x32xf32> to vector<16x32xf32>
    %23 = arith.mulf %19, %22 : vector<16x32xf32>
    %c0_7 = arith.constant 0 : index
    %c0_8 = arith.constant 0 : index
    %24 = vector.load %arg3[%c0_7, %c0_8] : memref<1x32xbf16, #tpu.memory_space<vmem>>, vector<1x32xbf16>
    %25 = arith.extf %24 : vector<1x32xbf16> to vector<1x32xf32>
    %26 = vector.broadcast %25 : vector<1x32xf32> to vector<16x32xf32>
    %27 = arith.addf %23, %26 : vector<16x32xf32>
    %28 = arith.truncf %27 : vector<16x32xf32> to vector<16x32xbf16>
    %c0_9 = arith.constant 0 : index
    %c0_10 = arith.constant 0 : index
    %29 = vector.load %arg4[%c0_9, %c0_10] : memref<16x32xbf16, #tpu.memory_space<vmem>>, vector<16x32xbf16>
    tpu.vector_store %arg4[%c0_9, %c0_10], %28 {strides = array<i32>} : memref<16x32xbf16, #tpu.memory_space<vmem>>, vector<16x32xbf16>,
    return
  }
  func.func @transform_0(%arg0: i32) -> (i32, i32) {
    %c0_i32 = arith.constant 0 : i32
    %c0_i32_0 = arith.constant 0 : i32
    return %arg0, %c0_i32 : i32, i32
  }
  func.func @transform_1(%arg0: i32) -> (i32, i32) {
    %c0_i32 = arith.constant 0 : i32
    %c0_i32_0 = arith.constant 0 : i32
    %c0_i32_1 = arith.constant 0 : i32
    return %c0_i32, %c0_i32_0 : i32, i32
  }
  func.func @transform_2(%arg0: i32) -> (i32, i32) {
    %c0_i32 = arith.constant 0 : i32
    %c0_i32_0 = arith.constant 0 : i32
    %c0_i32_1 = arith.constant 0 : i32
    return %c0_i32, %c0_i32_0 : i32, i32
  }
  func.func @transform_3(%arg0: i32) -> (i32, i32) {
    %c0_i32 = arith.constant 0 : i32
    %c0_i32_0 = arith.constant 0 : i32
    return %arg0, %c0_i32 : i32, i32
  }
}

module attributes {stable_mosaic.version = 11 : i64} {
  func.func @kernel(%arg0: i32, %arg1: i32, %arg2: i32, %arg3: memref<16x128xbf16, #tpu.memory_space<vmem>>, %arg4: memref<128x128xbf16, #tpu.memory_space<vmem>>, %arg5: memref<1x128xf32, #tpu.memory_space<vmem>>, %arg6: memref<16x128xbf16, #tpu.memory_space<vmem>>, %arg7: memref<16x128xf32, #tpu.memory_space<vmem>>) attributes {dimension_semantics = [#tpu.dimension_semantics<parallel>, #tpu.dimension_semantics<parallel>, #tpu.dimension_semantics<arbitrary>], iteration_bounds = array<i64: 1, 1, 1>, scalar_prefetch = 0 : i64, scratch_operands = 1 : i64, tpu.core_type = #tpu.core_type<tc>, window_params = [{transform_indices = @transform_0, window_bounds = array<i64: 16, 128>}, {transform_indices = @transform_1, window_bounds = array<i64: 128, 128>}, {transform_indices = @transform_2, window_bounds = array<i64: 1, 128>}, {transform_indices = @transform_3, window_bounds = array<i64: 16, 128>}]} {
    %c0_i32 = arith.constant 0 : i32
    %0 = arith.cmpi eq, %arg2, %c0_i32 : i32
    %1 = arith.extui %0 : i1 to i32
    %c0_i32_0 = arith.constant 0 : i32
    %2 = arith.cmpi ne, %1, %c0_i32_0 : i32
    scf.if %2 {
      %cst_10 = arith.constant 0.000000e+00 : f32
      %12 = vector.broadcast %cst_10 : f32 to vector<16x128xf32>
      %c0_11 = arith.constant 0 : index
      %c0_12 = arith.constant 0 : index
      %13 = vector.load %arg7[%c0_11, %c0_12] : memref<16x128xf32, #tpu.memory_space<vmem>>, vector<16x128xf32>
      tpu.vector_store %arg7[%c0_11, %c0_12], %12 {strides = array<i32>} : memref<16x128xf32, #tpu.memory_space<vmem>>, vector<16x128xf32>,
    } else {
    }
    %c0 = arith.constant 0 : index
    %c0_1 = arith.constant 0 : index
    %3 = vector.load %arg7[%c0, %c0_1] : memref<16x128xf32, #tpu.memory_space<vmem>>, vector<16x128xf32>
    %c0_2 = arith.constant 0 : index
    %c0_3 = arith.constant 0 : index
    %4 = vector.load %arg3[%c0_2, %c0_3] : memref<16x128xbf16, #tpu.memory_space<vmem>>, vector<16x128xbf16>
    %c0_4 = arith.constant 0 : index
    %c0_5 = arith.constant 0 : index
    %5 = vector.load %arg4[%c0_4, %c0_5] : memref<128x128xbf16, #tpu.memory_space<vmem>>, vector<128x128xbf16>
    %cst = arith.constant dense<0.000000e+00> : vector<16x128xf32>
    %6 = tpu.matmul %4, %5, %cst {dimension_numbers = #tpu.dot_dimension_numbers<[1], [0], [0], [1], [0, 0, 1, 1], [], []>} : vector<16x128xbf16>, vector<128x128xbf16>, vector<16x128xf32> -> vector<16x128xf32>
    %7 = arith.addf %3, %6 : vector<16x128xf32>
    %c0_6 = arith.constant 0 : index
    %c0_7 = arith.constant 0 : index
    %8 = vector.load %arg7[%c0_6, %c0_7] : memref<16x128xf32, #tpu.memory_space<vmem>>, vector<16x128xf32>
    tpu.vector_store %arg7[%c0_6, %c0_7], %7 {strides = array<i32>} : memref<16x128xf32, #tpu.memory_space<vmem>>, vector<16x128xf32>,
    %c0_i32_8 = arith.constant 0 : i32
    %9 = arith.cmpi eq, %arg2, %c0_i32_8 : i32
    %10 = arith.extui %9 : i1 to i32
    %c0_i32_9 = arith.constant 0 : i32
    %11 = arith.cmpi ne, %10, %c0_i32_9 : i32
    scf.if %11 {
      %c0_10 = arith.constant 0 : index
      %c0_11 = arith.constant 0 : index
      %12 = vector.load %arg7[%c0_10, %c0_11] : memref<16x128xf32, #tpu.memory_space<vmem>>, vector<16x128xf32>
      %c0_12 = arith.constant 0 : index
      %c0_13 = arith.constant 0 : index
      %13 = vector.load %arg5[%c0_12, %c0_13] : memref<1x128xf32, #tpu.memory_space<vmem>>, vector<1x128xf32>
      %14 = vector.broadcast %13 : vector<1x128xf32> to vector<16x128xf32>
      %15 = arith.addf %12, %14 : vector<16x128xf32>
      %16 = arith.truncf %15 : vector<16x128xf32> to vector<16x128xbf16>
      %c0_14 = arith.constant 0 : index
      %c0_15 = arith.constant 0 : index
      %17 = vector.load %arg6[%c0_14, %c0_15] : memref<16x128xbf16, #tpu.memory_space<vmem>>, vector<16x128xbf16>
      tpu.vector_store %arg6[%c0_14, %c0_15], %16 {strides = array<i32>} : memref<16x128xbf16, #tpu.memory_space<vmem>>, vector<16x128xbf16>,
    } else {
    }
    return
  }
  func.func @transform_0(%arg0: i32, %arg1: i32, %arg2: i32) -> (i32, i32) {
    %c0_i32 = arith.constant 0 : i32
    return %arg0, %arg2 : i32, i32
  }
  func.func @transform_1(%arg0: i32, %arg1: i32, %arg2: i32) -> (i32, i32) {
    %c0_i32 = arith.constant 0 : i32
    return %arg2, %arg1 : i32, i32
  }
  func.func @transform_2(%arg0: i32, %arg1: i32, %arg2: i32) -> (i32, i32) {
    %c0_i32 = arith.constant 0 : i32
    %c0_i32_0 = arith.constant 0 : i32
    return %c0_i32, %arg1 : i32, i32
  }
  func.func @transform_3(%arg0: i32, %arg1: i32, %arg2: i32) -> (i32, i32) {
    %c0_i32 = arith.constant 0 : i32
    return %arg0, %arg1 : i32, i32
  }
}

module attributes {stable_mosaic.version = 11 : i64} {
  func.func @kernel(%arg0: i32, %arg1: i32, %arg2: i32, %arg3: memref<1x8x32xbf16, #tpu.memory_space<vmem>>, %arg4: memref<1x8x64xbf16, #tpu.memory_space<vmem>>, %arg5: memref<1x8x32xbf16, #tpu.memory_space<vmem>>, %arg6: memref<8x4xf32, #tpu.memory_space<vmem>>, %arg7: memref<8x4xf32, #tpu.memory_space<vmem>>, %arg8: memref<8x32xf32, #tpu.memory_space<vmem>>) attributes {dimension_semantics = [#tpu.dimension_semantics<parallel>, #tpu.dimension_semantics<parallel>, #tpu.dimension_semantics<arbitrary>], iteration_bounds = array<i64: 2, 1, 1>, scalar_prefetch = 0 : i64, scratch_operands = 3 : i64, tpu.core_type = #tpu.core_type<tc>, window_params = [{transform_indices = @transform_0, window_bounds = array<i64: 1, 8, 32>}, {transform_indices = @transform_1, window_bounds = array<i64: 1, 8, 64>}, {transform_indices = @transform_2, window_bounds = array<i64: 1, 8, 32>}]} {
    %c0_i32 = arith.constant 0 : i32
    %0 = arith.cmpi eq, %arg2, %c0_i32 : i32
    %1 = arith.extui %0 : i1 to i32
    %c0_i32_0 = arith.constant 0 : i32
    %2 = arith.cmpi ne, %1, %c0_i32_0 : i32
    scf.if %2 {
      %cst = arith.constant -1.000000e+30 : f32
      %12 = vector.broadcast %cst : f32 to vector<8x4xf32>
      %c0 = arith.constant 0 : index
      %c0_5 = arith.constant 0 : index
      %13 = vector.load %arg6[%c0, %c0_5] : memref<8x4xf32, #tpu.memory_space<vmem>>, vector<8x4xf32>
      tpu.vector_store %arg6[%c0, %c0_5], %12 {strides = array<i32>} : memref<8x4xf32, #tpu.memory_space<vmem>>, vector<8x4xf32>,
      %cst_6 = arith.constant 0.000000e+00 : f32
      %14 = vector.broadcast %cst_6 : f32 to vector<8x4xf32>
      %c0_7 = arith.constant 0 : index
      %c0_8 = arith.constant 0 : index
      %15 = vector.load %arg7[%c0_7, %c0_8] : memref<8x4xf32, #tpu.memory_space<vmem>>, vector<8x4xf32>
      tpu.vector_store %arg7[%c0_7, %c0_8], %14 {strides = array<i32>} : memref<8x4xf32, #tpu.memory_space<vmem>>, vector<8x4xf32>,
      %cst_9 = arith.constant 0.000000e+00 : f32
      %16 = vector.broadcast %cst_9 : f32 to vector<8x32xf32>
      %c0_10 = arith.constant 0 : index
      %c0_11 = arith.constant 0 : index
      %17 = vector.load %arg8[%c0_10, %c0_11] : memref<8x32xf32, #tpu.memory_space<vmem>>, vector<8x32xf32>
      tpu.vector_store %arg8[%c0_10, %c0_11], %16 {strides = array<i32>} : memref<8x32xf32, #tpu.memory_space<vmem>>, vector<8x32xf32>,
    } else {
    }
    %c8_i32 = arith.constant 8 : i32
    %3 = arith.muli %arg1, %c8_i32 : i32
    %c8_i32_1 = arith.constant 8 : i32
    %4 = arith.muli %arg2, %c8_i32_1 : i32
    %c7_i32 = arith.constant 7 : i32
    %5 = arith.addi %3, %c7_i32 : i32
    %6 = arith.cmpi sle, %4, %5 : i32
    %7 = arith.extui %6 : i1 to i32
    %c0_i32_2 = arith.constant 0 : i32
    %8 = arith.cmpi ne, %7, %c0_i32_2 : i32
    scf.if %8 {
      %12 = tpu.iota {dimensions = array<i32: 0>} : vector<8x8xi32>
      %13 = vector.broadcast %3 : i32 to vector<8x8xi32>
      %14 = arith.addi %13, %12 : vector<8x8xi32>
      %15 = tpu.iota {dimensions = array<i32: 1>} : vector<8x8xi32>
      %16 = vector.broadcast %4 : i32 to vector<8x8xi32>
      %17 = arith.addi %16, %15 : vector<8x8xi32>
      %18 = arith.cmpi sle, %17, %14 : vector<8x8xi32>
      %c0 = arith.constant 0 : index
      %c0_5 = arith.constant 0 : index
      %c0_6 = arith.constant 0 : index
      %19 = vector.load %arg3[%c0, %c0_5, %c0_6] : memref<1x8x32xbf16, #tpu.memory_space<vmem>>, vector<1x8x8xbf16>
      %20 = vector.shape_cast %19 : vector<1x8x8xbf16> to vector<8x8xbf16>
      %c0_7 = arith.constant 0 : index
      %c0_8 = arith.constant 0 : index
      %c0_9 = arith.constant 0 : index
      %21 = vector.load %arg4[%c0_7, %c0_8, %c0_9] : memref<1x8x64xbf16, #tpu.memory_space<vmem>>, vector<1x8x8xbf16>
      %22 = vector.shape_cast %21 : vector<1x8x8xbf16> to vector<8x8xbf16>
      %c0_10 = arith.constant 0 : index
      %c0_11 = arith.constant 0 : index
      %c32 = arith.constant 32 : index
      %23 = vector.load %arg4[%c0_10, %c0_11, %c32] : memref<1x8x64xbf16, #tpu.memory_space<vmem>>, vector<1x8x8xbf16>
      %24 = vector.shape_cast %23 : vector<1x8x8xbf16> to vector<8x8xbf16>
      %cst = arith.constant dense<0.000000e+00> : vector<8x8xf32>
      %25 = tpu.matmul %20, %22, %cst {dimension_numbers = #tpu.dot_dimension_numbers<[1], [1], [0], [0], [0, 0, 1, 0], [], []>} : vector<8x8xbf16>, vector<8x8xbf16>, vector<8x8xf32> -> vector<8x8xf32>
      %cst_12 = arith.constant -1.000000e+30 : f32
      %26 = vector.broadcast %cst_12 : f32 to vector<8x8xf32>
      %27 = arith.select %18, %25, %26 : vector<8x8xi1>, vector<8x8xf32>
      %c0_13 = arith.constant 0 : index
      %c0_14 = arith.constant 0 : index
      %28 = vector.load %arg6[%c0_13, %c0_14] : memref<8x4xf32, #tpu.memory_space<vmem>>, vector<8x1xf32>
      %c0_15 = arith.constant 0 : index
      %c0_16 = arith.constant 0 : index
      %29 = vector.load %arg7[%c0_15, %c0_16] : memref<8x4xf32, #tpu.memory_space<vmem>>, vector<8x1xf32>
      %cst_17 = arith.constant dense<0xFF800000> : vector<8xf32>
      %30 = vector.multi_reduction <maximumf>, %27, %cst_17 [1] : vector<8x8xf32> to vector<8xf32>
      %31 = vector.shape_cast %30 : vector<8xf32> to vector<8x1xf32>
      %32 = arith.maximumf %28, %31 : vector<8x1xf32>
      %33 = arith.subf %28, %32 : vector<8x1xf32>
      %34 = math.exp %33 : vector<8x1xf32>
      %35 = vector.broadcast %32 : vector<8x1xf32> to vector<8x8xf32>
      %36 = arith.subf %27, %35 : vector<8x8xf32>
      %37 = math.exp %36 : vector<8x8xf32>
      %38 = arith.mulf %34, %29 : vector<8x1xf32>
      %cst_18 = arith.constant dense<0.000000e+00> : vector<8xf32>
      %39 = vector.multi_reduction <add>, %37, %cst_18 [1] : vector<8x8xf32> to vector<8xf32>
      %40 = vector.shape_cast %39 : vector<8xf32> to vector<8x1xf32>
      %41 = arith.addf %38, %40 : vector<8x1xf32>
      %c0_19 = arith.constant 0 : index
      %c0_20 = arith.constant 0 : index
      %42 = vector.load %arg7[%c0_19, %c0_20] : memref<8x4xf32, #tpu.memory_space<vmem>>, vector<8x1xf32>
      tpu.vector_store %arg7[%c0_19, %c0_20], %41 {strides = array<i32>} : memref<8x4xf32, #tpu.memory_space<vmem>>, vector<8x1xf32>,
      %c0_21 = arith.constant 0 : index
      %c0_22 = arith.constant 0 : index
      %43 = vector.load %arg6[%c0_21, %c0_22] : memref<8x4xf32, #tpu.memory_space<vmem>>, vector<8x1xf32>
      tpu.vector_store %arg6[%c0_21, %c0_22], %32 {strides = array<i32>} : memref<8x4xf32, #tpu.memory_space<vmem>>, vector<8x1xf32>,
      %44 = arith.truncf %37 : vector<8x8xf32> to vector<8x8xbf16>
      %cst_23 = arith.constant dense<0.000000e+00> : vector<8x8xf32>
      %45 = tpu.matmul %44, %24, %cst_23 {dimension_numbers = #tpu.dot_dimension_numbers<[1], [0], [0], [1], [0, 0, 1, 1], [], []>} : vector<8x8xbf16>, vector<8x8xbf16>, vector<8x8xf32> -> vector<8x8xf32>
      %c0_24 = arith.constant 0 : index
      %c0_25 = arith.constant 0 : index
      %46 = vector.load %arg8[%c0_24, %c0_25] : memref<8x32xf32, #tpu.memory_space<vmem>>, vector<8x8xf32>
      %47 = vector.broadcast %34 : vector<8x1xf32> to vector<8x8xf32>
      %48 = arith.mulf %47, %46 : vector<8x8xf32>
      %49 = arith.addf %48, %45 : vector<8x8xf32>
      %c0_26 = arith.constant 0 : index
      %c0_27 = arith.constant 0 : index
      %50 = vector.load %arg8[%c0_26, %c0_27] : memref<8x32xf32, #tpu.memory_space<vmem>>, vector<8x8xf32>
      tpu.vector_store %arg8[%c0_26, %c0_27], %49 {strides = array<i32>} : memref<8x32xf32, #tpu.memory_space<vmem>>, vector<8x8xf32>,
      %c0_28 = arith.constant 0 : index
      %c0_29 = arith.constant 0 : index
      %c8 = arith.constant 8 : index
      %51 = vector.load %arg3[%c0_28, %c0_29, %c8] : memref<1x8x32xbf16, #tpu.memory_space<vmem>>, vector<1x8x8xbf16>
      %52 = vector.shape_cast %51 : vector<1x8x8xbf16> to vector<8x8xbf16>
      %c0_30 = arith.constant 0 : index
      %c0_31 = arith.constant 0 : index
      %c8_32 = arith.constant 8 : index
      %53 = vector.load %arg4[%c0_30, %c0_31, %c8_32] : memref<1x8x64xbf16, #tpu.memory_space<vmem>>, vector<1x8x8xbf16>
      %54 = vector.shape_cast %53 : vector<1x8x8xbf16> to vector<8x8xbf16>
      %c0_33 = arith.constant 0 : index
      %c0_34 = arith.constant 0 : index
      %c40 = arith.constant 40 : index
      %55 = vector.load %arg4[%c0_33, %c0_34, %c40] : memref<1x8x64xbf16, #tpu.memory_space<vmem>>, vector<1x8x8xbf16>
      %56 = vector.shape_cast %55 : vector<1x8x8xbf16> to vector<8x8xbf16>
      %cst_35 = arith.constant dense<0.000000e+00> : vector<8x8xf32>
      %57 = tpu.matmul %52, %54, %cst_35 {dimension_numbers = #tpu.dot_dimension_numbers<[1], [1], [0], [0], [0, 0, 1, 0], [], []>} : vector<8x8xbf16>, vector<8x8xbf16>, vector<8x8xf32> -> vector<8x8xf32>
      %cst_36 = arith.constant -1.000000e+30 : f32
      %58 = vector.broadcast %cst_36 : f32 to vector<8x8xf32>
      %59 = arith.select %18, %57, %58 : vector<8x8xi1>, vector<8x8xf32>
      %c0_37 = arith.constant 0 : index
      %c1 = arith.constant 1 : index
      %60 = vector.load %arg6[%c0_37, %c1] : memref<8x4xf32, #tpu.memory_space<vmem>>, vector<8x1xf32>
      %c0_38 = arith.constant 0 : index
      %c1_39 = arith.constant 1 : index
      %61 = vector.load %arg7[%c0_38, %c1_39] : memref<8x4xf32, #tpu.memory_space<vmem>>, vector<8x1xf32>
      %cst_40 = arith.constant dense<0xFF800000> : vector<8xf32>
      %62 = vector.multi_reduction <maximumf>, %59, %cst_40 [1] : vector<8x8xf32> to vector<8xf32>
      %63 = vector.shape_cast %62 : vector<8xf32> to vector<8x1xf32>
      %64 = arith.maximumf %60, %63 : vector<8x1xf32>
      %65 = arith.subf %60, %64 : vector<8x1xf32>
      %66 = math.exp %65 : vector<8x1xf32>
      %67 = vector.broadcast %64 : vector<8x1xf32> to vector<8x8xf32>
      %68 = arith.subf %59, %67 : vector<8x8xf32>
      %69 = math.exp %68 : vector<8x8xf32>
      %70 = arith.mulf %66, %61 : vector<8x1xf32>
      %cst_41 = arith.constant dense<0.000000e+00> : vector<8xf32>
      %71 = vector.multi_reduction <add>, %69, %cst_41 [1] : vector<8x8xf32> to vector<8xf32>
      %72 = vector.shape_cast %71 : vector<8xf32> to vector<8x1xf32>
      %73 = arith.addf %70, %72 : vector<8x1xf32>
      %c0_42 = arith.constant 0 : index
      %c1_43 = arith.constant 1 : index
      %74 = vector.load %arg7[%c0_42, %c1_43] : memref<8x4xf32, #tpu.memory_space<vmem>>, vector<8x1xf32>
      tpu.vector_store %arg7[%c0_42, %c1_43], %73 {strides = array<i32>} : memref<8x4xf32, #tpu.memory_space<vmem>>, vector<8x1xf32>,
      %c0_44 = arith.constant 0 : index
      %c1_45 = arith.constant 1 : index
      %75 = vector.load %arg6[%c0_44, %c1_45] : memref<8x4xf32, #tpu.memory_space<vmem>>, vector<8x1xf32>
      tpu.vector_store %arg6[%c0_44, %c1_45], %64 {strides = array<i32>} : memref<8x4xf32, #tpu.memory_space<vmem>>, vector<8x1xf32>,
      %76 = arith.truncf %69 : vector<8x8xf32> to vector<8x8xbf16>
      %cst_46 = arith.constant dense<0.000000e+00> : vector<8x8xf32>
      %77 = tpu.matmul %76, %56, %cst_46 {dimension_numbers = #tpu.dot_dimension_numbers<[1], [0], [0], [1], [0, 0, 1, 1], [], []>} : vector<8x8xbf16>, vector<8x8xbf16>, vector<8x8xf32> -> vector<8x8xf32>
      %c0_47 = arith.constant 0 : index
      %c8_48 = arith.constant 8 : index
      %78 = vector.load %arg8[%c0_47, %c8_48] : memref<8x32xf32, #tpu.memory_space<vmem>>, vector<8x8xf32>
      %79 = vector.broadcast %66 : vector<8x1xf32> to vector<8x8xf32>
      %80 = arith.mulf %79, %78 : vector<8x8xf32>
      %81 = arith.addf %80, %77 : vector<8x8xf32>
      %c0_49 = arith.constant 0 : index
      %c8_50 = arith.constant 8 : index
      %82 = vector.load %arg8[%c0_49, %c8_50] : memref<8x32xf32, #tpu.memory_space<vmem>>, vector<8x8xf32>
      tpu.vector_store %arg8[%c0_49, %c8_50], %81 {strides = array<i32>} : memref<8x32xf32, #tpu.memory_space<vmem>>, vector<8x8xf32>,
      %c0_51 = arith.constant 0 : index
      %c0_52 = arith.constant 0 : index
      %c16 = arith.constant 16 : index
      %83 = vector.load %arg3[%c0_51, %c0_52, %c16] : memref<1x8x32xbf16, #tpu.memory_space<vmem>>, vector<1x8x8xbf16>
      %84 = vector.shape_cast %83 : vector<1x8x8xbf16> to vector<8x8xbf16>
      %c0_53 = arith.constant 0 : index
      %c0_54 = arith.constant 0 : index
      %c16_55 = arith.constant 16 : index
      %85 = vector.load %arg4[%c0_53, %c0_54, %c16_55] : memref<1x8x64xbf16, #tpu.memory_space<vmem>>, vector<1x8x8xbf16>
      %86 = vector.shape_cast %85 : vector<1x8x8xbf16> to vector<8x8xbf16>
      %c0_56 = arith.constant 0 : index
      %c0_57 = arith.constant 0 : index
      %c48 = arith.constant 48 : index
      %87 = vector.load %arg4[%c0_56, %c0_57, %c48] : memref<1x8x64xbf16, #tpu.memory_space<vmem>>, vector<1x8x8xbf16>
      %88 = vector.shape_cast %87 : vector<1x8x8xbf16> to vector<8x8xbf16>
      %cst_58 = arith.constant dense<0.000000e+00> : vector<8x8xf32>
      %89 = tpu.matmul %84, %86, %cst_58 {dimension_numbers = #tpu.dot_dimension_numbers<[1], [1], [0], [0], [0, 0, 1, 0], [], []>} : vector<8x8xbf16>, vector<8x8xbf16>, vector<8x8xf32> -> vector<8x8xf32>
      %cst_59 = arith.constant -1.000000e+30 : f32
      %90 = vector.broadcast %cst_59 : f32 to vector<8x8xf32>
      %91 = arith.select %18, %89, %90 : vector<8x8xi1>, vector<8x8xf32>
      %c0_60 = arith.constant 0 : index
      %c2 = arith.constant 2 : index
      %92 = vector.load %arg6[%c0_60, %c2] : memref<8x4xf32, #tpu.memory_space<vmem>>, vector<8x1xf32>
      %c0_61 = arith.constant 0 : index
      %c2_62 = arith.constant 2 : index
      %93 = vector.load %arg7[%c0_61, %c2_62] : memref<8x4xf32, #tpu.memory_space<vmem>>, vector<8x1xf32>
      %cst_63 = arith.constant dense<0xFF800000> : vector<8xf32>
      %94 = vector.multi_reduction <maximumf>, %91, %cst_63 [1] : vector<8x8xf32> to vector<8xf32>
      %95 = vector.shape_cast %94 : vector<8xf32> to vector<8x1xf32>
      %96 = arith.maximumf %92, %95 : vector<8x1xf32>
      %97 = arith.subf %92, %96 : vector<8x1xf32>
      %98 = math.exp %97 : vector<8x1xf32>
      %99 = vector.broadcast %96 : vector<8x1xf32> to vector<8x8xf32>
      %100 = arith.subf %91, %99 : vector<8x8xf32>
      %101 = math.exp %100 : vector<8x8xf32>
      %102 = arith.mulf %98, %93 : vector<8x1xf32>
      %cst_64 = arith.constant dense<0.000000e+00> : vector<8xf32>
      %103 = vector.multi_reduction <add>, %101, %cst_64 [1] : vector<8x8xf32> to vector<8xf32>
      %104 = vector.shape_cast %103 : vector<8xf32> to vector<8x1xf32>
      %105 = arith.addf %102, %104 : vector<8x1xf32>
      %c0_65 = arith.constant 0 : index
      %c2_66 = arith.constant 2 : index
      %106 = vector.load %arg7[%c0_65, %c2_66] : memref<8x4xf32, #tpu.memory_space<vmem>>, vector<8x1xf32>
      tpu.vector_store %arg7[%c0_65, %c2_66], %105 {strides = array<i32>} : memref<8x4xf32, #tpu.memory_space<vmem>>, vector<8x1xf32>,
      %c0_67 = arith.constant 0 : index
      %c2_68 = arith.constant 2 : index
      %107 = vector.load %arg6[%c0_67, %c2_68] : memref<8x4xf32, #tpu.memory_space<vmem>>, vector<8x1xf32>
      tpu.vector_store %arg6[%c0_67, %c2_68], %96 {strides = array<i32>} : memref<8x4xf32, #tpu.memory_space<vmem>>, vector<8x1xf32>,
      %108 = arith.truncf %101 : vector<8x8xf32> to vector<8x8xbf16>
      %cst_69 = arith.constant dense<0.000000e+00> : vector<8x8xf32>
      %109 = tpu.matmul %108, %88, %cst_69 {dimension_numbers = #tpu.dot_dimension_numbers<[1], [0], [0], [1], [0, 0, 1, 1], [], []>} : vector<8x8xbf16>, vector<8x8xbf16>, vector<8x8xf32> -> vector<8x8xf32>
      %c0_70 = arith.constant 0 : index
      %c16_71 = arith.constant 16 : index
      %110 = vector.load %arg8[%c0_70, %c16_71] : memref<8x32xf32, #tpu.memory_space<vmem>>, vector<8x8xf32>
      %111 = vector.broadcast %98 : vector<8x1xf32> to vector<8x8xf32>
      %112 = arith.mulf %111, %110 : vector<8x8xf32>
      %113 = arith.addf %112, %109 : vector<8x8xf32>
      %c0_72 = arith.constant 0 : index
      %c16_73 = arith.constant 16 : index
      %114 = vector.load %arg8[%c0_72, %c16_73] : memref<8x32xf32, #tpu.memory_space<vmem>>, vector<8x8xf32>
      tpu.vector_store %arg8[%c0_72, %c16_73], %113 {strides = array<i32>} : memref<8x32xf32, #tpu.memory_space<vmem>>, vector<8x8xf32>,
      %c0_74 = arith.constant 0 : index
      %c0_75 = arith.constant 0 : index
      %c24 = arith.constant 24 : index
      %115 = vector.load %arg3[%c0_74, %c0_75, %c24] : memref<1x8x32xbf16, #tpu.memory_space<vmem>>, vector<1x8x8xbf16>
      %116 = vector.shape_cast %115 : vector<1x8x8xbf16> to vector<8x8xbf16>
      %c0_76 = arith.constant 0 : index
      %c0_77 = arith.constant 0 : index
      %c24_78 = arith.constant 24 : index
      %117 = vector.load %arg4[%c0_76, %c0_77, %c24_78] : memref<1x8x64xbf16, #tpu.memory_space<vmem>>, vector<1x8x8xbf16>
      %118 = vector.shape_cast %117 : vector<1x8x8xbf16> to vector<8x8xbf16>
      %c0_79 = arith.constant 0 : index
      %c0_80 = arith.constant 0 : index
      %c56 = arith.constant 56 : index
      %119 = vector.load %arg4[%c0_79, %c0_80, %c56] : memref<1x8x64xbf16, #tpu.memory_space<vmem>>, vector<1x8x8xbf16>
      %120 = vector.shape_cast %119 : vector<1x8x8xbf16> to vector<8x8xbf16>
      %cst_81 = arith.constant dense<0.000000e+00> : vector<8x8xf32>
      %121 = tpu.matmul %116, %118, %cst_81 {dimension_numbers = #tpu.dot_dimension_numbers<[1], [1], [0], [0], [0, 0, 1, 0], [], []>} : vector<8x8xbf16>, vector<8x8xbf16>, vector<8x8xf32> -> vector<8x8xf32>
      %cst_82 = arith.constant -1.000000e+30 : f32
      %122 = vector.broadcast %cst_82 : f32 to vector<8x8xf32>
      %123 = arith.select %18, %121, %122 : vector<8x8xi1>, vector<8x8xf32>
      %c0_83 = arith.constant 0 : index
      %c3 = arith.constant 3 : index
      %124 = vector.load %arg6[%c0_83, %c3] : memref<8x4xf32, #tpu.memory_space<vmem>>, vector<8x1xf32>
      %c0_84 = arith.constant 0 : index
      %c3_85 = arith.constant 3 : index
      %125 = vector.load %arg7[%c0_84, %c3_85] : memref<8x4xf32, #tpu.memory_space<vmem>>, vector<8x1xf32>
      %cst_86 = arith.constant dense<0xFF800000> : vector<8xf32>
      %126 = vector.multi_reduction <maximumf>, %123, %cst_86 [1] : vector<8x8xf32> to vector<8xf32>
      %127 = vector.shape_cast %126 : vector<8xf32> to vector<8x1xf32>
      %128 = arith.maximumf %124, %127 : vector<8x1xf32>
      %129 = arith.subf %124, %128 : vector<8x1xf32>
      %130 = math.exp %129 : vector<8x1xf32>
      %131 = vector.broadcast %128 : vector<8x1xf32> to vector<8x8xf32>
      %132 = arith.subf %123, %131 : vector<8x8xf32>
      %133 = math.exp %132 : vector<8x8xf32>
      %134 = arith.mulf %130, %125 : vector<8x1xf32>
      %cst_87 = arith.constant dense<0.000000e+00> : vector<8xf32>
      %135 = vector.multi_reduction <add>, %133, %cst_87 [1] : vector<8x8xf32> to vector<8xf32>
      %136 = vector.shape_cast %135 : vector<8xf32> to vector<8x1xf32>
      %137 = arith.addf %134, %136 : vector<8x1xf32>
      %c0_88 = arith.constant 0 : index
      %c3_89 = arith.constant 3 : index
      %138 = vector.load %arg7[%c0_88, %c3_89] : memref<8x4xf32, #tpu.memory_space<vmem>>, vector<8x1xf32>
      tpu.vector_store %arg7[%c0_88, %c3_89], %137 {strides = array<i32>} : memref<8x4xf32, #tpu.memory_space<vmem>>, vector<8x1xf32>,
      %c0_90 = arith.constant 0 : index
      %c3_91 = arith.constant 3 : index
      %139 = vector.load %arg6[%c0_90, %c3_91] : memref<8x4xf32, #tpu.memory_space<vmem>>, vector<8x1xf32>
      tpu.vector_store %arg6[%c0_90, %c3_91], %128 {strides = array<i32>} : memref<8x4xf32, #tpu.memory_space<vmem>>, vector<8x1xf32>,
      %140 = arith.truncf %133 : vector<8x8xf32> to vector<8x8xbf16>
      %cst_92 = arith.constant dense<0.000000e+00> : vector<8x8xf32>
      %141 = tpu.matmul %140, %120, %cst_92 {dimension_numbers = #tpu.dot_dimension_numbers<[1], [0], [0], [1], [0, 0, 1, 1], [], []>} : vector<8x8xbf16>, vector<8x8xbf16>, vector<8x8xf32> -> vector<8x8xf32>
      %c0_93 = arith.constant 0 : index
      %c24_94 = arith.constant 24 : index
      %142 = vector.load %arg8[%c0_93, %c24_94] : memref<8x32xf32, #tpu.memory_space<vmem>>, vector<8x8xf32>
      %143 = vector.broadcast %130 : vector<8x1xf32> to vector<8x8xf32>
      %144 = arith.mulf %143, %142 : vector<8x8xf32>
      %145 = arith.addf %144, %141 : vector<8x8xf32>
      %c0_95 = arith.constant 0 : index
      %c24_96 = arith.constant 24 : index
      %146 = vector.load %arg8[%c0_95, %c24_96] : memref<8x32xf32, #tpu.memory_space<vmem>>, vector<8x8xf32>
      tpu.vector_store %arg8[%c0_95, %c24_96], %145 {strides = array<i32>} : memref<8x32xf32, #tpu.memory_space<vmem>>, vector<8x8xf32>,
    } else {
    }
    %c0_i32_3 = arith.constant 0 : i32
    %9 = arith.cmpi eq, %arg2, %c0_i32_3 : i32
    %10 = arith.extui %9 : i1 to i32
    %c0_i32_4 = arith.constant 0 : i32
    %11 = arith.cmpi ne, %10, %c0_i32_4 : i32
    scf.if %11 {
      %c0 = arith.constant 0 : index
      %c0_5 = arith.constant 0 : index
      %12 = vector.load %arg7[%c0, %c0_5] : memref<8x4xf32, #tpu.memory_space<vmem>>, vector<8x1xf32>
      %13 = tpu.reciprocal %12 {approx = true} : vector<8x1xf32> -> vector<8x1xf32>
      %c0_6 = arith.constant 0 : index
      %c0_7 = arith.constant 0 : index
      %14 = vector.load %arg8[%c0_6, %c0_7] : memref<8x32xf32, #tpu.memory_space<vmem>>, vector<8x8xf32>
      %15 = vector.broadcast %13 : vector<8x1xf32> to vector<8x8xf32>
      %16 = arith.mulf %14, %15 : vector<8x8xf32>
      %c0_8 = arith.constant 0 : index
      %c0_9 = arith.constant 0 : index
      %17 = vector.load %arg8[%c0_8, %c0_9] : memref<8x32xf32, #tpu.memory_space<vmem>>, vector<8x8xf32>
      tpu.vector_store %arg8[%c0_8, %c0_9], %16 {strides = array<i32>} : memref<8x32xf32, #tpu.memory_space<vmem>>, vector<8x8xf32>,
      %c0_10 = arith.constant 0 : index
      %c1 = arith.constant 1 : index
      %18 = vector.load %arg7[%c0_10, %c1] : memref<8x4xf32, #tpu.memory_space<vmem>>, vector<8x1xf32>
      %19 = tpu.reciprocal %18 {approx = true} : vector<8x1xf32> -> vector<8x1xf32>
      %c0_11 = arith.constant 0 : index
      %c8 = arith.constant 8 : index
      %20 = vector.load %arg8[%c0_11, %c8] : memref<8x32xf32, #tpu.memory_space<vmem>>, vector<8x8xf32>
      %21 = vector.broadcast %19 : vector<8x1xf32> to vector<8x8xf32>
      %22 = arith.mulf %20, %21 : vector<8x8xf32>
      %c0_12 = arith.constant 0 : index
      %c8_13 = arith.constant 8 : index
      %23 = vector.load %arg8[%c0_12, %c8_13] : memref<8x32xf32, #tpu.memory_space<vmem>>, vector<8x8xf32>
      tpu.vector_store %arg8[%c0_12, %c8_13], %22 {strides = array<i32>} : memref<8x32xf32, #tpu.memory_space<vmem>>, vector<8x8xf32>,
      %c0_14 = arith.constant 0 : index
      %c2 = arith.constant 2 : index
      %24 = vector.load %arg7[%c0_14, %c2] : memref<8x4xf32, #tpu.memory_space<vmem>>, vector<8x1xf32>
      %25 = tpu.reciprocal %24 {approx = true} : vector<8x1xf32> -> vector<8x1xf32>
      %c0_15 = arith.constant 0 : index
      %c16 = arith.constant 16 : index
      %26 = vector.load %arg8[%c0_15, %c16] : memref<8x32xf32, #tpu.memory_space<vmem>>, vector<8x8xf32>
      %27 = vector.broadcast %25 : vector<8x1xf32> to vector<8x8xf32>
      %28 = arith.mulf %26, %27 : vector<8x8xf32>
      %c0_16 = arith.constant 0 : index
      %c16_17 = arith.constant 16 : index
      %29 = vector.load %arg8[%c0_16, %c16_17] : memref<8x32xf32, #tpu.memory_space<vmem>>, vector<8x8xf32>
      tpu.vector_store %arg8[%c0_16, %c16_17], %28 {strides = array<i32>} : memref<8x32xf32, #tpu.memory_space<vmem>>, vector<8x8xf32>,
      %c0_18 = arith.constant 0 : index
      %c3 = arith.constant 3 : index
      %30 = vector.load %arg7[%c0_18, %c3] : memref<8x4xf32, #tpu.memory_space<vmem>>, vector<8x1xf32>
      %31 = tpu.reciprocal %30 {approx = true} : vector<8x1xf32> -> vector<8x1xf32>
      %c0_19 = arith.constant 0 : index
      %c24 = arith.constant 24 : index
      %32 = vector.load %arg8[%c0_19, %c24] : memref<8x32xf32, #tpu.memory_space<vmem>>, vector<8x8xf32>
      %33 = vector.broadcast %31 : vector<8x1xf32> to vector<8x8xf32>
      %34 = arith.mulf %32, %33 : vector<8x8xf32>
      %c0_20 = arith.constant 0 : index
      %c24_21 = arith.constant 24 : index
      %35 = vector.load %arg8[%c0_20, %c24_21] : memref<8x32xf32, #tpu.memory_space<vmem>>, vector<8x8xf32>
      tpu.vector_store %arg8[%c0_20, %c24_21], %34 {strides = array<i32>} : memref<8x32xf32, #tpu.memory_space<vmem>>, vector<8x8xf32>,
      %c0_22 = arith.constant 0 : index
      %c0_23 = arith.constant 0 : index
      %36 = vector.load %arg8[%c0_22, %c0_23] : memref<8x32xf32, #tpu.memory_space<vmem>>, vector<8x32xf32>
      %37 = arith.truncf %36 : vector<8x32xf32> to vector<8x32xbf16>
      %c0_24 = arith.constant 0 : index
      %c0_25 = arith.constant 0 : index
      %c0_26 = arith.constant 0 : index
      %38 = vector.load %arg5[%c0_24, %c0_25, %c0_26] : memref<1x8x32xbf16, #tpu.memory_space<vmem>>, vector<1x8x32xbf16>
      %39 = vector.shape_cast %38 : vector<1x8x32xbf16> to vector<8x32xbf16>
      %40 = vector.shape_cast %37 : vector<8x32xbf16> to vector<1x8x32xbf16>
      tpu.vector_store %arg5[%c0_24, %c0_25, %c0_26], %40 {strides = array<i32>} : memref<1x8x32xbf16, #tpu.memory_space<vmem>>, vector<1x8x32xbf16>,
    } else {
    }
    return
  }
  func.func @transform_0(%arg0: i32, %arg1: i32, %arg2: i32) -> (i32, i32, i32) {
    %c0_i32 = arith.constant 0 : i32
    %c0_i32_0 = arith.constant 0 : i32
    return %arg0, %arg1, %c0_i32 : i32, i32, i32
  }
  func.func @transform_1(%arg0: i32, %arg1: i32, %arg2: i32) -> (i32, i32, i32) {
    %c0_i32 = arith.constant 0 : i32
    %c0_i32_0 = arith.constant 0 : i32
    return %arg0, %arg2, %c0_i32 : i32, i32, i32
  }
  func.func @transform_2(%arg0: i32, %arg1: i32, %arg2: i32) -> (i32, i32, i32) {
    %c0_i32 = arith.constant 0 : i32
    %c0_i32_0 = arith.constant 0 : i32
    return %arg0, %arg1, %c0_i32 : i32, i32, i32
  }
}

module attributes {stable_mosaic.version = 11 : i64} {
  func.func @kernel(%arg0: i32, %arg1: i32, %arg2: i32, %arg3: memref<16x128xbf16, #tpu.memory_space<vmem>>, %arg4: memref<128x128xbf16, #tpu.memory_space<vmem>>, %arg5: memref<1x128xf32, #tpu.memory_space<vmem>>, %arg6: memref<16x128xbf16, #tpu.memory_space<vmem>>, %arg7: memref<16x128xbf16, #tpu.memory_space<vmem>>, %arg8: memref<16x128xf32, #tpu.memory_space<vmem>>) attributes {dimension_semantics = [#tpu.dimension_semantics<parallel>, #tpu.dimension_semantics<parallel>, #tpu.dimension_semantics<arbitrary>], iteration_bounds = array<i64: 1, 1, 1>, scalar_prefetch = 0 : i64, scratch_operands = 1 : i64, tpu.core_type = #tpu.core_type<tc>, window_params = [{transform_indices = @transform_0, window_bounds = array<i64: 16, 128>}, {transform_indices = @transform_1, window_bounds = array<i64: 128, 128>}, {transform_indices = @transform_2, window_bounds = array<i64: 1, 128>}, {transform_indices = @transform_3, window_bounds = array<i64: 16, 128>}, {transform_indices = @transform_4, window_bounds = array<i64: 16, 128>}]} {
    %c0_i32 = arith.constant 0 : i32
    %0 = arith.cmpi eq, %arg2, %c0_i32 : i32
    %1 = arith.extui %0 : i1 to i32
    %c0_i32_0 = arith.constant 0 : i32
    %2 = arith.cmpi ne, %1, %c0_i32_0 : i32
    scf.if %2 {
      %cst_10 = arith.constant 0.000000e+00 : f32
      %12 = vector.broadcast %cst_10 : f32 to vector<16x128xf32>
      %c0_11 = arith.constant 0 : index
      %c0_12 = arith.constant 0 : index
      %13 = vector.load %arg8[%c0_11, %c0_12] : memref<16x128xf32, #tpu.memory_space<vmem>>, vector<16x128xf32>
      tpu.vector_store %arg8[%c0_11, %c0_12], %12 {strides = array<i32>} : memref<16x128xf32, #tpu.memory_space<vmem>>, vector<16x128xf32>,
    } else {
    }
    %c0 = arith.constant 0 : index
    %c0_1 = arith.constant 0 : index
    %3 = vector.load %arg8[%c0, %c0_1] : memref<16x128xf32, #tpu.memory_space<vmem>>, vector<16x128xf32>
    %c0_2 = arith.constant 0 : index
    %c0_3 = arith.constant 0 : index
    %4 = vector.load %arg3[%c0_2, %c0_3] : memref<16x128xbf16, #tpu.memory_space<vmem>>, vector<16x128xbf16>
    %c0_4 = arith.constant 0 : index
    %c0_5 = arith.constant 0 : index
    %5 = vector.load %arg4[%c0_4, %c0_5] : memref<128x128xbf16, #tpu.memory_space<vmem>>, vector<128x128xbf16>
    %cst = arith.constant dense<0.000000e+00> : vector<16x128xf32>
    %6 = tpu.matmul %4, %5, %cst {dimension_numbers = #tpu.dot_dimension_numbers<[1], [0], [0], [1], [0, 0, 1, 1], [], []>} : vector<16x128xbf16>, vector<128x128xbf16>, vector<16x128xf32> -> vector<16x128xf32>
    %7 = arith.addf %3, %6 : vector<16x128xf32>
    %c0_6 = arith.constant 0 : index
    %c0_7 = arith.constant 0 : index
    %8 = vector.load %arg8[%c0_6, %c0_7] : memref<16x128xf32, #tpu.memory_space<vmem>>, vector<16x128xf32>
    tpu.vector_store %arg8[%c0_6, %c0_7], %7 {strides = array<i32>} : memref<16x128xf32, #tpu.memory_space<vmem>>, vector<16x128xf32>,
    %c0_i32_8 = arith.constant 0 : i32
    %9 = arith.cmpi eq, %arg2, %c0_i32_8 : i32
    %10 = arith.extui %9 : i1 to i32
    %c0_i32_9 = arith.constant 0 : i32
    %11 = arith.cmpi ne, %10, %c0_i32_9 : i32
    scf.if %11 {
      %c0_10 = arith.constant 0 : index
      %c0_11 = arith.constant 0 : index
      %12 = vector.load %arg8[%c0_10, %c0_11] : memref<16x128xf32, #tpu.memory_space<vmem>>, vector<16x128xf32>
      %c0_12 = arith.constant 0 : index
      %c0_13 = arith.constant 0 : index
      %13 = vector.load %arg5[%c0_12, %c0_13] : memref<1x128xf32, #tpu.memory_space<vmem>>, vector<1x128xf32>
      %14 = vector.broadcast %13 : vector<1x128xf32> to vector<16x128xf32>
      %15 = arith.addf %12, %14 : vector<16x128xf32>
      %c0_14 = arith.constant 0 : index
      %c0_15 = arith.constant 0 : index
      %16 = vector.load %arg6[%c0_14, %c0_15] : memref<16x128xbf16, #tpu.memory_space<vmem>>, vector<16x128xbf16>
      %17 = arith.extf %16 : vector<16x128xbf16> to vector<16x128xf32>
      %18 = arith.addf %15, %17 : vector<16x128xf32>
      %19 = arith.truncf %18 : vector<16x128xf32> to vector<16x128xbf16>
      %c0_16 = arith.constant 0 : index
      %c0_17 = arith.constant 0 : index
      %20 = vector.load %arg7[%c0_16, %c0_17] : memref<16x128xbf16, #tpu.memory_space<vmem>>, vector<16x128xbf16>
      tpu.vector_store %arg7[%c0_16, %c0_17], %19 {strides = array<i32>} : memref<16x128xbf16, #tpu.memory_space<vmem>>, vector<16x128xbf16>,
    } else {
    }
    return
  }
  func.func @transform_0(%arg0: i32, %arg1: i32, %arg2: i32) -> (i32, i32) {
    %c0_i32 = arith.constant 0 : i32
    return %arg0, %arg2 : i32, i32
  }
  func.func @transform_1(%arg0: i32, %arg1: i32, %arg2: i32) -> (i32, i32) {
    %c0_i32 = arith.constant 0 : i32
    return %arg2, %arg1 : i32, i32
  }
  func.func @transform_2(%arg0: i32, %arg1: i32, %arg2: i32) -> (i32, i32) {
    %c0_i32 = arith.constant 0 : i32
    %c0_i32_0 = arith.constant 0 : i32
    return %c0_i32, %arg1 : i32, i32
  }
  func.func @transform_3(%arg0: i32, %arg1: i32, %arg2: i32) -> (i32, i32) {
    %c0_i32 = arith.constant 0 : i32
    return %arg0, %arg1 : i32, i32
  }
  func.func @transform_4(%arg0: i32, %arg1: i32, %arg2: i32) -> (i32, i32) {
    %c0_i32 = arith.constant 0 : i32
    return %arg0, %arg1 : i32, i32
  }
}

module attributes {stable_mosaic.version = 11 : i64} {
  func.func @kernel(%arg0: i32, %arg1: i32, %arg2: i32, %arg3: memref<1x8x32xbf16, #tpu.memory_space<vmem>>, %arg4: memref<1x16x64xbf16, #tpu.memory_space<vmem>>, %arg5: memref<1x8x32xbf16, #tpu.memory_space<vmem>>, %arg6: memref<8x4xf32, #tpu.memory_space<vmem>>, %arg7: memref<8x4xf32, #tpu.memory_space<vmem>>, %arg8: memref<8x32xf32, #tpu.memory_space<vmem>>) attributes {dimension_semantics = [#tpu.dimension_semantics<parallel>, #tpu.dimension_semantics<parallel>, #tpu.dimension_semantics<arbitrary>], iteration_bounds = array<i64: 2, 1, 1>, scalar_prefetch = 0 : i64, scratch_operands = 3 : i64, tpu.core_type = #tpu.core_type<tc>, window_params = [{transform_indices = @transform_0, window_bounds = array<i64: 1, 8, 32>}, {transform_indices = @transform_1, window_bounds = array<i64: 1, 16, 64>}, {transform_indices = @transform_2, window_bounds = array<i64: 1, 8, 32>}]} {
    %c0_i32 = arith.constant 0 : i32
    %0 = arith.cmpi eq, %arg2, %c0_i32 : i32
    %1 = arith.extui %0 : i1 to i32
    %c0_i32_0 = arith.constant 0 : i32
    %2 = arith.cmpi ne, %1, %c0_i32_0 : i32
    scf.if %2 {
      %cst_91 = arith.constant -1.000000e+30 : f32
      %126 = vector.broadcast %cst_91 : f32 to vector<8x4xf32>
      %c0_92 = arith.constant 0 : index
      %c0_93 = arith.constant 0 : index
      %127 = vector.load %arg6[%c0_92, %c0_93] : memref<8x4xf32, #tpu.memory_space<vmem>>, vector<8x4xf32>
      tpu.vector_store %arg6[%c0_92, %c0_93], %126 {strides = array<i32>} : memref<8x4xf32, #tpu.memory_space<vmem>>, vector<8x4xf32>,
      %cst_94 = arith.constant 0.000000e+00 : f32
      %128 = vector.broadcast %cst_94 : f32 to vector<8x4xf32>
      %c0_95 = arith.constant 0 : index
      %c0_96 = arith.constant 0 : index
      %129 = vector.load %arg7[%c0_95, %c0_96] : memref<8x4xf32, #tpu.memory_space<vmem>>, vector<8x4xf32>
      tpu.vector_store %arg7[%c0_95, %c0_96], %128 {strides = array<i32>} : memref<8x4xf32, #tpu.memory_space<vmem>>, vector<8x4xf32>,
      %cst_97 = arith.constant 0.000000e+00 : f32
      %130 = vector.broadcast %cst_97 : f32 to vector<8x32xf32>
      %c0_98 = arith.constant 0 : index
      %c0_99 = arith.constant 0 : index
      %131 = vector.load %arg8[%c0_98, %c0_99] : memref<8x32xf32, #tpu.memory_space<vmem>>, vector<8x32xf32>
      tpu.vector_store %arg8[%c0_98, %c0_99], %130 {strides = array<i32>} : memref<8x32xf32, #tpu.memory_space<vmem>>, vector<8x32xf32>,
    } else {
    }
    %c0 = arith.constant 0 : index
    %c0_1 = arith.constant 0 : index
    %c0_2 = arith.constant 0 : index
    %3 = vector.load %arg3[%c0, %c0_1, %c0_2] : memref<1x8x32xbf16, #tpu.memory_space<vmem>>, vector<1x8x8xbf16>
    %4 = vector.shape_cast %3 : vector<1x8x8xbf16> to vector<8x8xbf16>
    %c0_3 = arith.constant 0 : index
    %c0_4 = arith.constant 0 : index
    %c0_5 = arith.constant 0 : index
    %5 = vector.load %arg4[%c0_3, %c0_4, %c0_5] : memref<1x16x64xbf16, #tpu.memory_space<vmem>>, vector<1x16x8xbf16>
    %6 = vector.shape_cast %5 : vector<1x16x8xbf16> to vector<16x8xbf16>
    %c0_6 = arith.constant 0 : index
    %c0_7 = arith.constant 0 : index
    %c32 = arith.constant 32 : index
    %7 = vector.load %arg4[%c0_6, %c0_7, %c32] : memref<1x16x64xbf16, #tpu.memory_space<vmem>>, vector<1x16x8xbf16>
    %8 = vector.shape_cast %7 : vector<1x16x8xbf16> to vector<16x8xbf16>
    %cst = arith.constant dense<0.000000e+00> : vector<8x16xf32>
    %9 = tpu.matmul %4, %6, %cst {dimension_numbers = #tpu.dot_dimension_numbers<[1], [1], [0], [0], [0, 0, 1, 0], [], []>} : vector<8x8xbf16>, vector<16x8xbf16>, vector<8x16xf32> -> vector<8x16xf32>
    %c0_8 = arith.constant 0 : index
    %c0_9 = arith.constant 0 : index
    %10 = vector.load %arg6[%c0_8, %c0_9] : memref<8x4xf32, #tpu.memory_space<vmem>>, vector<8x1xf32>
    %c0_10 = arith.constant 0 : index
    %c0_11 = arith.constant 0 : index
    %11 = vector.load %arg7[%c0_10, %c0_11] : memref<8x4xf32, #tpu.memory_space<vmem>>, vector<8x1xf32>
    %cst_12 = arith.constant dense<0xFF800000> : vector<8xf32>
    %12 = vector.multi_reduction <maximumf>, %9, %cst_12 [1] : vector<8x16xf32> to vector<8xf32>
    %13 = vector.shape_cast %12 : vector<8xf32> to vector<8x1xf32>
    %14 = arith.maximumf %10, %13 : vector<8x1xf32>
    %15 = arith.subf %10, %14 : vector<8x1xf32>
    %16 = math.exp %15 : vector<8x1xf32>
    %17 = vector.broadcast %14 : vector<8x1xf32> to vector<8x16xf32>
    %18 = arith.subf %9, %17 : vector<8x16xf32>
    %19 = math.exp %18 : vector<8x16xf32>
    %20 = arith.mulf %16, %11 : vector<8x1xf32>
    %cst_13 = arith.constant dense<0.000000e+00> : vector<8xf32>
    %21 = vector.multi_reduction <add>, %19, %cst_13 [1] : vector<8x16xf32> to vector<8xf32>
    %22 = vector.shape_cast %21 : vector<8xf32> to vector<8x1xf32>
    %23 = arith.addf %20, %22 : vector<8x1xf32>
    %c0_14 = arith.constant 0 : index
    %c0_15 = arith.constant 0 : index
    %24 = vector.load %arg7[%c0_14, %c0_15] : memref<8x4xf32, #tpu.memory_space<vmem>>, vector<8x1xf32>
    tpu.vector_store %arg7[%c0_14, %c0_15], %23 {strides = array<i32>} : memref<8x4xf32, #tpu.memory_space<vmem>>, vector<8x1xf32>,
    %c0_16 = arith.constant 0 : index
    %c0_17 = arith.constant 0 : index
    %25 = vector.load %arg6[%c0_16, %c0_17] : memref<8x4xf32, #tpu.memory_space<vmem>>, vector<8x1xf32>
    tpu.vector_store %arg6[%c0_16, %c0_17], %14 {strides = array<i32>} : memref<8x4xf32, #tpu.memory_space<vmem>>, vector<8x1xf32>,
    %26 = arith.truncf %19 : vector<8x16xf32> to vector<8x16xbf16>
    %cst_18 = arith.constant dense<0.000000e+00> : vector<8x8xf32>
    %27 = tpu.matmul %26, %8, %cst_18 {dimension_numbers = #tpu.dot_dimension_numbers<[1], [0], [0], [1], [0, 0, 1, 1], [], []>} : vector<8x16xbf16>, vector<16x8xbf16>, vector<8x8xf32> -> vector<8x8xf32>
    %c0_19 = arith.constant 0 : index
    %c0_20 = arith.constant 0 : index
    %28 = vector.load %arg8[%c0_19, %c0_20] : memref<8x32xf32, #tpu.memory_space<vmem>>, vector<8x8xf32>
    %29 = vector.broadcast %16 : vector<8x1xf32> to vector<8x8xf32>
    %30 = arith.mulf %29, %28 : vector<8x8xf32>
    %31 = arith.addf %30, %27 : vector<8x8xf32>
    %c0_21 = arith.constant 0 : index
    %c0_22 = arith.constant 0 : index
    %32 = vector.load %arg8[%c0_21, %c0_22] : memref<8x32xf32, #tpu.memory_space<vmem>>, vector<8x8xf32>
    tpu.vector_store %arg8[%c0_21, %c0_22], %31 {strides = array<i32>} : memref<8x32xf32, #tpu.memory_space<vmem>>, vector<8x8xf32>,
    %c0_23 = arith.constant 0 : index
    %c0_24 = arith.constant 0 : index
    %c8 = arith.constant 8 : index
    %33 = vector.load %arg3[%c0_23, %c0_24, %c8] : memref<1x8x32xbf16, #tpu.memory_space<vmem>>, vector<1x8x8xbf16>
    %34 = vector.shape_cast %33 : vector<1x8x8xbf16> to vector<8x8xbf16>
    %c0_25 = arith.constant 0 : index
    %c0_26 = arith.constant 0 : index
    %c8_27 = arith.constant 8 : index
    %35 = vector.load %arg4[%c0_25, %c0_26, %c8_27] : memref<1x16x64xbf16, #tpu.memory_space<vmem>>, vector<1x16x8xbf16>
    %36 = vector.shape_cast %35 : vector<1x16x8xbf16> to vector<16x8xbf16>
    %c0_28 = arith.constant 0 : index
    %c0_29 = arith.constant 0 : index
    %c40 = arith.constant 40 : index
    %37 = vector.load %arg4[%c0_28, %c0_29, %c40] : memref<1x16x64xbf16, #tpu.memory_space<vmem>>, vector<1x16x8xbf16>
    %38 = vector.shape_cast %37 : vector<1x16x8xbf16> to vector<16x8xbf16>
    %cst_30 = arith.constant dense<0.000000e+00> : vector<8x16xf32>
    %39 = tpu.matmul %34, %36, %cst_30 {dimension_numbers = #tpu.dot_dimension_numbers<[1], [1], [0], [0], [0, 0, 1, 0], [], []>} : vector<8x8xbf16>, vector<16x8xbf16>, vector<8x16xf32> -> vector<8x16xf32>
    %c0_31 = arith.constant 0 : index
    %c1 = arith.constant 1 : index
    %40 = vector.load %arg6[%c0_31, %c1] : memref<8x4xf32, #tpu.memory_space<vmem>>, vector<8x1xf32>
    %c0_32 = arith.constant 0 : index
    %c1_33 = arith.constant 1 : index
    %41 = vector.load %arg7[%c0_32, %c1_33] : memref<8x4xf32, #tpu.memory_space<vmem>>, vector<8x1xf32>
    %cst_34 = arith.constant dense<0xFF800000> : vector<8xf32>
    %42 = vector.multi_reduction <maximumf>, %39, %cst_34 [1] : vector<8x16xf32> to vector<8xf32>
    %43 = vector.shape_cast %42 : vector<8xf32> to vector<8x1xf32>
    %44 = arith.maximumf %40, %43 : vector<8x1xf32>
    %45 = arith.subf %40, %44 : vector<8x1xf32>
    %46 = math.exp %45 : vector<8x1xf32>
    %47 = vector.broadcast %44 : vector<8x1xf32> to vector<8x16xf32>
    %48 = arith.subf %39, %47 : vector<8x16xf32>
    %49 = math.exp %48 : vector<8x16xf32>
    %50 = arith.mulf %46, %41 : vector<8x1xf32>
    %cst_35 = arith.constant dense<0.000000e+00> : vector<8xf32>
    %51 = vector.multi_reduction <add>, %49, %cst_35 [1] : vector<8x16xf32> to vector<8xf32>
    %52 = vector.shape_cast %51 : vector<8xf32> to vector<8x1xf32>
    %53 = arith.addf %50, %52 : vector<8x1xf32>
    %c0_36 = arith.constant 0 : index
    %c1_37 = arith.constant 1 : index
    %54 = vector.load %arg7[%c0_36, %c1_37] : memref<8x4xf32, #tpu.memory_space<vmem>>, vector<8x1xf32>
    tpu.vector_store %arg7[%c0_36, %c1_37], %53 {strides = array<i32>} : memref<8x4xf32, #tpu.memory_space<vmem>>, vector<8x1xf32>,
    %c0_38 = arith.constant 0 : index
    %c1_39 = arith.constant 1 : index
    %55 = vector.load %arg6[%c0_38, %c1_39] : memref<8x4xf32, #tpu.memory_space<vmem>>, vector<8x1xf32>
    tpu.vector_store %arg6[%c0_38, %c1_39], %44 {strides = array<i32>} : memref<8x4xf32, #tpu.memory_space<vmem>>, vector<8x1xf32>,
    %56 = arith.truncf %49 : vector<8x16xf32> to vector<8x16xbf16>
    %cst_40 = arith.constant dense<0.000000e+00> : vector<8x8xf32>
    %57 = tpu.matmul %56, %38, %cst_40 {dimension_numbers = #tpu.dot_dimension_numbers<[1], [0], [0], [1], [0, 0, 1, 1], [], []>} : vector<8x16xbf16>, vector<16x8xbf16>, vector<8x8xf32> -> vector<8x8xf32>
    %c0_41 = arith.constant 0 : index
    %c8_42 = arith.constant 8 : index
    %58 = vector.load %arg8[%c0_41, %c8_42] : memref<8x32xf32, #tpu.memory_space<vmem>>, vector<8x8xf32>
    %59 = vector.broadcast %46 : vector<8x1xf32> to vector<8x8xf32>
    %60 = arith.mulf %59, %58 : vector<8x8xf32>
    %61 = arith.addf %60, %57 : vector<8x8xf32>
    %c0_43 = arith.constant 0 : index
    %c8_44 = arith.constant 8 : index
    %62 = vector.load %arg8[%c0_43, %c8_44] : memref<8x32xf32, #tpu.memory_space<vmem>>, vector<8x8xf32>
    tpu.vector_store %arg8[%c0_43, %c8_44], %61 {strides = array<i32>} : memref<8x32xf32, #tpu.memory_space<vmem>>, vector<8x8xf32>,
    %c0_45 = arith.constant 0 : index
    %c0_46 = arith.constant 0 : index
    %c16 = arith.constant 16 : index
    %63 = vector.load %arg3[%c0_45, %c0_46, %c16] : memref<1x8x32xbf16, #tpu.memory_space<vmem>>, vector<1x8x8xbf16>
    %64 = vector.shape_cast %63 : vector<1x8x8xbf16> to vector<8x8xbf16>
    %c0_47 = arith.constant 0 : index
    %c0_48 = arith.constant 0 : index
    %c16_49 = arith.constant 16 : index
    %65 = vector.load %arg4[%c0_47, %c0_48, %c16_49] : memref<1x16x64xbf16, #tpu.memory_space<vmem>>, vector<1x16x8xbf16>
    %66 = vector.shape_cast %65 : vector<1x16x8xbf16> to vector<16x8xbf16>
    %c0_50 = arith.constant 0 : index
    %c0_51 = arith.constant 0 : index
    %c48 = arith.constant 48 : index
    %67 = vector.load %arg4[%c0_50, %c0_51, %c48] : memref<1x16x64xbf16, #tpu.memory_space<vmem>>, vector<1x16x8xbf16>
    %68 = vector.shape_cast %67 : vector<1x16x8xbf16> to vector<16x8xbf16>
    %cst_52 = arith.constant dense<0.000000e+00> : vector<8x16xf32>
    %69 = tpu.matmul %64, %66, %cst_52 {dimension_numbers = #tpu.dot_dimension_numbers<[1], [1], [0], [0], [0, 0, 1, 0], [], []>} : vector<8x8xbf16>, vector<16x8xbf16>, vector<8x16xf32> -> vector<8x16xf32>
    %c0_53 = arith.constant 0 : index
    %c2 = arith.constant 2 : index
    %70 = vector.load %arg6[%c0_53, %c2] : memref<8x4xf32, #tpu.memory_space<vmem>>, vector<8x1xf32>
    %c0_54 = arith.constant 0 : index
    %c2_55 = arith.constant 2 : index
    %71 = vector.load %arg7[%c0_54, %c2_55] : memref<8x4xf32, #tpu.memory_space<vmem>>, vector<8x1xf32>
    %cst_56 = arith.constant dense<0xFF800000> : vector<8xf32>
    %72 = vector.multi_reduction <maximumf>, %69, %cst_56 [1] : vector<8x16xf32> to vector<8xf32>
    %73 = vector.shape_cast %72 : vector<8xf32> to vector<8x1xf32>
    %74 = arith.maximumf %70, %73 : vector<8x1xf32>
    %75 = arith.subf %70, %74 : vector<8x1xf32>
    %76 = math.exp %75 : vector<8x1xf32>
    %77 = vector.broadcast %74 : vector<8x1xf32> to vector<8x16xf32>
    %78 = arith.subf %69, %77 : vector<8x16xf32>
    %79 = math.exp %78 : vector<8x16xf32>
    %80 = arith.mulf %76, %71 : vector<8x1xf32>
    %cst_57 = arith.constant dense<0.000000e+00> : vector<8xf32>
    %81 = vector.multi_reduction <add>, %79, %cst_57 [1] : vector<8x16xf32> to vector<8xf32>
    %82 = vector.shape_cast %81 : vector<8xf32> to vector<8x1xf32>
    %83 = arith.addf %80, %82 : vector<8x1xf32>
    %c0_58 = arith.constant 0 : index
    %c2_59 = arith.constant 2 : index
    %84 = vector.load %arg7[%c0_58, %c2_59] : memref<8x4xf32, #tpu.memory_space<vmem>>, vector<8x1xf32>
    tpu.vector_store %arg7[%c0_58, %c2_59], %83 {strides = array<i32>} : memref<8x4xf32, #tpu.memory_space<vmem>>, vector<8x1xf32>,
    %c0_60 = arith.constant 0 : index
    %c2_61 = arith.constant 2 : index
    %85 = vector.load %arg6[%c0_60, %c2_61] : memref<8x4xf32, #tpu.memory_space<vmem>>, vector<8x1xf32>
    tpu.vector_store %arg6[%c0_60, %c2_61], %74 {strides = array<i32>} : memref<8x4xf32, #tpu.memory_space<vmem>>, vector<8x1xf32>,
    %86 = arith.truncf %79 : vector<8x16xf32> to vector<8x16xbf16>
    %cst_62 = arith.constant dense<0.000000e+00> : vector<8x8xf32>
    %87 = tpu.matmul %86, %68, %cst_62 {dimension_numbers = #tpu.dot_dimension_numbers<[1], [0], [0], [1], [0, 0, 1, 1], [], []>} : vector<8x16xbf16>, vector<16x8xbf16>, vector<8x8xf32> -> vector<8x8xf32>
    %c0_63 = arith.constant 0 : index
    %c16_64 = arith.constant 16 : index
    %88 = vector.load %arg8[%c0_63, %c16_64] : memref<8x32xf32, #tpu.memory_space<vmem>>, vector<8x8xf32>
    %89 = vector.broadcast %76 : vector<8x1xf32> to vector<8x8xf32>
    %90 = arith.mulf %89, %88 : vector<8x8xf32>
    %91 = arith.addf %90, %87 : vector<8x8xf32>
    %c0_65 = arith.constant 0 : index
    %c16_66 = arith.constant 16 : index
    %92 = vector.load %arg8[%c0_65, %c16_66] : memref<8x32xf32, #tpu.memory_space<vmem>>, vector<8x8xf32>
    tpu.vector_store %arg8[%c0_65, %c16_66], %91 {strides = array<i32>} : memref<8x32xf32, #tpu.memory_space<vmem>>, vector<8x8xf32>,
    %c0_67 = arith.constant 0 : index
    %c0_68 = arith.constant 0 : index
    %c24 = arith.constant 24 : index
    %93 = vector.load %arg3[%c0_67, %c0_68, %c24] : memref<1x8x32xbf16, #tpu.memory_space<vmem>>, vector<1x8x8xbf16>
    %94 = vector.shape_cast %93 : vector<1x8x8xbf16> to vector<8x8xbf16>
    %c0_69 = arith.constant 0 : index
    %c0_70 = arith.constant 0 : index
    %c24_71 = arith.constant 24 : index
    %95 = vector.load %arg4[%c0_69, %c0_70, %c24_71] : memref<1x16x64xbf16, #tpu.memory_space<vmem>>, vector<1x16x8xbf16>
    %96 = vector.shape_cast %95 : vector<1x16x8xbf16> to vector<16x8xbf16>
    %c0_72 = arith.constant 0 : index
    %c0_73 = arith.constant 0 : index
    %c56 = arith.constant 56 : index
    %97 = vector.load %arg4[%c0_72, %c0_73, %c56] : memref<1x16x64xbf16, #tpu.memory_space<vmem>>, vector<1x16x8xbf16>
    %98 = vector.shape_cast %97 : vector<1x16x8xbf16> to vector<16x8xbf16>
    %cst_74 = arith.constant dense<0.000000e+00> : vector<8x16xf32>
    %99 = tpu.matmul %94, %96, %cst_74 {dimension_numbers = #tpu.dot_dimension_numbers<[1], [1], [0], [0], [0, 0, 1, 0], [], []>} : vector<8x8xbf16>, vector<16x8xbf16>, vector<8x16xf32> -> vector<8x16xf32>
    %c0_75 = arith.constant 0 : index
    %c3 = arith.constant 3 : index
    %100 = vector.load %arg6[%c0_75, %c3] : memref<8x4xf32, #tpu.memory_space<vmem>>, vector<8x1xf32>
    %c0_76 = arith.constant 0 : index
    %c3_77 = arith.constant 3 : index
    %101 = vector.load %arg7[%c0_76, %c3_77] : memref<8x4xf32, #tpu.memory_space<vmem>>, vector<8x1xf32>
    %cst_78 = arith.constant dense<0xFF800000> : vector<8xf32>
    %102 = vector.multi_reduction <maximumf>, %99, %cst_78 [1] : vector<8x16xf32> to vector<8xf32>
    %103 = vector.shape_cast %102 : vector<8xf32> to vector<8x1xf32>
    %104 = arith.maximumf %100, %103 : vector<8x1xf32>
    %105 = arith.subf %100, %104 : vector<8x1xf32>
    %106 = math.exp %105 : vector<8x1xf32>
    %107 = vector.broadcast %104 : vector<8x1xf32> to vector<8x16xf32>
    %108 = arith.subf %99, %107 : vector<8x16xf32>
    %109 = math.exp %108 : vector<8x16xf32>
    %110 = arith.mulf %106, %101 : vector<8x1xf32>
    %cst_79 = arith.constant dense<0.000000e+00> : vector<8xf32>
    %111 = vector.multi_reduction <add>, %109, %cst_79 [1] : vector<8x16xf32> to vector<8xf32>
    %112 = vector.shape_cast %111 : vector<8xf32> to vector<8x1xf32>
    %113 = arith.addf %110, %112 : vector<8x1xf32>
    %c0_80 = arith.constant 0 : index
    %c3_81 = arith.constant 3 : index
    %114 = vector.load %arg7[%c0_80, %c3_81] : memref<8x4xf32, #tpu.memory_space<vmem>>, vector<8x1xf32>
    tpu.vector_store %arg7[%c0_80, %c3_81], %113 {strides = array<i32>} : memref<8x4xf32, #tpu.memory_space<vmem>>, vector<8x1xf32>,
    %c0_82 = arith.constant 0 : index
    %c3_83 = arith.constant 3 : index
    %115 = vector.load %arg6[%c0_82, %c3_83] : memref<8x4xf32, #tpu.memory_space<vmem>>, vector<8x1xf32>
    tpu.vector_store %arg6[%c0_82, %c3_83], %104 {strides = array<i32>} : memref<8x4xf32, #tpu.memory_space<vmem>>, vector<8x1xf32>,
    %116 = arith.truncf %109 : vector<8x16xf32> to vector<8x16xbf16>
    %cst_84 = arith.constant dense<0.000000e+00> : vector<8x8xf32>
    %117 = tpu.matmul %116, %98, %cst_84 {dimension_numbers = #tpu.dot_dimension_numbers<[1], [0], [0], [1], [0, 0, 1, 1], [], []>} : vector<8x16xbf16>, vector<16x8xbf16>, vector<8x8xf32> -> vector<8x8xf32>
    %c0_85 = arith.constant 0 : index
    %c24_86 = arith.constant 24 : index
    %118 = vector.load %arg8[%c0_85, %c24_86] : memref<8x32xf32, #tpu.memory_space<vmem>>, vector<8x8xf32>
    %119 = vector.broadcast %106 : vector<8x1xf32> to vector<8x8xf32>
    %120 = arith.mulf %119, %118 : vector<8x8xf32>
    %121 = arith.addf %120, %117 : vector<8x8xf32>
    %c0_87 = arith.constant 0 : index
    %c24_88 = arith.constant 24 : index
    %122 = vector.load %arg8[%c0_87, %c24_88] : memref<8x32xf32, #tpu.memory_space<vmem>>, vector<8x8xf32>
    tpu.vector_store %arg8[%c0_87, %c24_88], %121 {strides = array<i32>} : memref<8x32xf32, #tpu.memory_space<vmem>>, vector<8x8xf32>,
    %c0_i32_89 = arith.constant 0 : i32
    %123 = arith.cmpi eq, %arg2, %c0_i32_89 : i32
    %124 = arith.extui %123 : i1 to i32
    %c0_i32_90 = arith.constant 0 : i32
    %125 = arith.cmpi ne, %124, %c0_i32_90 : i32
    scf.if %125 {
      %c0_91 = arith.constant 0 : index
      %c0_92 = arith.constant 0 : index
      %126 = vector.load %arg7[%c0_91, %c0_92] : memref<8x4xf32, #tpu.memory_space<vmem>>, vector<8x1xf32>
      %127 = tpu.reciprocal %126 {approx = true} : vector<8x1xf32> -> vector<8x1xf32>
      %c0_93 = arith.constant 0 : index
      %c0_94 = arith.constant 0 : index
      %128 = vector.load %arg8[%c0_93, %c0_94] : memref<8x32xf32, #tpu.memory_space<vmem>>, vector<8x8xf32>
      %129 = vector.broadcast %127 : vector<8x1xf32> to vector<8x8xf32>
      %130 = arith.mulf %128, %129 : vector<8x8xf32>
      %c0_95 = arith.constant 0 : index
      %c0_96 = arith.constant 0 : index
      %131 = vector.load %arg8[%c0_95, %c0_96] : memref<8x32xf32, #tpu.memory_space<vmem>>, vector<8x8xf32>
      tpu.vector_store %arg8[%c0_95, %c0_96], %130 {strides = array<i32>} : memref<8x32xf32, #tpu.memory_space<vmem>>, vector<8x8xf32>,
      %c0_97 = arith.constant 0 : index
      %c1_98 = arith.constant 1 : index
      %132 = vector.load %arg7[%c0_97, %c1_98] : memref<8x4xf32, #tpu.memory_space<vmem>>, vector<8x1xf32>
      %133 = tpu.reciprocal %132 {approx = true} : vector<8x1xf32> -> vector<8x1xf32>
      %c0_99 = arith.constant 0 : index
      %c8_100 = arith.constant 8 : index
      %134 = vector.load %arg8[%c0_99, %c8_100] : memref<8x32xf32, #tpu.memory_space<vmem>>, vector<8x8xf32>
      %135 = vector.broadcast %133 : vector<8x1xf32> to vector<8x8xf32>
      %136 = arith.mulf %134, %135 : vector<8x8xf32>
      %c0_101 = arith.constant 0 : index
      %c8_102 = arith.constant 8 : index
      %137 = vector.load %arg8[%c0_101, %c8_102] : memref<8x32xf32, #tpu.memory_space<vmem>>, vector<8x8xf32>
      tpu.vector_store %arg8[%c0_101, %c8_102], %136 {strides = array<i32>} : memref<8x32xf32, #tpu.memory_space<vmem>>, vector<8x8xf32>,
      %c0_103 = arith.constant 0 : index
      %c2_104 = arith.constant 2 : index
      %138 = vector.load %arg7[%c0_103, %c2_104] : memref<8x4xf32, #tpu.memory_space<vmem>>, vector<8x1xf32>
      %139 = tpu.reciprocal %138 {approx = true} : vector<8x1xf32> -> vector<8x1xf32>
      %c0_105 = arith.constant 0 : index
      %c16_106 = arith.constant 16 : index
      %140 = vector.load %arg8[%c0_105, %c16_106] : memref<8x32xf32, #tpu.memory_space<vmem>>, vector<8x8xf32>
      %141 = vector.broadcast %139 : vector<8x1xf32> to vector<8x8xf32>
      %142 = arith.mulf %140, %141 : vector<8x8xf32>
      %c0_107 = arith.constant 0 : index
      %c16_108 = arith.constant 16 : index
      %143 = vector.load %arg8[%c0_107, %c16_108] : memref<8x32xf32, #tpu.memory_space<vmem>>, vector<8x8xf32>
      tpu.vector_store %arg8[%c0_107, %c16_108], %142 {strides = array<i32>} : memref<8x32xf32, #tpu.memory_space<vmem>>, vector<8x8xf32>,
      %c0_109 = arith.constant 0 : index
      %c3_110 = arith.constant 3 : index
      %144 = vector.load %arg7[%c0_109, %c3_110] : memref<8x4xf32, #tpu.memory_space<vmem>>, vector<8x1xf32>
      %145 = tpu.reciprocal %144 {approx = true} : vector<8x1xf32> -> vector<8x1xf32>
      %c0_111 = arith.constant 0 : index
      %c24_112 = arith.constant 24 : index
      %146 = vector.load %arg8[%c0_111, %c24_112] : memref<8x32xf32, #tpu.memory_space<vmem>>, vector<8x8xf32>
      %147 = vector.broadcast %145 : vector<8x1xf32> to vector<8x8xf32>
      %148 = arith.mulf %146, %147 : vector<8x8xf32>
      %c0_113 = arith.constant 0 : index
      %c24_114 = arith.constant 24 : index
      %149 = vector.load %arg8[%c0_113, %c24_114] : memref<8x32xf32, #tpu.memory_space<vmem>>, vector<8x8xf32>
      tpu.vector_store %arg8[%c0_113, %c24_114], %148 {strides = array<i32>} : memref<8x32xf32, #tpu.memory_space<vmem>>, vector<8x8xf32>,
      %c0_115 = arith.constant 0 : index
      %c0_116 = arith.constant 0 : index
      %150 = vector.load %arg8[%c0_115, %c0_116] : memref<8x32xf32, #tpu.memory_space<vmem>>, vector<8x32xf32>
      %151 = arith.truncf %150 : vector<8x32xf32> to vector<8x32xbf16>
      %c0_117 = arith.constant 0 : index
      %c0_118 = arith.constant 0 : index
      %c0_119 = arith.constant 0 : index
      %152 = vector.load %arg5[%c0_117, %c0_118, %c0_119] : memref<1x8x32xbf16, #tpu.memory_space<vmem>>, vector<1x8x32xbf16>
      %153 = vector.shape_cast %152 : vector<1x8x32xbf16> to vector<8x32xbf16>
      %154 = vector.shape_cast %151 : vector<8x32xbf16> to vector<1x8x32xbf16>
      tpu.vector_store %arg5[%c0_117, %c0_118, %c0_119], %154 {strides = array<i32>} : memref<1x8x32xbf16, #tpu.memory_space<vmem>>, vector<1x8x32xbf16>,
    } else {
    }
    return
  }
  func.func @transform_0(%arg0: i32, %arg1: i32, %arg2: i32) -> (i32, i32, i32) {
    %c0_i32 = arith.constant 0 : i32
    %c0_i32_0 = arith.constant 0 : i32
    return %arg0, %arg1, %c0_i32 : i32, i32, i32
  }
  func.func @transform_1(%arg0: i32, %arg1: i32, %arg2: i32) -> (i32, i32, i32) {
    %c0_i32 = arith.constant 0 : i32
    %c0_i32_0 = arith.constant 0 : i32
    return %arg0, %arg2, %c0_i32 : i32, i32, i32
  }
  func.func @transform_2(%arg0: i32, %arg1: i32, %arg2: i32) -> (i32, i32, i32) {
    %c0_i32 = arith.constant 0 : i32
    %c0_i32_0 = arith.constant 0 : i32
    return %arg0, %arg1, %c0_i32 : i32, i32, i32
  }
}

module attributes {stable_mosaic.version = 11 : i64} {
  func.func @kernel(%arg0: i32, %arg1: i32, %arg2: i32, %arg3: memref<16x128xbf16, #tpu.memory_space<vmem>>, %arg4: memref<128x128xbf16, #tpu.memory_space<vmem>>, %arg5: memref<1x128xf32, #tpu.memory_space<vmem>>, %arg6: memref<16x128xbf16, #tpu.memory_space<vmem>>, %arg7: memref<16x128xf32, #tpu.memory_space<vmem>>) attributes {dimension_semantics = [#tpu.dimension_semantics<parallel>, #tpu.dimension_semantics<parallel>, #tpu.dimension_semantics<arbitrary>], iteration_bounds = array<i64: 1, 1, 1>, scalar_prefetch = 0 : i64, scratch_operands = 1 : i64, tpu.core_type = #tpu.core_type<tc>, window_params = [{transform_indices = @transform_0, window_bounds = array<i64: 16, 128>}, {transform_indices = @transform_1, window_bounds = array<i64: 128, 128>}, {transform_indices = @transform_2, window_bounds = array<i64: 1, 128>}, {transform_indices = @transform_3, window_bounds = array<i64: 16, 128>}]} {
    %c0_i32 = arith.constant 0 : i32
    %0 = arith.cmpi eq, %arg2, %c0_i32 : i32
    %1 = arith.extui %0 : i1 to i32
    %c0_i32_0 = arith.constant 0 : i32
    %2 = arith.cmpi ne, %1, %c0_i32_0 : i32
    scf.if %2 {
      %cst_10 = arith.constant 0.000000e+00 : f32
      %12 = vector.broadcast %cst_10 : f32 to vector<16x128xf32>
      %c0_11 = arith.constant 0 : index
      %c0_12 = arith.constant 0 : index
      %13 = vector.load %arg7[%c0_11, %c0_12] : memref<16x128xf32, #tpu.memory_space<vmem>>, vector<16x128xf32>
      tpu.vector_store %arg7[%c0_11, %c0_12], %12 {strides = array<i32>} : memref<16x128xf32, #tpu.memory_space<vmem>>, vector<16x128xf32>,
    } else {
    }
    %c0 = arith.constant 0 : index
    %c0_1 = arith.constant 0 : index
    %3 = vector.load %arg7[%c0, %c0_1] : memref<16x128xf32, #tpu.memory_space<vmem>>, vector<16x128xf32>
    %c0_2 = arith.constant 0 : index
    %c0_3 = arith.constant 0 : index
    %4 = vector.load %arg3[%c0_2, %c0_3] : memref<16x128xbf16, #tpu.memory_space<vmem>>, vector<16x128xbf16>
    %c0_4 = arith.constant 0 : index
    %c0_5 = arith.constant 0 : index
    %5 = vector.load %arg4[%c0_4, %c0_5] : memref<128x128xbf16, #tpu.memory_space<vmem>>, vector<128x128xbf16>
    %cst = arith.constant dense<0.000000e+00> : vector<16x128xf32>
    %6 = tpu.matmul %4, %5, %cst {dimension_numbers = #tpu.dot_dimension_numbers<[1], [0], [0], [1], [0, 0, 1, 1], [], []>} : vector<16x128xbf16>, vector<128x128xbf16>, vector<16x128xf32> -> vector<16x128xf32>
    %7 = arith.addf %3, %6 : vector<16x128xf32>
    %c0_6 = arith.constant 0 : index
    %c0_7 = arith.constant 0 : index
    %8 = vector.load %arg7[%c0_6, %c0_7] : memref<16x128xf32, #tpu.memory_space<vmem>>, vector<16x128xf32>
    tpu.vector_store %arg7[%c0_6, %c0_7], %7 {strides = array<i32>} : memref<16x128xf32, #tpu.memory_space<vmem>>, vector<16x128xf32>,
    %c0_i32_8 = arith.constant 0 : i32
    %9 = arith.cmpi eq, %arg2, %c0_i32_8 : i32
    %10 = arith.extui %9 : i1 to i32
    %c0_i32_9 = arith.constant 0 : i32
    %11 = arith.cmpi ne, %10, %c0_i32_9 : i32
    scf.if %11 {
      %c0_10 = arith.constant 0 : index
      %c0_11 = arith.constant 0 : index
      %12 = vector.load %arg7[%c0_10, %c0_11] : memref<16x128xf32, #tpu.memory_space<vmem>>, vector<16x128xf32>
      %c0_12 = arith.constant 0 : index
      %c0_13 = arith.constant 0 : index
      %13 = vector.load %arg5[%c0_12, %c0_13] : memref<1x128xf32, #tpu.memory_space<vmem>>, vector<1x128xf32>
      %14 = vector.broadcast %13 : vector<1x128xf32> to vector<16x128xf32>
      %15 = arith.addf %12, %14 : vector<16x128xf32>
      %cst_14 = arith.constant 5.000000e-01 : f32
      %16 = vector.broadcast %cst_14 : f32 to vector<16x128xf32>
      %17 = arith.mulf %16, %15 : vector<16x128xf32>
      %cst_15 = arith.constant 0.707106769 : f32
      %18 = vector.broadcast %cst_15 : f32 to vector<16x128xf32>
      %19 = arith.mulf %15, %18 : vector<16x128xf32>
      %20 = math.erf %19 : vector<16x128xf32>
      %cst_16 = arith.constant 1.000000e+00 : f32
      %21 = vector.broadcast %cst_16 : f32 to vector<16x128xf32>
      %22 = arith.addf %21, %20 : vector<16x128xf32>
      %23 = arith.mulf %17, %22 : vector<16x128xf32>
      %24 = arith.truncf %23 : vector<16x128xf32> to vector<16x128xbf16>
      %c0_17 = arith.constant 0 : index
      %c0_18 = arith.constant 0 : index
      %25 = vector.load %arg6[%c0_17, %c0_18] : memref<16x128xbf16, #tpu.memory_space<vmem>>, vector<16x128xbf16>
      tpu.vector_store %arg6[%c0_17, %c0_18], %24 {strides = array<i32>} : memref<16x128xbf16, #tpu.memory_space<vmem>>, vector<16x128xbf16>,
    } else {
    }
    return
  }
  func.func @transform_0(%arg0: i32, %arg1: i32, %arg2: i32) -> (i32, i32) {
    %c0_i32 = arith.constant 0 : i32
    return %arg0, %arg2 : i32, i32
  }
  func.func @transform_1(%arg0: i32, %arg1: i32, %arg2: i32) -> (i32, i32) {
    %c0_i32 = arith.constant 0 : i32
    return %arg2, %arg1 : i32, i32
  }
  func.func @transform_2(%arg0: i32, %arg1: i32, %arg2: i32) -> (i32, i32) {
    %c0_i32 = arith.constant 0 : i32
    %c0_i32_0 = arith.constant 0 : i32
    return %c0_i32, %arg1 : i32, i32
  }
  func.func @transform_3(%arg0: i32, %arg1: i32, %arg2: i32) -> (i32, i32) {
    %c0_i32 = arith.constant 0 : i32
    return %arg0, %arg1 : i32, i32
  }
}

module attributes {stable_mosaic.version = 11 : i64} {
  func.func @kernel(%arg0: i32, %arg1: memref<16x32xbf16, #tpu.memory_space<vmem>>, %arg2: memref<128x32xbf16, #tpu.memory_space<vmem>>, %arg3: memref<16x128xf32, #tpu.memory_space<vmem>>) attributes {dimension_semantics = [#tpu.dimension_semantics<parallel>], iteration_bounds = array<i64: 1>, scalar_prefetch = 0 : i64, scratch_operands = 0 : i64, tpu.core_type = #tpu.core_type<tc>, window_params = [{pipeline_mode = #tpu.pipeline_mode<synchronous>, transform_indices = @transform_0, window_bounds = array<i64: 16, 32>}, {transform_indices = @transform_1, window_bounds = array<i64: 128, 32>}, {transform_indices = @transform_2, window_bounds = array<i64: 16, 128>}]} {
    %c0 = arith.constant 0 : index
    %c0_0 = arith.constant 0 : index
    %0 = vector.load %arg1[%c0, %c0_0] : memref<16x32xbf16, #tpu.memory_space<vmem>>, vector<16x32xbf16>
    %c0_1 = arith.constant 0 : index
    %c0_2 = arith.constant 0 : index
    %1 = vector.load %arg2[%c0_1, %c0_2] : memref<128x32xbf16, #tpu.memory_space<vmem>>, vector<128x32xbf16>
    %cst = arith.constant dense<0.000000e+00> : vector<16x128xf32>
    %2 = tpu.matmul %0, %1, %cst {dimension_numbers = #tpu.dot_dimension_numbers<[1], [1], [0], [0], [0, 0, 1, 0], [], []>} : vector<16x32xbf16>, vector<128x32xbf16>, vector<16x128xf32> -> vector<16x128xf32>
    %c0_3 = arith.constant 0 : index
    %c0_4 = arith.constant 0 : index
    %3 = vector.load %arg3[%c0_3, %c0_4] : memref<16x128xf32, #tpu.memory_space<vmem>>, vector<16x128xf32>
    tpu.vector_store %arg3[%c0_3, %c0_4], %2 {strides = array<i32>} : memref<16x128xf32, #tpu.memory_space<vmem>>, vector<16x128xf32>,
    return
  }
  func.func @transform_0(%arg0: i32) -> (i32, i32) {
    %c0_i32 = arith.constant 0 : i32
    %c0_i32_0 = arith.constant 0 : i32
    %c0_i32_1 = arith.constant 0 : i32
    return %c0_i32, %c0_i32_0 : i32, i32
  }
  func.func @transform_1(%arg0: i32) -> (i32, i32) {
    %c0_i32 = arith.constant 0 : i32
    %c0_i32_0 = arith.constant 0 : i32
    return %arg0, %c0_i32 : i32, i32
  }
  func.func @transform_2(%arg0: i32) -> (i32, i32) {
    %c0_i32 = arith.constant 0 : i32
    %c0_i32_0 = arith.constant 0 : i32
    return %c0_i32, %arg0 : i32, i32
  }
}

</mosaic_0001>

<bundles_post_ra>
// kernel: _lambda_.47
= control target key start
LH: loop header
LB: loop body
LE: loop exit
PB: predicated region body
PF: predicated region fallthrough
CT: control target
= control target key end

     0   :  { %s525_s1 = inlined_call_operand.vmem [shape: bf16[128,128], index: 1, kind: input, shape index: {}]   ;;  %s526_s0 = inlined_call_operand.vmem [shape: bf16[64,128], index: 0, kind: input, shape index: {}]   ;;  %s527_s2 = inlined_call_operand.vmem [shape: f32[1,128], index: 2, kind: input, shape index: {}]   ;;  %s528_s3 = inlined_call_operand.vmem [shape: bf16[64,128], index: 3, kind: output, shape index: {}]  }
   0x1   :  { %v426_v0 = vld [vmem:[%s525_s1] sm:$0xff]   ;;  %v427_v1 = vld [vmem:[%s525_s1 + $0x8] sm:$0xff]   ;;  %v428_v2 = vld [vmem:[%s525_s1 + $0x10] sm:$0xff]  }
   0x2   :  { %386 = vmatprep.subr.bf16.mxu0 %v426_v0  ;;  %410 = vmatprep.subr.bf16.mxu1 %v426_v0  ;;  %v429_v3 = vld [vmem:[%s525_s1 + $0x18] sm:$0xff]   ;;  %v434_v4 = vld [vmem:[%s526_s0] sm:$0xff]   ;;  %v435_v5 = vld [vmem:[%s526_s0 + $0x10] sm:$0xff]  }
   0x3   :  { %387 = vmatpush3.bf16.msra.mxu0 %v426_v0  ;;  %418 = vmatpush3.bf16.msra.mxu1 %v426_v0  ;;  %v430_v6 = vld [vmem:[%s525_s1 + $0x20] sm:$0xff]   ;;  %v431_v7 = vld [vmem:[%s525_s1 + $0x28] sm:$0xff]   ;;  %v432_v8 = vld [vmem:[%s525_s1 + $0x30] sm:$0xff]  }
   0x4   :  { %388 = vmatprep.subr.bf16.mxu0 %v427_v1  ;;  %411 = vmatprep.subr.bf16.mxu1 %v427_v1  ;;  %v433_v9 = vld [vmem:[%s525_s1 + $0x38] sm:$0xff]   ;;  %v436_v10 = vld [vmem:[%s526_s0 + $0x8] sm:$0xff]   ;;  %v334_v12 = vld [vmem:[%s527_s2] ss:$0 sm:$0xff] }
   0x5   :  { %402 = vmatprep.mubr.bf16.mxu0 %v434_v4  ;;  %406 = vmatprep.mubr.bf16.mxu1 %v435_v5  ;;  %v437_v11 = vld [vmem:[%s526_s0 + $0x18] sm:$0xff]  }
   0x7   :  { %389 = vmatpush3.bf16.msra.mxu0 %v427_v1  ;;  %419 = vmatpush3.bf16.msra.mxu1 %v427_v1 }
   0x8   :  { %390 = vmatprep.subr.bf16.mxu0 %v428_v2  ;;  %412 = vmatprep.subr.bf16.mxu1 %v428_v2 }
   0xb   :  { %391 = vmatpush3.bf16.msra.mxu0 %v428_v2  ;;  %420 = vmatpush3.bf16.msra.mxu1 %v428_v2 }
   0xc   :  { %392 = vmatprep.subr.bf16.mxu0 %v429_v3  ;;  %413 = vmatprep.subr.bf16.mxu1 %v429_v3 }
   0xf   :  { %393 = vmatpush3.bf16.msra.mxu0 %v429_v3  ;;  %421 = vmatpush3.bf16.msra.mxu1 %v429_v3 }
  0x10   :  { %394 = vmatprep.subr.bf16.mxu0 %v430_v6  ;;  %414 = vmatprep.subr.bf16.mxu1 %v430_v6 }
  0x13   :  { %395 = vmatpush3.bf16.msra.mxu0 %v430_v6  ;;  %422 = vmatpush3.bf16.msra.mxu1 %v430_v6 }
  0x14   :  { %396 = vmatprep.subr.bf16.mxu0 %v431_v7  ;;  %415 = vmatprep.subr.bf16.mxu1 %v431_v7 }
  0x17   :  { %397 = vmatpush3.bf16.msra.mxu0 %v431_v7  ;;  %423 = vmatpush3.bf16.msra.mxu1 %v431_v7 }
  0x18   :  { %398 = vmatprep.subr.bf16.mxu0 %v432_v8  ;;  %416 = vmatprep.subr.bf16.mxu1 %v432_v8 }
  0x1b   :  { %399 = vmatpush3.bf16.msra.mxu0 %v432_v8  ;;  %424 = vmatpush3.bf16.msra.mxu1 %v432_v8 }
  0x1c   :  { %400 = vmatprep.subr.bf16.mxu0 %v433_v9  ;;  %417 = vmatprep.subr.bf16.mxu1 %v433_v9 }
  0x1f   :  { %401 = vmatpush3.bf16.msra.mxu0 %v433_v9  ;;  %425 = vmatpush3.bf16.msra.mxu1 %v433_v9 }
  0x22   :  { %403 = vmatmul.mubr.bf16.vlgmr.msra.gmra.mrb[0].mxu0 %v436_v10  ;;  %407 = vmatmul.mubr.bf16.vlgmr.msra.gmra.mrb[0].mxu1 %v437_v11 }
  0xf5   :  { %v404_v13 = vpop.f32.mrb[0].mxu0  ;;  %v408_v14 = vpop.f32.mrb[0].mxu1 }
  0xf6   :  { %v232_v15 = vadd.f32 %v404_v13, %v334_v12  ;;  %v236_v16 = vadd.f32 %v408_v14, %v334_v12  ;;  %v165_v17 = vpop.f32.mrb[1].mxu0  ;;  %v181_v18 = vpop.f32.mrb[1].mxu1 }
  0xf7   :  { %v230_v19 = vadd.f32 %v334_v12, %v165_v17  ;;  %v234_v20 = vadd.f32 %v334_v12, %v181_v18  ;;  %v405_v21 = vpop.f32.mrb[2].mxu0  ;;  %v409_v22 = vpop.f32.mrb[2].mxu1 }
  0xf8   :  { %v248_v23 = vmul.f32 0.70710677, %v232_v15  ;;  %v252_v24 = vmul.f32 0.70710677, %v236_v16  ;;  %v233_v27 = vadd.f32 %v405_v21, %v334_v12  ;;  %v237_v28 = vadd.f32 %v409_v22, %v334_v12  ;;  %v168_v29 = vpop.f32.mrb[3].mxu0  ;;  %v184_v30 = vpop.f32.mrb[3].mxu1 }
  0xf9   :  { %v246_v25 = vmul.f32 0.70710677, %v230_v19  ;;  %v250_v26 = vmul.f32 0.70710677, %v234_v20  ;;  %v231_v31 = vadd.f32 %v334_v12, %v168_v29  ;;  %v235_v32 = vadd.f32 %v334_v12, %v184_v30 }
  0xfa   :  { %438 = verf.f32 %v248_v23  ;;  %v249_v33 = vmul.f32 0.70710677, %v233_v27  ;;  %v253_v34 = vmul.f32 0.70710677, %v237_v28  ;;  %v240_v43 = vmul.f32 0.5, %v232_v15 }
  0xfb   :  { %440 = verf.f32 %v252_v24  ;;  %v247_v35 = vmul.f32 0.70710677, %v231_v31  ;;  %v251_v36 = vmul.f32 0.70710677, %v235_v32  ;;  %v244_v44 = vmul.f32 0.5, %v236_v16 }
  0xfc   :  { %442 = verf.f32 %v246_v25  ;;  %v238_v47 = vmul.f32 0.5, %v230_v19  ;;  %v241_v49 = vmul.f32 0.5, %v233_v27  ;;  %v242_v52 = vmul.f32 0.5, %v234_v20 }
  0xfd   :  { %444 = verf.f32 %v250_v26  ;;  %v245_v54 = vmul.f32 0.5, %v237_v28  ;;  %v239_v59 = vmul.f32 0.5, %v231_v31  ;;  %v243_v63 = vmul.f32 0.5, %v235_v32 }
  0xfe   :  { %446 = verf.f32 %v249_v33 }
  0xff   :  { %448 = verf.f32 %v253_v34 }
 0x100   :  { %450 = verf.f32 %v247_v35 }
 0x101   :  { %452 = verf.f32 %v251_v36 }
 0x104   :  { %v439_v37 = vpop.eup %438 }
 0x105   :  { %v441_v38 = vpop.eup %440  ;;  %v264_v41 = vadd.f32 1.0, %v439_v37 }
 0x106   :  { %v443_v39 = vpop.eup %442  ;;  %v268_v45 = vadd.f32 1.0, %v441_v38 }
 0x107   :  { %v445_v40 = vpop.eup %444  ;;  %v262_v48 = vadd.f32 1.0, %v443_v39  ;;  %v272_v57 = vmul.f32 %v264_v41, %v240_v43 }
 0x108   :  { %v447_v42 = vpop.eup %446  ;;  %v266_v53 = vadd.f32 1.0, %v445_v40  ;;  %v276_v61 = vmul.f32 %v268_v45, %v244_v44 }
 0x109   :  { %v449_v46 = vpop.eup %448  ;;  %v265_v50 = vadd.f32 1.0, %v447_v42  ;;  %v270_v1 = vmul.f32 %v262_v48, %v238_v47 }
 0x10a   :  { %v451_v51 = vpop.eup %450  ;;  %v269_v55 = vadd.f32 1.0, %v449_v46  ;;  %v274_v4 = vmul.f32 %v266_v53, %v242_v52 }
 0x10b   :  { %v453_v56 = vpop.eup %452  ;;  %v273_v58 = vmul.f32 %v265_v50, %v241_v49  ;;  %v263_v60 = vadd.f32 1.0, %v451_v51 }
 0x10c   :  { %v277_v62 = vmul.f32 %v269_v55, %v245_v54  ;;  %v267_v0 = vadd.f32 1.0, %v453_v56 }
 0x10d   :  { %v359_v2 = vpack.c.bf16 %v273_v58, %v272_v57  ;;  %v271_v3 = vmul.f32 %v263_v60, %v239_v59 }
 0x10e   :  { %v369_v5 = vpack.c.bf16 %v277_v62, %v276_v61  ;;  %v275_v6 = vmul.f32 %v267_v0, %v243_v63 }
 0x10f   :  { %371 = vst [vmem:[%s528_s3 + $0x8] sm:$0xff] %v359_v2   ;;  %v354_v7 = vpack.c.bf16 %v271_v3, %v270_v1 }
 0x110   :  { %373 = vst [vmem:[%s528_s3 + $0x18] sm:$0xff] %v369_v5   ;;  %v364_v8 = vpack.c.bf16 %v275_v6, %v274_v4 }
 0x111   :  { %355 = vst [vmem:[%s528_s3] sm:$0xff] %v354_v7  }
 0x112   :  { %372 = vst [vmem:[%s528_s3 + $0x10] sm:$0xff] %v364_v8  }

// kernel: _lambda_.48
= control target key start
LH: loop header
LB: loop body
LE: loop exit
PB: predicated region body
PF: predicated region fallthrough
CT: control target
= control target key end

     0   :  { %s363_s1 = inlined_call_operand.vmem [shape: bf16[128,128], index: 1, kind: input, shape index: {}]   ;;  %s364_s0 = inlined_call_operand.vmem [shape: bf16[32,128], index: 0, kind: input, shape index: {}]   ;;  %s365_s2 = inlined_call_operand.vmem [shape: f32[1,128], index: 2, kind: input, shape index: {}]   ;;  %s366_s3 = inlined_call_operand.vmem [shape: bf16[32,128], index: 3, kind: output, shape index: {}]  }
   0x1   :  { %v286_v0 = vld [vmem:[%s363_s1] sm:$0xff]   ;;  %v287_v1 = vld [vmem:[%s363_s1 + $0x8] sm:$0xff]   ;;  %v288_v2 = vld [vmem:[%s363_s1 + $0x10] sm:$0xff]  }
   0x2   :  { %266 = vmatprep.subr.bf16.mxu0 %v286_v0  ;;  %v289_v3 = vld [vmem:[%s363_s1 + $0x18] sm:$0xff]   ;;  %v294_v4 = vld [vmem:[%s364_s0] sm:$0xff]   ;;  %v291_v6 = vld [vmem:[%s363_s1 + $0x28] sm:$0xff]  }
   0x3   :  { %267 = vmatpush3.bf16.msra.mxu0 %v286_v0  ;;  %282 = vmatprep.mubr.bf16.mxu0 %v294_v4  ;;  %v290_v5 = vld [vmem:[%s363_s1 + $0x20] sm:$0xff]   ;;  %v292_v7 = vld [vmem:[%s363_s1 + $0x30] sm:$0xff]   ;;  %v293_v8 = vld [vmem:[%s363_s1 + $0x38] sm:$0xff]  }
   0x4   :  { %268 = vmatprep.subr.bf16.mxu0 %v287_v1  ;;  %v295_v9 = vld [vmem:[%s364_s0 + $0x8] sm:$0xff]   ;;  %v236_v10 = vld [vmem:[%s365_s2] ss:$0 sm:$0xff] }
   0x7   :  { %269 = vmatpush3.bf16.msra.mxu0 %v287_v1 }
   0x8   :  { %270 = vmatprep.subr.bf16.mxu0 %v288_v2 }
   0xb   :  { %271 = vmatpush3.bf16.msra.mxu0 %v288_v2 }
   0xc   :  { %272 = vmatprep.subr.bf16.mxu0 %v289_v3 }
   0xf   :  { %273 = vmatpush3.bf16.msra.mxu0 %v289_v3 }
  0x10   :  { %274 = vmatprep.subr.bf16.mxu0 %v290_v5 }
  0x13   :  { %275 = vmatpush3.bf16.msra.mxu0 %v290_v5 }
  0x14   :  { %276 = vmatprep.subr.bf16.mxu0 %v291_v6 }
  0x17   :  { %277 = vmatpush3.bf16.msra.mxu0 %v291_v6 }
  0x18   :  { %278 = vmatprep.subr.bf16.mxu0 %v292_v7 }
  0x1b   :  { %279 = vmatpush3.bf16.msra.mxu0 %v292_v7 }
  0x1c   :  { %280 = vmatprep.subr.bf16.mxu0 %v293_v8 }
  0x1f   :  { %281 = vmatpush3.bf16.msra.mxu0 %v293_v8 }
  0x22   :  { %283 = vmatmul.mubr.bf16.vlgmr.msra.gmra.mrb[0].mxu0 %v295_v9 }
  0xf5   :  { %v284_v11 = vpop.f32.mrb[0].mxu0 }
  0xf6   :  { %v180_v12 = vadd.f32 %v284_v11, %v236_v10  ;;  %v141_v13 = vpop.f32.mrb[1].mxu0 }
  0xf7   :  { %v178_v14 = vadd.f32 %v236_v10, %v141_v13  ;;  %v285_v15 = vpop.f32.mrb[2].mxu0 }
  0xf8   :  { %v188_v16 = vmul.f32 0.70710677, %v180_v12  ;;  %v181_v17 = vadd.f32 %v285_v15, %v236_v10  ;;  %v144_v18 = vpop.f32.mrb[3].mxu0  ;;  %v184_v29 = vmul.f32 0.5, %v180_v12 }
  0xf9   :  { %v186_v19 = vmul.f32 0.70710677, %v178_v14  ;;  %v179_v20 = vadd.f32 %v236_v10, %v144_v18  ;;  %v182_v32 = vmul.f32 0.5, %v178_v14 }
  0xfa   :  { %296 = verf.f32 %v188_v16  ;;  %v189_v21 = vmul.f32 0.70710677, %v181_v17  ;;  %v185_v30 = vmul.f32 0.5, %v181_v17 }
  0xfb   :  { %298 = verf.f32 %v186_v19  ;;  %v187_v22 = vmul.f32 0.70710677, %v179_v20  ;;  %v183_v33 = vmul.f32 0.5, %v179_v20 }
  0xfc   :  { %300 = verf.f32 %v189_v21 }
  0xfd   :  { %302 = verf.f32 %v187_v22 }
 0x104   :  { %v297_v23 = vpop.eup %296 }
 0x105   :  { %v299_v24 = vpop.eup %298  ;;  %v196_v25 = vadd.f32 1.0, %v297_v23 }
 0x106   :  { %v301_v26 = vpop.eup %300  ;;  %v194_v27 = vadd.f32 1.0, %v299_v24 }
 0x107   :  { %v303_v28 = vpop.eup %302  ;;  %v197_v31 = vadd.f32 1.0, %v301_v26  ;;  %v200_v35 = vmul.f32 %v196_v25, %v184_v29 }
 0x108   :  { %v195_v34 = vadd.f32 1.0, %v303_v28  ;;  %v198_v37 = vmul.f32 %v194_v27, %v182_v32 }
 0x109   :  { %v201_v36 = vmul.f32 %v197_v31, %v185_v30 }
 0x10a   :  { %v199_v38 = vmul.f32 %v195_v34, %v183_v33 }
 0x10b   :  { %v253_v39 = vpack.c.bf16 %v201_v36, %v200_v35 }
 0x10c   :  { %v248_v40 = vpack.c.bf16 %v199_v38, %v198_v37 }
 0x10d   :  { %255 = vst [vmem:[%s366_s3 + $0x8] sm:$0xff] %v253_v39  }
 0x10e   :  { %249 = vst [vmem:[%s366_s3] sm:$0xff] %v248_v40  }

// kernel: _lambda_.49
= control target key start
LH: loop header
LB: loop body
LE: loop exit
PB: predicated region body
PF: predicated region fallthrough
CT: control target
= control target key end

     0   :  { %vm22_vm0 = vcmask 261120   ;;  %v78_v32 = vlaneseq  ;;  %vm112_vm1 = vcmask 257024   ;;  %s202_s0 = inlined_call_operand.vmem [shape: bf16[32,32], index: 0, kind: input, shape index: {}]   ;;  %s203_s1 = inlined_call_operand.vmem [shape: bf16[1,32], index: 1, kind: input, shape index: {}]   ;;  %s204_s2 = inlined_call_operand.vmem [shape: bf16[1,32], index: 2, kind: input, shape index: {}]   ;;  %s205_s3 = inlined_call_operand.vmem [shape: bf16[32,32], index: 3, kind: output, shape index: {}]  }
   0x1   :  { %v130_v0 = vld [vmem:[%s202_s0] sm:$0xff]   ;;  %v137_v1 = vld [vmem:[%s202_s0 + $0x8] sm:$0xff]  }
   0x2   :  { %v131_v2 = vunpack.c.l.bf16 %v130_v0  ;;  %v135_v3 = vunpack.c.l.bf16 %v137_v1  ;;  %v132_v4 = vunpack.c.h.bf16 %v130_v0  ;;  %v136_v5 = vunpack.c.h.bf16 %v137_v1  ;;  %v76_v39 = vld [vmem:[%s203_s1] sm:$0x1] }
   0x3   :  { %v79_v38 = vshrl.u32 %v78_v32, 7  ;;  %v86_v43 = vld [vmem:[%s204_s2] sm:$0x1]  ;;  %v77_v45 = vunpack.c.l.bf16 %v76_v39 }
   0x4   :  { %v23_v6 = vsel %vm22_vm0, %v131_v2, 0.0  ;;  %v29_v7 = vsel %vm22_vm0, %v135_v3, 0.0  ;;  %v26_v8 = vsel %vm22_vm0, %v132_v4, 0.0  ;;  %v32_v9 = vsel %vm22_vm0, %v136_v5, 0.0 }
   0x5   :  { %24 = vadd.xlane.f32.xlu0 %v23_v6  ;;  %30 = vadd.xlane.f32.xlu1 %v29_v7  ;;  %v80_v46 = vsub.s32 0, %v79_v38  ;;  %v87_v48 = vunpack.c.l.bf16 %v86_v43 }
   0x7   :  { %v81_v49 = vrot.slane %v77_v45, %v80_v46  ;;  %v91_v51 = vrot.slane %v87_v48, %v80_v46 }
   0x9   :  { %27 = vadd.xlane.f32.xlu0 %v26_v8  ;;  %33 = vadd.xlane.f32.xlu1 %v32_v9 }
  0x92   :  { %v25_v10 = vpop.xlane.xlu0 %24  ;;  %v31_v11 = vpop.xlane.xlu1 %30 }
  0x93   :  { %v36_v12 = vmul.f32 0.03125, %v25_v10  ;;  %v38_v13 = vmul.f32 0.03125, %v31_v11 }
  0x95   :  { %v40_v14 = vsub.f32 %v131_v2, %v36_v12  ;;  %v42_v15 = vsub.f32 %v135_v3, %v38_v13 }
  0x96   :  { %v28_v16 = vpop.xlane.xlu0 %27  ;;  %v34_v17 = vpop.xlane.xlu1 %33 }
  0x97   :  { %v37_v18 = vmul.f32 0.03125, %v28_v16  ;;  %v39_v19 = vmul.f32 0.03125, %v34_v17  ;;  %v44_v20 = vmul.f32 %v40_v14, %v40_v14  ;;  %v46_v21 = vmul.f32 %v42_v15, %v42_v15 }
  0x99   :  { %v41_v22 = vsub.f32 %v132_v4, %v37_v18  ;;  %v43_v23 = vsub.f32 %v136_v5, %v39_v19  ;;  %v48_v24 = vsel %vm22_vm0, %v44_v20, 0.0  ;;  %v54_v25 = vsel %vm22_vm0, %v46_v21, 0.0 }
  0x9a   :  { %49 = vadd.xlane.f32.xlu0 %v48_v24 }
  0x9b   :  { %v45_v26 = vmul.f32 %v41_v22, %v41_v22  ;;  %v47_v27 = vmul.f32 %v43_v23, %v43_v23 }
  0x9d   :  { %v51_v28 = vsel %vm22_vm0, %v45_v26, 0.0  ;;  %v57_v29 = vsel %vm22_vm0, %v47_v27, 0.0 }
  0x9e   :  { %55 = vadd.xlane.f32.xlu0 %v54_v25  ;;  %52 = vadd.xlane.f32.xlu1 %v51_v28 }
  0xa2   :  { %58 = vadd.xlane.f32.xlu1 %v57_v29 }
 0x127   :  { %v50_v30 = vpop.xlane.xlu0 %49 }
 0x128   :  { %v60_v31 = vmul.f32 0.03125, %v50_v30 }
 0x12a   :  { %v64_v33 = vadd.f32 1e-05, %v60_v31 }
 0x12b   :  { %v53_v34 = vpop.xlane.xlu1 %52  ;;  %v56_v35 = vpop.xlane.xlu0 %55 }
 0x12c   :  { %138 = vrsqrt.f32 %v64_v33  ;;  %v61_v36 = vmul.f32 0.03125, %v53_v34  ;;  %v62_v37 = vmul.f32 0.03125, %v56_v35 }
 0x12e   :  { %v65_v40 = vadd.f32 1e-05, %v61_v36  ;;  %v66_v41 = vadd.f32 1e-05, %v62_v37 }
 0x12f   :  { %v59_v42 = vpop.xlane.xlu1 %58 }
 0x130   :  { %140 = vrsqrt.f32 %v65_v40  ;;  %v63_v44 = vmul.f32 0.03125, %v59_v42 }
 0x131   :  { %142 = vrsqrt.f32 %v66_v41 }
 0x132   :  { %v67_v47 = vadd.f32 1e-05, %v63_v44 }
 0x134   :  { %144 = vrsqrt.f32 %v67_v47 }
 0x136   :  { %v139_v50 = vpop.eup %138 }
 0x137   :  { %v72_v52 = vmul.f32 %v139_v50, %v40_v14 }
 0x139   :  { %v82_v53 = vmul.f32 %v81_v49, %v72_v52 }
 0x13a   :  { %v141_v54 = vpop.eup %140 }
 0x13b   :  { %v143_v55 = vpop.eup %142  ;;  %v92_v56 = vadd.f32 %v91_v51, %v82_v53  ;;  %v73_v57 = vmul.f32 %v141_v54, %v41_v22 }
 0x13c   :  { %v74_v58 = vmul.f32 %v143_v55, %v42_v15 }
 0x13d   :  { %v125_v59 = vpack.c.bf16 %v92_v56, %v92_v56  ;;  %v83_v60 = vmul.f32 %v81_v49, %v73_v57 }
 0x13e   :  { %v145_v61 = vpop.eup %144  ;;  %v84_v62 = vmul.f32 %v81_v49, %v74_v58 }
 0x13f   :  { %113 = vst.msk [vmem:[%s205_s3] sm:$0xf] %vm112_vm1, %v125_v59  ;;  %v93_v63 = vadd.f32 %v91_v51, %v83_v60  ;;  %v75_v0 = vmul.f32 %v145_v61, %v43_v23 }
 0x140   :  { %v94_v1 = vadd.f32 %v91_v51, %v84_v62 }
 0x141   :  { %v126_v2 = vpack.c.bf16 %v93_v63, %v93_v63  ;;  %v85_v3 = vmul.f32 %v81_v49, %v75_v0 }
 0x142   :  { %v127_v4 = vpack.c.bf16 %v94_v1, %v94_v1 }
 0x143   :  { %114 = vst.msk [vmem:[%s205_s3 + $0x4] sm:$0xf] %vm112_vm1, %v126_v2  ;;  %v95_v5 = vadd.f32 %v91_v51, %v85_v3 }
 0x144   :  { %115 = vst.msk [vmem:[%s205_s3 + $0x8] sm:$0xf] %vm112_vm1, %v127_v4 }
 0x145   :  { %v128_v6 = vpack.c.bf16 %v95_v5, %v95_v5 }
 0x147   :  { %116 = vst.msk [vmem:[%s205_s3 + $0xc] sm:$0xf] %vm112_vm1, %v128_v6 }

// kernel: _lambda_.50
= control target key start
LH: loop header
LB: loop body
LE: loop exit
PB: predicated region body
PF: predicated region fallthrough
CT: control target
= control target key end

     0   :  { %s335_s1 = inlined_call_operand.vmem [shape: bf16[128,128], index: 1, kind: input, shape index: {}]   ;;  %s336_s0 = inlined_call_operand.vmem [shape: bf16[32,128], index: 0, kind: input, shape index: {}]   ;;  %s337_s2 = inlined_call_operand.vmem [shape: f32[1,128], index: 2, kind: input, shape index: {}]   ;;  %s338_s3 = inlined_call_operand.vmem [shape: bf16[32,128], index: 3, kind: output, shape index: {}]  }
   0x1   :  { %v266_v0 = vld [vmem:[%s335_s1] sm:$0xff]   ;;  %v267_v1 = vld [vmem:[%s335_s1 + $0x8] sm:$0xff]   ;;  %v268_v2 = vld [vmem:[%s335_s1 + $0x10] sm:$0xff]  }
   0x2   :  { %246 = vmatprep.subr.bf16.mxu0 %v266_v0  ;;  %v269_v3 = vld [vmem:[%s335_s1 + $0x18] sm:$0xff]   ;;  %v274_v4 = vld [vmem:[%s336_s0] sm:$0xff]   ;;  %v271_v6 = vld [vmem:[%s335_s1 + $0x28] sm:$0xff]  }
   0x3   :  { %247 = vmatpush3.bf16.msra.mxu0 %v266_v0  ;;  %262 = vmatprep.mubr.bf16.mxu0 %v274_v4  ;;  %v270_v5 = vld [vmem:[%s335_s1 + $0x20] sm:$0xff]   ;;  %v272_v7 = vld [vmem:[%s335_s1 + $0x30] sm:$0xff]   ;;  %v273_v8 = vld [vmem:[%s335_s1 + $0x38] sm:$0xff]  }
   0x4   :  { %248 = vmatprep.subr.bf16.mxu0 %v267_v1  ;;  %v275_v9 = vld [vmem:[%s336_s0 + $0x8] sm:$0xff]   ;;  %v216_v11 = vld [vmem:[%s337_s2] ss:$0 sm:$0xff] }
   0x7   :  { %249 = vmatpush3.bf16.msra.mxu0 %v267_v1 }
   0x8   :  { %250 = vmatprep.subr.bf16.mxu0 %v268_v2 }
   0xb   :  { %251 = vmatpush3.bf16.msra.mxu0 %v268_v2 }
   0xc   :  { %252 = vmatprep.subr.bf16.mxu0 %v269_v3 }
   0xf   :  { %253 = vmatpush3.bf16.msra.mxu0 %v269_v3 }
  0x10   :  { %254 = vmatprep.subr.bf16.mxu0 %v270_v5 }
  0x13   :  { %255 = vmatpush3.bf16.msra.mxu0 %v270_v5 }
  0x14   :  { %256 = vmatprep.subr.bf16.mxu0 %v271_v6 }
  0x17   :  { %257 = vmatpush3.bf16.msra.mxu0 %v271_v6 }
  0x18   :  { %258 = vmatprep.subr.bf16.mxu0 %v272_v7 }
  0x1b   :  { %259 = vmatpush3.bf16.msra.mxu0 %v272_v7 }
  0x1c   :  { %260 = vmatprep.subr.bf16.mxu0 %v273_v8 }
  0x1f   :  { %261 = vmatpush3.bf16.msra.mxu0 %v273_v8 }
  0x22   :  { %263 = vmatmul.mubr.bf16.vlgmr.msra.gmra.mrb[0].mxu0 %v275_v9 }
  0xf5   :  { %v264_v10 = vpop.f32.mrb[0].mxu0 }
  0xf6   :  { %v141_v12 = vpop.f32.mrb[1].mxu0  ;;  %v180_v14 = vadd.f32 %v264_v10, %v216_v11 }
  0xf7   :  { %v265_v13 = vpop.f32.mrb[2].mxu0  ;;  %v178_v17 = vadd.f32 %v216_v11, %v141_v12 }
  0xf8   :  { %v181_v15 = vadd.f32 %v265_v13, %v216_v11  ;;  %v144_v16 = vpop.f32.mrb[3].mxu0 }
  0xf9   :  { %v179_v18 = vadd.f32 %v216_v11, %v144_v16 }
  0xfa   :  { %v233_v19 = vpack.c.bf16 %v181_v15, %v180_v14 }
  0xfb   :  { %v228_v20 = vpack.c.bf16 %v179_v18, %v178_v17 }
  0xfc   :  { %235 = vst [vmem:[%s338_s3 + $0x8] sm:$0xff] %v233_v19  }
  0xfd   :  { %229 = vst [vmem:[%s338_s3] sm:$0xff] %v228_v20  }

// kernel: _lambda_.53
= control target key start
LH: loop header
LB: loop body
LE: loop exit
PB: predicated region body
PF: predicated region fallthrough
CT: control target
= control target key end

     0   :  { %s370_s1 = inlined_call_operand.vmem [shape: bf16[128,128], index: 1, kind: input, shape index: {}]   ;;  %s371_s0 = inlined_call_operand.vmem [shape: bf16[32,128], index: 0, kind: input, shape index: {}]   ;;  %s372_s2 = inlined_call_operand.vmem [shape: f32[1,128], index: 2, kind: input, shape index: {}]   ;;  %s373_s3 = inlined_call_operand.vmem [shape: bf16[32,128], index: 3, kind: input, shape index: {}]   ;;  %s374_s4 = inlined_call_operand.vmem [shape: bf16[32,128], index: 4, kind: output, shape index: {}]  }
   0x1   :  { %v290_v0 = vld [vmem:[%s370_s1] sm:$0xff]   ;;  %v291_v1 = vld [vmem:[%s370_s1 + $0x8] sm:$0xff]   ;;  %v292_v2 = vld [vmem:[%s370_s1 + $0x10] sm:$0xff]  }
   0x2   :  { %270 = vmatprep.subr.bf16.mxu0 %v290_v0  ;;  %v293_v3 = vld [vmem:[%s370_s1 + $0x18] sm:$0xff]   ;;  %v298_v4 = vld [vmem:[%s371_s0] sm:$0xff]   ;;  %v295_v6 = vld [vmem:[%s370_s1 + $0x28] sm:$0xff]  }
   0x3   :  { %271 = vmatpush3.bf16.msra.mxu0 %v290_v0  ;;  %286 = vmatprep.mubr.bf16.mxu0 %v298_v4  ;;  %v294_v5 = vld [vmem:[%s370_s1 + $0x20] sm:$0xff]   ;;  %v296_v7 = vld [vmem:[%s370_s1 + $0x30] sm:$0xff]   ;;  %v297_v8 = vld [vmem:[%s370_s1 + $0x38] sm:$0xff]  }
   0x4   :  { %272 = vmatprep.subr.bf16.mxu0 %v291_v1  ;;  %v299_v9 = vld [vmem:[%s371_s0 + $0x8] sm:$0xff]   ;;  %v231_v10 = vld [vmem:[%s372_s2] ss:$0 sm:$0xff] }
   0x5   :  { %v258_v11 = vld [vmem:[%s373_s3 + $0x8] sm:$0xff]   ;;  %v241_v12 = vld [vmem:[%s373_s3] sm:$0xff]  }
   0x6   :  { %v246_v15 = vunpack.c.l.bf16 %v258_v11  ;;  %v247_v17 = vunpack.c.h.bf16 %v258_v11  ;;  %v242_v19 = vunpack.c.l.bf16 %v241_v12  ;;  %v243_v21 = vunpack.c.h.bf16 %v241_v12 }
   0x7   :  { %273 = vmatpush3.bf16.msra.mxu0 %v291_v1 }
   0x8   :  { %274 = vmatprep.subr.bf16.mxu0 %v292_v2 }
   0xb   :  { %275 = vmatpush3.bf16.msra.mxu0 %v292_v2 }
   0xc   :  { %276 = vmatprep.subr.bf16.mxu0 %v293_v3 }
   0xf   :  { %277 = vmatpush3.bf16.msra.mxu0 %v293_v3 }
  0x10   :  { %278 = vmatprep.subr.bf16.mxu0 %v294_v5 }
  0x13   :  { %279 = vmatpush3.bf16.msra.mxu0 %v294_v5 }
  0x14   :  { %280 = vmatprep.subr.bf16.mxu0 %v295_v6 }
  0x17   :  { %281 = vmatpush3.bf16.msra.mxu0 %v295_v6 }
  0x18   :  { %282 = vmatprep.subr.bf16.mxu0 %v296_v7 }
  0x1b   :  { %283 = vmatpush3.bf16.msra.mxu0 %v296_v7 }
  0x1c   :  { %284 = vmatprep.subr.bf16.mxu0 %v297_v8 }
  0x1f   :  { %285 = vmatpush3.bf16.msra.mxu0 %v297_v8 }
  0x22   :  { %287 = vmatmul.mubr.bf16.vlgmr.msra.gmra.mrb[0].mxu0 %v299_v9 }
  0xf5   :  { %v288_v13 = vpop.f32.mrb[0].mxu0 }
  0xf6   :  { %v183_v14 = vadd.f32 %v288_v13, %v231_v10  ;;  %v144_v16 = vpop.f32.mrb[1].mxu0 }
  0xf7   :  { %v181_v18 = vadd.f32 %v231_v10, %v144_v16  ;;  %v289_v20 = vpop.f32.mrb[2].mxu0 }
  0xf8   :  { %v184_v22 = vadd.f32 %v289_v20, %v231_v10  ;;  %v147_v23 = vpop.f32.mrb[3].mxu0  ;;  %v195_v25 = vadd.f32 %v246_v15, %v183_v14 }
  0xf9   :  { %v182_v24 = vadd.f32 %v231_v10, %v147_v23  ;;  %v193_v27 = vadd.f32 %v242_v19, %v181_v18 }
  0xfa   :  { %v196_v26 = vadd.f32 %v247_v17, %v184_v22 }
  0xfb   :  { %v194_v28 = vadd.f32 %v243_v21, %v182_v24 }
  0xfc   :  { %v256_v29 = vpack.c.bf16 %v196_v26, %v195_v25 }
  0xfd   :  { %v251_v30 = vpack.c.bf16 %v194_v28, %v193_v27 }
  0xfe   :  { %259 = vst [vmem:[%s374_s4 + $0x8] sm:$0xff] %v256_v29  }
  0xff   :  { %252 = vst [vmem:[%s374_s4] sm:$0xff] %v251_v30  }

// kernel: _lambda_.66
= control target key start
LH: loop header
LB: loop body
LE: loop exit
PB: predicated region body
PF: predicated region fallthrough
CT: control target
= control target key end

     0   :  { %vm18_vm0 = vcmask 261120   ;;  %v48_v17 = vlaneseq  ;;  %vm70_vm1 = vcmask 257024   ;;  %s128_s0 = inlined_call_operand.vmem [shape: bf16[16,32], index: 0, kind: input, shape index: {}]   ;;  %s129_s1 = inlined_call_operand.vmem [shape: bf16[1,32], index: 1, kind: input, shape index: {}]   ;;  %s130_s2 = inlined_call_operand.vmem [shape: bf16[1,32], index: 2, kind: input, shape index: {}]   ;;  %s131_s3 = inlined_call_operand.vmem [shape: bf16[16,32], index: 3, kind: output, shape index: {}]  }
   0x1   :  { %v82_v0 = vld [vmem:[%s128_s0] sm:$0xff]  }
   0x2   :  { %v83_v1 = vunpack.c.l.bf16 %v82_v0  ;;  %v84_v2 = vunpack.c.h.bf16 %v82_v0  ;;  %v49_v21 = vshrl.u32 %v48_v17, 7  ;;  %v46_v22 = vld [vmem:[%s129_s1] sm:$0x1] }
   0x3   :  { %v54_v24 = vld [vmem:[%s130_s2] sm:$0x1]  ;;  %v47_v25 = vunpack.c.l.bf16 %v46_v22 }
   0x4   :  { %v19_v3 = vsel %vm18_vm0, %v83_v1, 0.0  ;;  %v22_v4 = vsel %vm18_vm0, %v84_v2, 0.0  ;;  %v50_v26 = vsub.s32 0, %v49_v21  ;;  %v55_v27 = vunpack.c.l.bf16 %v54_v24 }
   0x5   :  { %20 = vadd.xlane.f32.xlu0 %v19_v3 }
   0x6   :  { %v51_v28 = vrot.slane %v47_v25, %v50_v26  ;;  %v59_v30 = vrot.slane %v55_v27, %v50_v26 }
   0x9   :  { %23 = vadd.xlane.f32.xlu0 %v22_v4 }
  0x92   :  { %v21_v5 = vpop.xlane.xlu0 %20 }
  0x93   :  { %v26_v6 = vmul.f32 0.03125, %v21_v5 }
  0x95   :  { %v28_v7 = vsub.f32 %v83_v1, %v26_v6 }
  0x96   :  { %v24_v8 = vpop.xlane.xlu0 %23 }
  0x97   :  { %v27_v9 = vmul.f32 0.03125, %v24_v8  ;;  %v30_v10 = vmul.f32 %v28_v7, %v28_v7 }
  0x99   :  { %v29_v11 = vsub.f32 %v84_v2, %v27_v9  ;;  %v32_v12 = vsel %vm18_vm0, %v30_v10, 0.0 }
  0x9a   :  { %33 = vadd.xlane.f32.xlu1 %v32_v12 }
  0x9b   :  { %v31_v13 = vmul.f32 %v29_v11, %v29_v11 }
  0x9d   :  { %v35_v14 = vsel %vm18_vm0, %v31_v13, 0.0 }
  0x9e   :  { %36 = vadd.xlane.f32.xlu1 %v35_v14 }
 0x127   :  { %v34_v15 = vpop.xlane.xlu1 %33 }
 0x128   :  { %v38_v16 = vmul.f32 0.03125, %v34_v15 }
 0x12a   :  { %v40_v18 = vadd.f32 1e-05, %v38_v16 }
 0x12b   :  { %v37_v19 = vpop.xlane.xlu1 %36 }
 0x12c   :  { %85 = vrsqrt.f32 %v40_v18  ;;  %v39_v20 = vmul.f32 0.03125, %v37_v19 }
 0x12e   :  { %v41_v23 = vadd.f32 1e-05, %v39_v20 }
 0x130   :  { %87 = vrsqrt.f32 %v41_v23 }
 0x136   :  { %v86_v29 = vpop.eup %85 }
 0x137   :  { %v44_v31 = vmul.f32 %v86_v29, %v28_v7 }
 0x139   :  { %v52_v32 = vmul.f32 %v51_v28, %v44_v31 }
 0x13a   :  { %v88_v33 = vpop.eup %87 }
 0x13b   :  { %v60_v34 = vadd.f32 %v59_v30, %v52_v32  ;;  %v45_v35 = vmul.f32 %v88_v33, %v29_v11 }
 0x13d   :  { %v79_v36 = vpack.c.bf16 %v60_v34, %v60_v34  ;;  %v53_v37 = vmul.f32 %v51_v28, %v45_v35 }
 0x13f   :  { %71 = vst.msk [vmem:[%s131_s3] sm:$0xf] %vm70_vm1, %v79_v36  ;;  %v61_v38 = vadd.f32 %v59_v30, %v53_v37 }
 0x141   :  { %v80_v39 = vpack.c.bf16 %v61_v38, %v61_v38 }
 0x143   :  { %72 = vst.msk [vmem:[%s131_s3 + $0x4] sm:$0xf] %vm70_vm1, %v80_v39 }

// kernel: _lambda_.52
= control target key start
LH: loop header
LB: loop body
LE: loop exit
PB: predicated region body
PF: predicated region fallthrough
CT: control target
= control target key end

     0   :  { %s1449_s9 = smov 0   ;;  %s1451_s10 = smov 0   ;;  %s1752_s0 = inlined_call_operand.vmem [shape: bf16[2,16,32], index: 0, kind: input, shape index: {}]   ;;  %s1753_s1 = inlined_call_operand.vmem [shape: bf16[2,16,64], index: 1, kind: input, shape index: {}]   ;;  %s1754_s2 = inlined_call_operand.vmem [shape: bf16[2,16,32], index: 2, kind: output, shape index: {}]  }
   0x1   :  { %s1453_s11 = smov 0  }
   0x2 LB: > { %s31_s12 = sadd.s32 1, %s1411_s10  ;;  %p1192_p0 = scmp.ge.s32.totalorder %s1415_s11, 1  ;;  %s1415_s11 = sphi %s1453_s11, %s12_s11   ;;  %s1411_s10 = sphi %s1451_s10, %s1756_s10   ;;  %s1407_s9 = sphi %s1449_s9, %s1755_s9  }
   0x3   : > { %p33_p1 = scmp.ge.s32.totalorder %s31_s12, 2  ;;  %p157_p2 = scmp.lt.s32.totalorder %s1415_s11, 3 }
   0x5   : > { %s1758_s12 = smov (%p33_p1, %s31_s12), 0  ;;  %p158_p3 = pnand %p1192_p0, %p157_p2 }
   0x6   : > { %p197_p4 = scmp.lt.s32.totalorder (!%p158_p3), %s1407_s9, 1  ;;  %v1417_v0 = vmov (!%p158_p3), 0.0   ;;  %vm1418_vm0 = vmmov (!%p158_p3), 0   ;;  %vm253_vm1 = vcmask (!%p158_p3), 64512   ;;  %vm231_vm2 = vcmask (!%p158_p3), 31744   ;;  %s1421_s20 = smov (!%p158_p3), 96  }
   0x7   : > { %161 = sbr.rel (%p158_p3) target bundleno = 1463 (0x5b7), region = 28  ;;  %1240 = vmatprep.subr.bf16.mxu0 (!%p158_p3), %v1417_v0  ;;  %1242 = vmatprep.mubr.msk.bf16.mxu0 (!%p158_p3), %vm1418_vm0, %v1417_v0  ;;  %v1419_v4 = vmov (!%p158_p3), -1e+30   ;;  %234 = vst.msk [vmem:[#allocation3] sm:$0xff] (!%p158_p3), %vm231_vm2, %v1417_v0  ;;  %235 = vst.msk [vmem:[#allocation3 + $0x8] sm:$0xff] (!%p158_p3), %vm231_vm2, %v1417_v0  ;;  %vm305_vm3 = vcmask (!%p158_p3), 130048  }
   0x8   : > { %1246 = vmatprep.subr.bf16.mxu1 (!%p158_p3), %v1417_v0  ;;  %1248 = vmatprep.mubr.msk.bf16.mxu1 (!%p158_p3), %vm1418_vm0, %v1417_v0  ;;  %232 = vst.msk [vmem:[#allocation2] sm:$0xff] (!%p158_p3), %vm231_vm2, %v1419_v4  ;;  %233 = vst.msk [vmem:[#allocation2 + $0x8] sm:$0xff] (!%p158_p3), %vm231_vm2, %v1419_v4  ;;  %v1420_v11 = vmov (!%p158_p3), 0   ;;  %vm346_vm4 = vcmask (!%p158_p3), 7168   ;;  %s1422_s21 = smov (!%p158_p3), 120   ;;  %s1423_s22 = smov (!%p158_p3), 112  }
   0x9   : > { %1329 = vset.pattern.permute.xlu1 (!%p158_p3), %v1420_v11  ;;  %s1424_s23 = smov (!%p158_p3), 104   ;;  %vm526_vm5 = vcmask (!%p158_p3), 15368   ;;  %vm715_vm6 = vcmask (!%p158_p3), 23568   ;;  %vm904_vm7 = vcmask (!%p158_p3), 31768   ;;  %s1427_s24 = smov (!%p158_p3), 88   ;;  %vm236_vm8 = vcmask (!%p158_p3), 261120  }
   0xa   : > { %s1429_s25 = smov (!%p158_p3), 80   ;;  %s1430_s26 = smov (!%p158_p3), 72   ;;  %237 = vst.msk [vmem:[#allocation4] sm:$0xff] (!%p158_p3), %vm236_vm8, %v1417_v0  ;;  %238 = vst.msk [vmem:[#allocation4 + $0x8] sm:$0xff] (!%p158_p3), %vm236_vm8, %v1417_v0  ;;  %vm603_vm9 = vcmask (!%p158_p3), 130112   ;;  %vm792_vm10 = vcmask (!%p158_p3), 195712  }
   0xb   : > { %s1431_s27 = smov (!%p158_p3), 8   ;;  %s1432_s28 = smov (!%p158_p3), 16   ;;  %vm981_vm11 = vcmask (!%p158_p3), 261312   ;;  %vm1077_vm12 = vcmask (!%p158_p3), 257024  }
   0xc   : > { %s1433_s29 = smov (!%p158_p3), 24  }
   0xe   : > { %s1760_s9 = smov (!%p197_p4, %s1407_s9), 1 }
   0xf   : > { %s1473_s13 = sshll.u32 %s1760_s9, 3  ;;  %v1499_v12 = vld [vmem:[#allocation2] sm:$0xff]  ;;  %v1504_v15 = vld [vmem:[#allocation2 + $0x8] sm:$0xff] }
  0x10   : > { %s1479_s16 = scalar_lea.vmem %s1753_s1, %s1473_s13  ;;  %s1485_s19 = scalar_lea.vmem %s1752_s0, %s1473_s13 }
  0x11   : > { %v1349_v1 = vld [vmem:[%s1479_s16] sm:$0xff]   ;;  %s224_s4 = scalar_lea.vmem %s1754_s2, %s1473_s13 }
  0x12   : > { %v258_v2 = vsel %vm253_vm1, %v1349_v1, 0  ;;  %v1350_v3 = vld [vmem:[%s1485_s19] sm:$0xff]  }
  0x13   : > { %1241 = vmatpush3.bf16.xpose.msra.mxu0 %v258_v2  ;;  %v1520_v20 = vld [vmem:[%s1479_s16] sm:$0xff]  }
  0x14   : > { %1258 = vmatprep.subr.bf16.mxu0 %v1417_v0  ;;  %v1352_v21 = vld [vmem:[%s1485_s19] sm:$0xff]  }
  0x15   : > { %v1526_v23 = vld [vmem:[%s1479_s16] sm:$0xff]  }
  0x16   : > { %v1354_v24 = vld [vmem:[%s1485_s19] sm:$0xff]  }
  0x17   : > { %v1531_v25 = vld [vmem:[%s1479_s16] sm:$0xff]  }
  0x18   : > { %v1356_v26 = vld [vmem:[%s1485_s19] sm:$0xff]  }
  0x1a   : > { %1243 = vmatmul.mubr.msk.bf16.vlgmr.msra.gmra.mrb[0].mxu0 %vm253_vm1, %v1350_v3 }
  0x1b   : > { %1260 = vmatprep.mubr.msk.bf16.mxu0 %vm1418_vm0, %v1417_v0 }
  0xed   : > { %v294_v5 = vpop.f32.mrb[0].mxu0 }
  0xee   : > { %v1244_v6 = vpop.f32.mrb[1].mxu0  ;;  %v306_v7 = vsel %vm305_vm3, %v294_v5, -inf }
  0xef   : > { %307 = vmax.xlane.f32.xlu0 %v306_v7  ;;  %v297_v8 = vpop.f32.mrb[2].mxu0 }
  0xf0   : > { %v1245_v9 = vpop.f32.mrb[3].mxu0  ;;  %v309_v10 = vsel %vm305_vm3, %v297_v8, -inf }
  0xf3   : > { %310 = vmax.xlane.f32.xlu0 %v309_v10 }
 0x109   : > { %352 = vrot.lane.b32.xlu0 %v1349_v1, %s1421_s20  ;;  %v1425_v1 = vmov 1  }
 0x10a   : > { %1331 = vset.pattern.permute.xlu0 %v1425_v1 }
 0x17c   : > { %v308_v13 = vpop.xlane.xlu0 %307 }
 0x17d   : > { %v1502_v14 = vmax.f32 %v1499_v12, %v308_v13 }
 0x17f   : > { %v314_v16 = vsub.f32 %v1499_v12, %v1502_v14  ;;  %349 = vst.msk [vmem:[#allocation2] sm:$0xff] %vm346_vm4, %v1502_v14  ;;  %322 = vperm.xlu1 %1329, %v1502_v14  }
 0x180   : > { %v311_v17 = vpop.xlane.xlu0 %310 }
 0x181   : > { %v1512_v18 = vmax.f32 %v1504_v15, %v311_v17  ;;  %v1426_v17 = vmov 2  }
 0x183   : > { %v315_v19 = vsub.f32 %v1504_v15, %v1512_v18  ;;  %350 = vst.msk [vmem:[#allocation2 + $0x8] sm:$0xff] %vm346_vm4, %v1512_v18  ;;  %327 = vperm.xlu1 %1329, %v1512_v18   ;;  %v304_v18 = vld [vmem:[#allocation3 + $0x8] sm:$0xff] }
 0x184   : > { %v353_v22 = vpop.permute.xlu0 %352 }
 0x185   : > { %1247 = vmatpush3.bf16.msra.mxu1 %v353_v22 }
 0x186   : > { %1252 = vmatprep.subr.bf16.mxu1 %v1417_v0 }
 0x187   : > { %433 = vrot.lane.b32.xlu1 %v1520_v20, %s1422_s21 }
 0x188   : > { %1330 = vset.pattern.permute.xlu1 %v1425_v1 }
 0x18b   : > { %426 = vrot.lane.b32.xlu1 %v1352_v21, %s1422_s21 }
 0x18f   : > { %622 = vrot.lane.b32.xlu1 %v1526_v23, %s1423_s22 }
 0x193   : > { %615 = vrot.lane.b32.xlu1 %v1354_v24, %s1423_s22 }
 0x197   : > { %811 = vrot.lane.b32.xlu1 %v1531_v25, %s1424_s23 }
 0x19b   : > { %804 = vrot.lane.b32.xlu1 %v1356_v26, %s1424_s23 }
 0x1fe   : > { %v323_v27 = vpop.permute.xlu1 %322 }
 0x1ff   : > { %v330_v28 = vsub.f32 %v294_v5, %v323_v27  ;;  %v482_v5 = vld [vmem:[#allocation2] sm:$0xff] }
 0x201   : > { %v332_v29 = vmul.f32 1.442695, %v330_v28 }
 0x202   : > { %v328_v30 = vpop.permute.xlu1 %327 }
 0x203   : > { %v331_v31 = vsub.f32 %v297_v8, %v328_v30  ;;  %1357 = vpow2.f32 %v332_v29  ;;  %v1586_v8 = vld [vmem:[#allocation2 + $0x8] sm:$0xff] }
 0x205   : > { %v334_v32 = vmul.f32 1.442695, %v331_v31 }
 0x206   : > { %v434_v33 = vpop.permute.xlu1 %433 }
 0x207   : > { %1359 = vpow2.f32 %v334_v32  ;;  %v439_v37 = vsel %vm253_vm1, %v434_v33, 0 }
 0x20a   : > { %v427_v34 = vpop.permute.xlu1 %426 }
 0x20d   : > { %v1535_v35 = vpop.eup %1357 }
 0x20e   : > { %v623_v39 = vpop.permute.xlu1 %622 }
 0x20f   : > { %v628_v41 = vsel %vm253_vm1, %v623_v39, 0 }
 0x211   : > { %v1537_v36 = vpop.eup %1359 }
 0x212   : > { %v351_v38 = vpack.c.bf16 %v1537_v36, %v1535_v35  ;;  %v616_v40 = vpop.permute.xlu1 %615  ;;  %v341_v12 = vsel %vm305_vm3, %v1537_v36, 0.0 }
 0x214   : > { %1249 = vmatmul.mubr.msk.bf16.vlgmr.msra.gmra.mrb[0].mxu1 %vm305_vm3, %v351_v38  ;;  %v1428_v38 = vmov 3  }
 0x215   : > { %1253 = vmatpush3.bf16.xpose.msra.mxu1 %v439_v37  ;;  %1254 = vmatprep.mubr.msk.bf16.mxu1 %vm1418_vm0, %v1417_v0 }
 0x216   : > { %1264 = vmatprep.subr.bf16.mxu1 %v1417_v0  ;;  %v812_v42 = vpop.permute.xlu1 %811 }
 0x217   : > { %v817_v43 = vsel %vm253_vm1, %v812_v42, 0  ;;  %v316_v42 = vmul.f32 1.442695, %v314_v16 }
 0x219   : > { %1361 = vpow2.f32 %v316_v42 }
 0x21a   : > { %v805_v44 = vpop.permute.xlu1 %804 }
 0x21c   : > { %1255 = vmatmul.mubr.msk.bf16.vlgmr.msra.gmra.mrb[4].mxu1 %vm253_vm1, %v427_v34 }
 0x21d   : > { %1265 = vmatpush3.bf16.xpose.msra.mxu1 %v628_v41  ;;  %1266 = vmatprep.mubr.msk.bf16.mxu1 %vm1418_vm0, %v1417_v0 }
 0x21e   : > { %1276 = vmatprep.subr.bf16.mxu1 %v1417_v0 }
 0x224   : > { %1267 = vmatmul.mubr.msk.bf16.vlgmr.msra.gmra.mrb[8].mxu1 %vm253_vm1, %v616_v40 }
 0x225   : > { %1277 = vmatpush3.bf16.xpose.msra.mxu1 %v817_v43  ;;  %1278 = vmatprep.mubr.msk.bf16.mxu1 %vm1418_vm0, %v1417_v0 }
 0x22c   : > { %1279 = vmatmul.mubr.msk.bf16.vlgmr.msra.gmra.mrb[12].mxu1 %vm253_vm1, %v805_v44 }
 0x2e7   : > { %v1556_v45 = vpop.f32.mrb[0].mxu1 }
 0x2e8   : > { %v1250_v46 = vpop.f32.mrb[1].mxu1 }
 0x2e9   : > { %v1558_v47 = vpop.f32.mrb[2].mxu1 }
 0x2ea   : > { %v1251_v48 = vpop.f32.mrb[3].mxu1 }
 0x2ef   : > { %v1560_v49 = vpop.f32.mrb[4].mxu1 }
 0x2f0   : > { %v1256_v50 = vpop.f32.mrb[5].mxu1  ;;  %v486_v51 = vsel %vm305_vm3, %v1560_v49, -inf }
 0x2f1   : > { %487 = vmax.xlane.f32.xlu0 %v486_v51  ;;  %v1564_v52 = vpop.f32.mrb[6].mxu1 }
 0x2f2   : > { %v1257_v53 = vpop.f32.mrb[7].mxu1  ;;  %v489_v54 = vsel %vm305_vm3, %v1564_v52, -inf }
 0x2f3   : > { %490 = vmax.xlane.f32.xlu1 %v489_v54 }
 0x2f7   : > { %v1568_v55 = vpop.f32.mrb[8].mxu1 }
 0x2f8   : > { %v1268_v56 = vpop.f32.mrb[9].mxu1  ;;  %v675_v57 = vsel %vm305_vm3, %v1568_v55, -inf }
 0x2f9   : > { %676 = vmax.xlane.f32.xlu0 %v675_v57  ;;  %v1572_v58 = vpop.f32.mrb[10].mxu1 }
 0x2fa   : > { %v1269_v59 = vpop.f32.mrb[11].mxu1  ;;  %v678_v60 = vsel %vm305_vm3, %v1572_v58, -inf }
 0x2fd   : > { %679 = vmax.xlane.f32.xlu0 %v678_v60 }
 0x2ff   : > { %v1576_v61 = vpop.f32.mrb[12].mxu1 }
 0x300   : > { %v1280_v62 = vpop.f32.mrb[13].mxu1  ;;  %v864_v63 = vsel %vm305_vm3, %v1576_v61, -inf }
 0x301   : > { %v1582_v2 = vpop.f32.mrb[14].mxu1  ;;  %865 = vmax.xlane.f32.xlu1 %v864_v63 }
 0x302   : > { %v1281_v3 = vpop.f32.mrb[15].mxu1  ;;  %v867_v4 = vsel %vm305_vm3, %v1582_v2, -inf }
 0x303   : > { %868 = vmax.xlane.f32.xlu0 %v867_v4 }
 0x37e   : > { %v488_v6 = vpop.xlane.xlu0 %487 }
 0x37f   : > { %v492_v7 = vmax.f32 %v482_v5, %v488_v6 }
 0x380   : > { %v491_v9 = vpop.xlane.xlu1 %490 }
 0x381   : > { %529 = vst.msk [vmem:[#allocation2] sm:$0xff] %vm526_vm5, %v492_v7  ;;  %v1590_v10 = vmax.f32 %v1586_v8, %v491_v9  ;;  %502 = vperm.xlu1 %1330, %v492_v7   ;;  %v494_v43 = vsub.f32 %v482_v5, %v492_v7 }
 0x383   : > { %v495_v13 = vsub.f32 %v1586_v8, %v1590_v10  ;;  %530 = vst.msk [vmem:[#allocation2 + $0x8] sm:$0xff] %vm526_vm5, %v1590_v10  ;;  %507 = vperm.xlu0 %1331, %v1590_v10   ;;  %v496_v44 = vmul.f32 1.442695, %v494_v43 }
 0x385   : > { %1332 = vset.pattern.permute.xlu1 %v1426_v17  ;;  %1363 = vpow2.f32 %v496_v44 }
 0x386   : > { %v677_v21 = vpop.xlane.xlu0 %676 }
 0x387   : > { %1334 = vset.pattern.permute.xlu0 %v1420_v11 }
 0x388   : > { %v1599_v22 = vld [vmem:[#allocation2] sm:$0xff] }
 0x389   : > { %v1602_v24 = vmax.f32 %v1599_v22, %v677_v21 }
 0x38a   : > { %v1604_v26 = vld [vmem:[#allocation2 + $0x8] sm:$0xff]  ;;  %v680_v27 = vpop.xlane.xlu0 %679 }
 0x38b   : > { %v683_v28 = vsub.f32 %v1599_v22, %v1602_v24  ;;  %718 = vst.msk [vmem:[#allocation2] sm:$0xff] %vm715_vm6, %v1602_v24  ;;  %v1611_v29 = vmax.f32 %v1604_v26, %v680_v27  ;;  %691 = vperm.xlu1 %1332, %v1602_v24  }
 0x38d   : > { %v684_v30 = vsub.f32 %v1604_v26, %v1611_v29  ;;  %719 = vst.msk [vmem:[#allocation2 + $0x8] sm:$0xff] %vm715_vm6, %v1611_v29 }
 0x38e   : > { %v866_v31 = vpop.xlane.xlu1 %865 }
 0x38f   : > { %696 = vperm.xlu1 %1332, %v1611_v29  }
 0x390   : > { %v869_v33 = vpop.xlane.xlu0 %868 }
 0x392   : > { %v1619_v32 = vld [vmem:[#allocation2] sm:$0xff] }
 0x393   : > { %v1622_v34 = vmax.f32 %v1619_v32, %v866_v31  ;;  %532 = vrot.lane.b32.xlu1 %v1520_v20, %s1427_s24  ;;  %v338_v20 = vsel %vm305_vm3, %v1535_v35, 0.0 }
 0x394   : > { %v1625_v37 = vld [vmem:[#allocation2 + $0x8] sm:$0xff]  ;;  %1333 = vset.pattern.permute.xlu1 %v1428_v38 }
 0x395   : > { %v872_v39 = vsub.f32 %v1619_v32, %v1622_v34  ;;  %907 = vst.msk [vmem:[#allocation2] sm:$0xff] %vm904_vm7, %v1622_v34  ;;  %v1633_v40 = vmax.f32 %v1625_v37, %v869_v33 }
 0x397   : > { %v873_v41 = vsub.f32 %v1625_v37, %v1633_v40  ;;  %908 = vst.msk [vmem:[#allocation2 + $0x8] sm:$0xff] %vm904_vm7, %v1633_v40  ;;  %880 = vperm.xlu1 %1333, %v1622_v34   ;;  %v874_v22 = vmul.f32 1.442695, %v872_v39 }
 0x399   : > { %v876_v29 = vmul.f32 1.442695, %v873_v41  ;;  %v400_v41 = vld [vmem:[#allocation4 + $0x8] sm:$0xff] }
 0x39b   : > { %885 = vperm.xlu1 %1333, %v1633_v40  }
 0x39f   : > { %721 = vrot.lane.b32.xlu1 %v1526_v23, %s1429_s25  ;;  %v1651_v23 = vpop.eup %1361 }
 0x3a0   : > { %1335 = vset.pattern.permute.xlu1 %v1420_v11  ;;  %v1654_v35 = vpop.eup %1363 }
 0x3a2   : > { %339 = vadd.xlane.f32.xlu0 %v338_v20 }
 0x3a3   : > { %910 = vrot.lane.b32.xlu1 %v1531_v25, %s1430_s26 }
 0x3b8   : > { %403 = vperm.xlu0 %1334, %v1651_v23  }
 0x3bc   : > { %1336 = vset.pattern.permute.xlu0 %v1425_v1 }
 0x3bd   : > { %583 = vperm.xlu0 %1336, %v1654_v35  }
 0x3c1   : > { %1339 = vset.pattern.permute.xlu0 %v1426_v17 }
 0x3c7   : > { %342 = vadd.xlane.f32.xlu1 %v341_v12  ;;  %v303_v12 = vld [vmem:[#allocation3] sm:$0xff] }
 0x400   : > { %v503_v14 = vpop.permute.xlu1 %502 }
 0x401   : > { %v510_v16 = vsub.f32 %v1560_v49, %v503_v14  ;;  %v318_v14 = vmul.f32 1.442695, %v315_v19 }
 0x402   : > { %v508_v25 = vpop.permute.xlu0 %507 }
 0x403   : > { %v512_v46 = vmul.f32 1.442695, %v510_v16  ;;  %v511_v48 = vsub.f32 %v1564_v52, %v508_v25  ;;  %v336_v16 = vmul.f32 %v1651_v23, %v303_v12 }
 0x405   : > { %1365 = vpow2.f32 %v512_v46  ;;  %v514_v50 = vmul.f32 1.442695, %v511_v48  ;;  %v498_v46 = vmul.f32 1.442695, %v495_v13  ;;  %v399_v48 = vld [vmem:[#allocation4] sm:$0xff] }
 0x407   : > { %1367 = vpow2.f32 %v514_v50 }
 0x40a   : > { %v692_v51 = vpop.permute.xlu1 %691 }
 0x40b   : > { %v699_v53 = vsub.f32 %v1568_v55, %v692_v51 }
 0x40d   : > { %v701_v54 = vmul.f32 1.442695, %v699_v53 }
 0x40e   : > { %v697_v56 = vpop.permute.xlu1 %696 }
 0x40f   : > { %v1366_v57 = vpop.eup %1365  ;;  %1369 = vpow2.f32 %v701_v54  ;;  %v700_v36 = vsub.f32 %v1572_v58, %v697_v56  ;;  %v687_v56 = vmul.f32 1.442695, %v684_v30 }
 0x410   : > { %v518_v59 = vsel %vm305_vm3, %v1366_v57, 0.0 }
 0x411   : > { %v1368_v60 = vpop.eup %1367  ;;  %v703_v49 = vmul.f32 1.442695, %v700_v36  ;;  %519 = vadd.xlane.f32.xlu1 %v518_v59 }
 0x412   : > { %v533_v62 = vpop.permute.xlu1 %532  ;;  %v531_v63 = vpack.c.bf16 %v1368_v60, %v1366_v57  ;;  %v521_v52 = vsel %vm305_vm3, %v1368_v60, 0.0 }
 0x413   : > { %1371 = vpow2.f32 %v703_v49  ;;  %1259 = vmatpush3.bf16.msra.mxu0 %v533_v62 }
 0x414   : > { %1270 = vmatprep.subr.bf16.mxu0 %v1417_v0 }
 0x415   : > { %522 = vadd.xlane.f32.xlu1 %v521_v52 }
 0x416   : > { %v881_v55 = vpop.permute.xlu1 %880  ;;  %1261 = vmatmul.mubr.msk.bf16.vlgmr.msra.gmra.mrb[4].mxu0 %vm305_vm3, %v531_v63 }
 0x417   : > { %v888_v3 = vsub.f32 %v1576_v61, %v881_v55  ;;  %1272 = vmatprep.mubr.msk.bf16.mxu0 %vm1418_vm0, %v1417_v0 }
 0x419   : > { %v1370_v58 = vpop.eup %1369  ;;  %v890_v4 = vmul.f32 1.442695, %v888_v3 }
 0x41a   : > { %v886_v5 = vpop.permute.xlu1 %885  ;;  %v707_v6 = vsel %vm305_vm3, %v1370_v58, 0.0 }
 0x41b   : > { %1373 = vpow2.f32 %v890_v4  ;;  %v889_v7 = vsub.f32 %v1582_v2, %v886_v5  ;;  %708 = vadd.xlane.f32.xlu1 %v707_v6 }
 0x41d   : > { %v1372_v9 = vpop.eup %1371  ;;  %v892_v21 = vmul.f32 1.442695, %v889_v7 }
 0x41e   : > { %v722_v27 = vpop.permute.xlu1 %721  ;;  %v710_v31 = vsel %vm305_vm3, %v1372_v9, 0.0  ;;  %v720_v33 = vpack.c.bf16 %v1372_v9, %v1370_v58 }
 0x41f   : > { %1375 = vpow2.f32 %v892_v21  ;;  %1271 = vmatpush3.bf16.msra.mxu0 %v722_v27  ;;  %711 = vadd.xlane.f32.xlu1 %v710_v31 }
 0x420   : > { %1282 = vmatprep.subr.bf16.mxu0 %v1417_v0  ;;  %1377 = vpow2.f32 %v318_v14 }
 0x421   : > { %1379 = vpow2.f32 %v498_v46 }
 0x422   : > { %1273 = vmatmul.mubr.msk.bf16.vlgmr.msra.gmra.mrb[8].mxu0 %vm305_vm3, %v720_v33  ;;  %v911_v61 = vpop.permute.xlu1 %910 }
 0x423   : > { %1283 = vmatpush3.bf16.msra.mxu0 %v911_v61  ;;  %1284 = vmatprep.mubr.msk.bf16.mxu0 %vm1418_vm0, %v1417_v0 }
 0x425   : > { %v1374_v2 = vpop.eup %1373 }
 0x426   : > { %v896_v20 = vsel %vm305_vm3, %v1374_v2, 0.0 }
 0x427   : > { %897 = vadd.xlane.f32.xlu1 %v896_v20 }
 0x429   : > { %v1376_v42 = vpop.eup %1375 }
 0x42a   : > { %v899_v43 = vsel %vm305_vm3, %v1376_v42, 0.0  ;;  %v909_v44 = vpack.c.bf16 %v1376_v42, %v1374_v2  ;;  %v1378_v54 = vpop.eup %1377 }
 0x42b   : > { %900 = vadd.xlane.f32.xlu1 %v899_v43  ;;  %v1380_v15 = vpop.eup %1379  ;;  %v337_v19 = vmul.f32 %v1378_v54, %v304_v18 }
 0x42c   : > { %1285 = vmatmul.mubr.msk.bf16.vlgmr.msra.gmra.mrb[12].mxu0 %vm305_vm3, %v909_v44 }
 0x42f   : > { %v340_v25 = vpop.xlane.xlu0 %339 }
 0x430   : > { %v344_v0 = vadd.f32 %v340_v25, %v336_v16 }
 0x432   : > { %347 = vst.msk [vmem:[#allocation3] sm:$0xff] %vm346_vm4, %v344_v0 }
 0x437   : > { %v404_v50 = vpop.permute.xlu0 %403 }
 0x438   : > { %v411_v51 = vmul.f32 %v404_v50, %v399_v48 }
 0x439   : > { %v484_v13 = vld [vmem:[#allocation3] sm:$0xff] }
 0x43a   : > { %v413_v53 = vadd.f32 %v411_v51, %v1556_v45  ;;  %v685_v45 = vmul.f32 1.442695, %v683_v28  ;;  %v516_v23 = vmul.f32 %v1654_v35, %v484_v13 }
 0x43c   : > { %415 = vst.msk [vmem:[#allocation4] sm:$0xff] %vm253_vm1, %v413_v53  ;;  %408 = vperm.xlu1 %1335, %v1378_v54   ;;  %1381 = vpow2.f32 %v685_v45  ;;  %v584_v53 = vpop.permute.xlu0 %583 }
 0x43d   : > { %1383 = vpow2.f32 %v687_v56 }
 0x43e   : > { %1385 = vpow2.f32 %v874_v22 }
 0x43f   : > { %1387 = vpow2.f32 %v876_v29 }
 0x440   : > { %1337 = vset.pattern.permute.xlu1 %v1425_v1 }
 0x441   : > { %588 = vperm.xlu1 %1337, %v1380_v15  }
 0x445   : > { %1338 = vset.pattern.permute.xlu1 %v1426_v17 }
 0x446   : > { %v1382_v24 = vpop.eup %1381 }
 0x447   : > { %v1384_v63 = vpop.eup %1383 }
 0x448   : > { %v1386_v32 = vpop.eup %1385 }
 0x449   : > { %v1388_v6 = vpop.eup %1387 }
 0x454   : > { %v343_v8 = vpop.xlane.xlu1 %342 }
 0x455   : > { %v345_v10 = vadd.f32 %v343_v8, %v337_v19 }
 0x457   : > { %348 = vst.msk [vmem:[#allocation3 + $0x8] sm:$0xff] %vm346_vm4, %v345_v10 }
 0x45e   : > { %v485_v36 = vld [vmem:[#allocation3 + $0x8] sm:$0xff] }
 0x45f   : > { %v517_v60 = vmul.f32 %v1380_v15, %v485_v36 }
 0x49e   : > { %v520_v57 = vpop.xlane.xlu1 %519 }
 0x49f   : > { %v524_v59 = vadd.f32 %v520_v57, %v516_v23 }
 0x4a1   : > { %527 = vst.msk [vmem:[#allocation3] sm:$0xff] %vm526_vm5, %v524_v59 }
 0x4a2   : > { %v523_v49 = vpop.xlane.xlu1 %522 }
 0x4a3   : > { %v525_v62 = vadd.f32 %v523_v49, %v517_v60 }
 0x4a5   : > { %528 = vst.msk [vmem:[#allocation3 + $0x8] sm:$0xff] %vm526_vm5, %v525_v62 }
 0x4a8   : > { %v709_v28 = vpop.xlane.xlu1 %708  ;;  %v673_v35 = vld [vmem:[#allocation3] sm:$0xff] }
 0x4a9   : > { %v705_v26 = vmul.f32 %v1382_v24, %v673_v35 }
 0x4ab   : > { %v713_v30 = vadd.f32 %v709_v28, %v705_v26 }
 0x4ac   : > { %v674_v52 = vld [vmem:[#allocation3 + $0x8] sm:$0xff]  ;;  %v712_v3 = vpop.xlane.xlu1 %711 }
 0x4ad   : > { %716 = vst.msk [vmem:[#allocation3] sm:$0xff] %vm715_vm6, %v713_v30  ;;  %v706_v55 = vmul.f32 %v1384_v63, %v674_v52 }
 0x4af   : > { %v714_v58 = vadd.f32 %v712_v3, %v706_v55 }
 0x4b1   : > { %717 = vst.msk [vmem:[#allocation3 + $0x8] sm:$0xff] %vm715_vm6, %v714_v58 }
 0x4b4   : > { %v898_v34 = vpop.xlane.xlu1 %897  ;;  %v862_v39 = vld [vmem:[#allocation3] sm:$0xff] }
 0x4b5   : > { %v894_v4 = vmul.f32 %v1386_v32, %v862_v39 }
 0x4b7   : > { %v902_v5 = vadd.f32 %v898_v34, %v894_v4 }
 0x4b8   : > { %v863_v7 = vld [vmem:[#allocation3 + $0x8] sm:$0xff]  ;;  %v901_v37 = vpop.xlane.xlu1 %900 }
 0x4b9   : > { %905 = vst.msk [vmem:[#allocation3] sm:$0xff] %vm904_vm7, %v902_v5  ;;  %v895_v40 = vmul.f32 %v1388_v6, %v863_v7 }
 0x4bb   : > { %v903_v9 = vadd.f32 %v901_v37, %v895_v40 }
 0x4bc   : > { %v409_v21 = vpop.permute.xlu1 %408 }
 0x4bd   : > { %906 = vst.msk [vmem:[#allocation3 + $0x8] sm:$0xff] %vm904_vm7, %v903_v9  ;;  %v412_v27 = vmul.f32 %v409_v21, %v400_v41 }
 0x4bf   : > { %v414_v31 = vadd.f32 %v412_v27, %v1558_v47 }
 0x4c0   : > { %v987_v44 = vld [vmem:[#allocation3] sm:$0xff]  ;;  %v589_v51 = vpop.permute.xlu1 %588 }
 0x4c1   : > { %416 = vst.msk [vmem:[#allocation4 + $0x8] sm:$0xff] %vm253_vm1, %v414_v31  ;;  %1389 = vrcp.f32 %v987_v44 }
 0x4c4   : > { %v988_v14 = vld [vmem:[#allocation3 + $0x8] sm:$0xff] }
 0x4c5   : > { %1391 = vrcp.f32 %v988_v14 }
 0x4c8   : > { %v580_v54 = vld [vmem:[#allocation4 + $0x8] sm:$0xff] }
 0x4c9   : > { %v592_v18 = vmul.f32 %v589_v51, %v580_v54 }
 0x4cb   : > { %v1390_v48 = vpop.eup %1389 }
 0x4cf   : > { %v1392_v50 = vpop.eup %1391 }
 0x4e9   : > { %v572_v33 = vpop.f32.mrb[4].mxu0 }
 0x4ea   : > { %595 = vrot.lane.b32.xlu1 %v572_v33, %s1431_s27  ;;  %v1262_v61 = vpop.f32.mrb[5].mxu0 }
 0x4eb   : > { %v575_v2 = vpop.f32.mrb[6].mxu0 }
 0x4ec   : > { %597 = vrot.lane.b32.xlu0 %v575_v2, %s1431_s27  ;;  %v1263_v20 = vpop.f32.mrb[7].mxu0 }
 0x4ee   : > { %772 = vperm.xlu1 %1338, %v1382_v24  }
 0x4f0   : > { %777 = vperm.xlu0 %1339, %v1384_v63  }
 0x4f2   : > { %1341 = vset.pattern.permute.xlu1 %v1428_v38 }
 0x4f4   : > { %1340 = vset.pattern.permute.xlu0 %v1428_v38 }
 0x4f5   : > { %961 = vperm.xlu0 %1340, %v1386_v32   ;;  %v761_v42 = vpop.f32.mrb[8].mxu0 }
 0x4f6   : > { %784 = vrot.lane.b32.xlu1 %v761_v42, %s1432_s28  ;;  %v1274_v47 = vpop.f32.mrb[9].mxu0 }
 0x4f7   : > { %v764_v43 = vpop.f32.mrb[10].mxu0 }
 0x4f8   : > { %v1275_v12 = vpop.f32.mrb[11].mxu0 }
 0x4f9   : > { %1343 = vset.pattern.permute.xlu0 %v1420_v11 }
 0x4fa   : > { %786 = vrot.lane.b32.xlu1 %v764_v43, %s1432_s28 }
 0x4fe   : > { %966 = vperm.xlu1 %1341, %v1388_v6  }
 0x4ff   : > { %v950_v16 = vpop.f32.mrb[12].mxu0 }
 0x500   : > { %v1286_v25 = vpop.f32.mrb[13].mxu0 }
 0x501   : > { %v953_v0 = vpop.f32.mrb[14].mxu0 }
 0x502   : > { %973 = vrot.lane.b32.xlu1 %v950_v16, %s1433_s29  ;;  %975 = vrot.lane.b32.xlu0 %v953_v0, %s1433_s29  ;;  %v1287_v46 = vpop.f32.mrb[15].mxu0 }
 0x503   : > { %1342 = vset.pattern.permute.xlu1 %v1420_v11  ;;  %v579_v11 = vld [vmem:[#allocation4] sm:$0xff] }
 0x504   : > { %v591_v15 = vmul.f32 %v584_v53, %v579_v11 }
 0x506   : > { %995 = vperm.xlu1 %1342, %v1390_v48   ;;  %1000 = vperm.xlu0 %1343, %v1392_v50  }
 0x50a   : > { %1344 = vset.pattern.permute.xlu1 %v1425_v1  ;;  %1345 = vset.pattern.permute.xlu0 %v1426_v17 }
 0x50b   : > { %1015 = vperm.xlu1 %1344, %v1390_v48   ;;  %1035 = vperm.xlu0 %1345, %v1390_v48  }
 0x50f   : > { %1020 = vperm.xlu1 %1344, %v1392_v50   ;;  %1348 = vset.pattern.permute.xlu0 %v1428_v38 }
 0x510   : > { %1060 = vperm.xlu0 %1348, %v1392_v50  }
 0x513   : > { %1346 = vset.pattern.permute.xlu1 %v1426_v17 }
 0x514   : > { %1040 = vperm.xlu1 %1346, %v1392_v50  }
 0x518   : > { %1347 = vset.pattern.permute.xlu1 %v1428_v38 }
 0x519   : > { %1055 = vperm.xlu1 %1347, %v1390_v48  }
 0x55c   : > { %v596_v1 = vpop.permute.xlu1 %595 }
 0x55d   : > { %v601_v19 = vadd.f32 %v596_v1, %v591_v15 }
 0x55e   : > { %v598_v8 = vpop.permute.xlu0 %597 }
 0x55f   : > { %604 = vst.msk [vmem:[#allocation4] sm:$0xff] %vm603_vm9, %v601_v19  ;;  %v602_v10 = vadd.f32 %v598_v8, %v592_v18 }
 0x561   : > { %605 = vst.msk [vmem:[#allocation4 + $0x8] sm:$0xff] %vm603_vm9, %v602_v10 }
 0x566   : > { %v768_v45 = vld [vmem:[#allocation4] sm:$0xff] }
 0x568   : > { %v769_v57 = vld [vmem:[#allocation4 + $0x8] sm:$0xff] }
 0x56d   : > { %v773_v17 = vpop.permute.xlu1 %772 }
 0x56e   : > { %v780_v13 = vmul.f32 %v773_v17, %v768_v45 }
 0x56f   : > { %v778_v38 = vpop.permute.xlu0 %777 }
 0x570   : > { %v781_v36 = vmul.f32 %v778_v38, %v769_v57 }
 0x571   : > { %v785_v23 = vpop.permute.xlu1 %784 }
 0x572   : > { %v790_v56 = vadd.f32 %v785_v23, %v780_v13 }
 0x574   : > { %793 = vst.msk [vmem:[#allocation4] sm:$0xff] %vm792_vm10, %v790_v56  ;;  %v962_v49 = vpop.permute.xlu0 %961 }
 0x575   : > { %v787_v59 = vpop.permute.xlu1 %786 }
 0x576   : > { %v791_v60 = vadd.f32 %v787_v59, %v781_v36 }
 0x578   : > { %794 = vst.msk [vmem:[#allocation4 + $0x8] sm:$0xff] %vm792_vm10, %v791_v60  ;;  %v976_v26 = vpop.permute.xlu0 %975 }
 0x57b   : > { %v957_v62 = vld [vmem:[#allocation4] sm:$0xff] }
 0x57c   : > { %v969_v28 = vmul.f32 %v962_v49, %v957_v62 }
 0x57d   : > { %v967_v22 = vpop.permute.xlu1 %966 }
 0x57f   : > { %v958_v24 = vld [vmem:[#allocation4 + $0x8] sm:$0xff] }
 0x580   : > { %v970_v35 = vmul.f32 %v967_v22, %v958_v24 }
 0x581   : > { %v974_v29 = vpop.permute.xlu1 %973 }
 0x582   : > { %v980_v30 = vadd.f32 %v976_v26, %v970_v35  ;;  %v979_v63 = vadd.f32 %v974_v29, %v969_v28 }
 0x584   : > { %983 = vst.msk [vmem:[#allocation4 + $0x8] sm:$0xff] %vm981_vm11, %v980_v30  ;;  %982 = vst.msk [vmem:[#allocation4] sm:$0xff] %vm981_vm11, %v979_v63 }
 0x585   : > { %v996_v52 = vpop.permute.xlu1 %995  ;;  %v1001_v58 = vpop.permute.xlu0 %1000 }
 0x58a   : > { %v1016_v39 = vpop.permute.xlu1 %1015  ;;  %v1036_v41 = vpop.permute.xlu0 %1035 }
 0x58b   : > { %v991_v55 = vld [vmem:[#allocation4] sm:$0xff]  ;;  %v992_v3 = vld [vmem:[#allocation4 + $0x8] sm:$0xff] }
 0x58c   : > { %v1003_v32 = vmul.f32 %v996_v52, %v991_v55  ;;  %v1004_v34 = vmul.f32 %v1001_v58, %v992_v3 }
 0x58e   : > { %1005 = vst.msk [vmem:[#allocation4] sm:$0xff] %vm253_vm1, %v1003_v32  ;;  %1006 = vst.msk [vmem:[#allocation4 + $0x8] sm:$0xff] %vm253_vm1, %v1004_v34  ;;  %v1021_v5 = vpop.permute.xlu1 %1020 }
 0x58f   : > { %v1061_v33 = vpop.permute.xlu0 %1060 }
 0x593   : > { %v1041_v9 = vpop.permute.xlu1 %1040 }
 0x595   : > { %v1011_v4 = vld [vmem:[#allocation4] sm:$0xff]  ;;  %v1012_v6 = vld [vmem:[#allocation4 + $0x8] sm:$0xff] }
 0x596   : > { %v1023_v7 = vmul.f32 %v1016_v39, %v1011_v4  ;;  %v1024_v37 = vmul.f32 %v1021_v5, %v1012_v6 }
 0x598   : > { %1025 = vst.msk [vmem:[#allocation4] sm:$0xff] %vm603_vm9, %v1023_v7  ;;  %1026 = vst.msk [vmem:[#allocation4 + $0x8] sm:$0xff] %vm603_vm9, %v1024_v37  ;;  %v1056_v2 = vpop.permute.xlu1 %1055 }
 0x59f   : > { %v1031_v40 = vld [vmem:[#allocation4] sm:$0xff]  ;;  %v1032_v21 = vld [vmem:[#allocation4 + $0x8] sm:$0xff] }
 0x5a0   : > { %v1043_v27 = vmul.f32 %v1036_v41, %v1031_v40  ;;  %v1044_v31 = vmul.f32 %v1041_v9, %v1032_v21 }
 0x5a2   : > { %1045 = vst.msk [vmem:[#allocation4] sm:$0xff] %vm792_vm10, %v1043_v27  ;;  %1046 = vst.msk [vmem:[#allocation4 + $0x8] sm:$0xff] %vm792_vm10, %v1044_v31 }
 0x5a9   : > { %v1052_v61 = vld [vmem:[#allocation4 + $0x8] sm:$0xff]  ;;  %v1051_v20 = vld [vmem:[#allocation4] sm:$0xff] }
 0x5aa   : > { %v1064_v42 = vmul.f32 %v1061_v33, %v1052_v61  ;;  %v1063_v47 = vmul.f32 %v1056_v2, %v1051_v20 }
 0x5ac   : > { %1066 = vst.msk [vmem:[#allocation4 + $0x8] sm:$0xff] %vm981_vm11, %v1064_v42  ;;  %1065 = vst.msk [vmem:[#allocation4] sm:$0xff] %vm981_vm11, %v1063_v47 }
 0x5b3   : > { %v1068_v43 = vld [vmem:[#allocation4 + $0x8] sm:$0xff]  ;;  %v1067_v44 = vld [vmem:[#allocation4] sm:$0xff] }
 0x5b4   : > { %v1223_v12 = vpack.c.bf16 %v1068_v43, %v1068_v43  ;;  %v1222_v14 = vpack.c.bf16 %v1067_v44, %v1067_v44 }
 0x5b6   : > { %1078 = vst.msk [vmem:[%s224_s4] sm:$0xf] %vm1077_vm12, %v1222_v14  ;;  %1079 = vst.msk [vmem:[%s224_s4 + $0x4] sm:$0xf] %vm1077_vm12, %v1223_v12 }
 0x5b7 PF: > { %s12_s11 = sadd.s32 1, %s1415_s11   ;;  %s1755_s9 = smov %s1411_s10 }
 0x5b8   : > { %p9_p5 = scmp.ge.s32.totalorder %s12_s11, 4   ;;  %s1756_s10 = smov %s1758_s12 }
 0x5ba   :  { %11 = sbr.rel (!%p9_p5) target bundleno = 2 (0x2), region = 69 }

// kernel: _lambda_.68
= control target key start
LH: loop header
LB: loop body
LE: loop exit
PB: predicated region body
PF: predicated region fallthrough
CT: control target
= control target key end

     0   :  { %v227_v0 = vmov 0.0   ;;  %vm228_vm0 = vmmov 0   ;;  %s282_s1 = inlined_call_operand.vmem [shape: bf16[128,128], index: 1, kind: input, shape index: {}]   ;;  %s283_s0 = inlined_call_operand.vmem [shape: bf16[16,128], index: 0, kind: input, shape index: {}]   ;;  %s284_s2 = inlined_call_operand.vmem [shape: f32[1,128], index: 2, kind: input, shape index: {}]   ;;  %s285_s3 = inlined_call_operand.vmem [shape: bf16[16,128], index: 3, kind: output, shape index: {}]  }
   0x1   :  { %196 = vmatprep.subr.bf16.mxu0 %v227_v0  ;;  %v218_v1 = vld [vmem:[%s282_s1] sm:$0xff]   ;;  %212 = vmatprep.mubr.msk.bf16.mxu0 %vm228_vm0, %v227_v0  ;;  %v219_v2 = vld [vmem:[%s282_s1 + $0x8] sm:$0xff]   ;;  %v220_v3 = vld [vmem:[%s282_s1 + $0x10] sm:$0xff]  }
   0x2   :  { %197 = vmatpush3.bf16.msra.mxu0 %v218_v1  ;;  %v221_v4 = vld [vmem:[%s282_s1 + $0x18] sm:$0xff]   ;;  %v222_v5 = vld [vmem:[%s282_s1 + $0x20] sm:$0xff]   ;;  %v223_v6 = vld [vmem:[%s282_s1 + $0x28] sm:$0xff]  }
   0x3   :  { %198 = vmatprep.subr.bf16.mxu0 %v227_v0  ;;  %v224_v7 = vld [vmem:[%s282_s1 + $0x30] sm:$0xff]   ;;  %v225_v8 = vld [vmem:[%s282_s1 + $0x38] sm:$0xff]   ;;  %v226_v9 = vld [vmem:[%s283_s0] sm:$0xff]  }
   0x4   :  { %v177_v11 = vld [vmem:[%s284_s2] ss:$0 sm:$0xff] }
   0x6   :  { %199 = vmatpush3.bf16.msra.mxu0 %v219_v2 }
   0x7   :  { %200 = vmatprep.subr.bf16.mxu0 %v227_v0 }
   0xa   :  { %201 = vmatpush3.bf16.msra.mxu0 %v220_v3 }
   0xb   :  { %202 = vmatprep.subr.bf16.mxu0 %v227_v0 }
   0xe   :  { %203 = vmatpush3.bf16.msra.mxu0 %v221_v4 }
   0xf   :  { %204 = vmatprep.subr.bf16.mxu0 %v227_v0 }
  0x12   :  { %205 = vmatpush3.bf16.msra.mxu0 %v222_v5 }
  0x13   :  { %206 = vmatprep.subr.bf16.mxu0 %v227_v0 }
  0x16   :  { %207 = vmatpush3.bf16.msra.mxu0 %v223_v6 }
  0x17   :  { %208 = vmatprep.subr.bf16.mxu0 %v227_v0 }
  0x1a   :  { %209 = vmatpush3.bf16.msra.mxu0 %v224_v7 }
  0x1b   :  { %210 = vmatprep.subr.bf16.mxu0 %v227_v0 }
  0x1e   :  { %211 = vmatpush3.bf16.msra.mxu0 %v225_v8 }
  0x21   :  { %213 = vmatmul.mubr.bf16.vlgmr.msra.gmra.mrb[0].mxu0 %v226_v9 }
  0xf4   :  { %v129_v10 = vpop.f32.mrb[0].mxu0 }
  0xf5   :  { %v214_v12 = vpop.f32.mrb[1].mxu0  ;;  %v152_v14 = vadd.f32 %v177_v11, %v129_v10 }
  0xf6   :  { %v132_v13 = vpop.f32.mrb[2].mxu0 }
  0xf7   :  { %v153_v15 = vadd.f32 %v177_v11, %v132_v13  ;;  %v215_v16 = vpop.f32.mrb[3].mxu0 }
  0xf9   :  { %v185_v17 = vpack.c.bf16 %v153_v15, %v152_v14 }
  0xfb   :  { %186 = vst [vmem:[%s285_s3] sm:$0xff] %v185_v17  }

// kernel: _lambda_.70
= control target key start
LH: loop header
LB: loop body
LE: loop exit
PB: predicated region body
PF: predicated region fallthrough
CT: control target
= control target key end

     0   :  { %v240_v0 = vmov 0.0   ;;  %vm241_vm0 = vmmov 0   ;;  %s303_s1 = inlined_call_operand.vmem [shape: bf16[128,128], index: 1, kind: input, shape index: {}]   ;;  %s304_s0 = inlined_call_operand.vmem [shape: bf16[16,128], index: 0, kind: input, shape index: {}]   ;;  %s305_s2 = inlined_call_operand.vmem [shape: f32[1,128], index: 2, kind: input, shape index: {}]   ;;  %s306_s3 = inlined_call_operand.vmem [shape: bf16[16,128], index: 3, kind: input, shape index: {}]   ;;  %s307_s4 = inlined_call_operand.vmem [shape: bf16[16,128], index: 4, kind: output, shape index: {}]  }
   0x1   :  { %209 = vmatprep.subr.bf16.mxu0 %v240_v0  ;;  %v231_v1 = vld [vmem:[%s303_s1] sm:$0xff]   ;;  %225 = vmatprep.mubr.msk.bf16.mxu0 %vm241_vm0, %v240_v0  ;;  %v232_v2 = vld [vmem:[%s303_s1 + $0x8] sm:$0xff]   ;;  %v233_v3 = vld [vmem:[%s303_s1 + $0x10] sm:$0xff]  }
   0x2   :  { %210 = vmatpush3.bf16.msra.mxu0 %v231_v1  ;;  %v234_v4 = vld [vmem:[%s303_s1 + $0x18] sm:$0xff]   ;;  %v235_v5 = vld [vmem:[%s303_s1 + $0x20] sm:$0xff]   ;;  %v236_v6 = vld [vmem:[%s303_s1 + $0x28] sm:$0xff]  }
   0x3   :  { %211 = vmatprep.subr.bf16.mxu0 %v240_v0  ;;  %v237_v7 = vld [vmem:[%s303_s1 + $0x30] sm:$0xff]   ;;  %v238_v8 = vld [vmem:[%s303_s1 + $0x38] sm:$0xff]   ;;  %v239_v9 = vld [vmem:[%s304_s0] sm:$0xff]  }
   0x4   :  { %v186_v10 = vld [vmem:[%s305_s2] ss:$0 sm:$0xff] }
   0x5   :  { %v192_v11 = vld [vmem:[%s306_s3] sm:$0xff]  }
   0x6   :  { %212 = vmatpush3.bf16.msra.mxu0 %v232_v2  ;;  %v193_v14 = vunpack.c.l.bf16 %v192_v11  ;;  %v194_v16 = vunpack.c.h.bf16 %v192_v11 }
   0x7   :  { %213 = vmatprep.subr.bf16.mxu0 %v240_v0 }
   0xa   :  { %214 = vmatpush3.bf16.msra.mxu0 %v233_v3 }
   0xb   :  { %215 = vmatprep.subr.bf16.mxu0 %v240_v0 }
   0xe   :  { %216 = vmatpush3.bf16.msra.mxu0 %v234_v4 }
   0xf   :  { %217 = vmatprep.subr.bf16.mxu0 %v240_v0 }
  0x12   :  { %218 = vmatpush3.bf16.msra.mxu0 %v235_v5 }
  0x13   :  { %219 = vmatprep.subr.bf16.mxu0 %v240_v0 }
  0x16   :  { %220 = vmatpush3.bf16.msra.mxu0 %v236_v6 }
  0x17   :  { %221 = vmatprep.subr.bf16.mxu0 %v240_v0 }
  0x1a   :  { %222 = vmatpush3.bf16.msra.mxu0 %v237_v7 }
  0x1b   :  { %223 = vmatprep.subr.bf16.mxu0 %v240_v0 }
  0x1e   :  { %224 = vmatpush3.bf16.msra.mxu0 %v238_v8 }
  0x21   :  { %226 = vmatmul.mubr.bf16.vlgmr.msra.gmra.mrb[0].mxu0 %v239_v9 }
  0xf4   :  { %v132_v12 = vpop.f32.mrb[0].mxu0 }
  0xf5   :  { %v155_v13 = vadd.f32 %v186_v10, %v132_v12  ;;  %v227_v15 = vpop.f32.mrb[1].mxu0 }
  0xf6   :  { %v135_v17 = vpop.f32.mrb[2].mxu0 }
  0xf7   :  { %v156_v18 = vadd.f32 %v186_v10, %v135_v17  ;;  %v228_v19 = vpop.f32.mrb[3].mxu0  ;;  %v161_v20 = vadd.f32 %v193_v14, %v155_v13 }
  0xf9   :  { %v162_v21 = vadd.f32 %v194_v16, %v156_v18 }
  0xfb   :  { %v198_v22 = vpack.c.bf16 %v162_v21, %v161_v20 }
  0xfd   :  { %199 = vst [vmem:[%s307_s4] sm:$0xff] %v198_v22  }

// kernel: _lambda_.69
= control target key start
LH: loop header
LB: loop body
LE: loop exit
PB: predicated region body
PF: predicated region fallthrough
CT: control target
= control target key end

     0   :  { %s1175_s9 = smov 0   ;;  %s1177_s10 = smov 0   ;;  %s1385_s0 = inlined_call_operand.vmem [shape: bf16[2,8,32], index: 0, kind: input, shape index: {}]   ;;  %s1386_s1 = inlined_call_operand.vmem [shape: bf16[2,8,64], index: 1, kind: input, shape index: {}]   ;;  %s1387_s2 = inlined_call_operand.vmem [shape: bf16[2,8,32], index: 2, kind: output, shape index: {}]  }
   0x1   :  { %s1179_s11 = smov 0  }
   0x2 LB: > { %s31_s12 = sadd.s32 1, %s1137_s10  ;;  %p956_p0 = scmp.ge.s32.totalorder %s1141_s11, 1  ;;  %s1141_s11 = sphi %s1179_s11, %s12_s11   ;;  %s1137_s10 = sphi %s1177_s10, %s1389_s10   ;;  %s1133_s9 = sphi %s1175_s9, %s1388_s9  }
   0x3   : > { %p33_p1 = scmp.ge.s32.totalorder %s31_s12, 2  ;;  %p151_p2 = scmp.lt.s32.totalorder %s1141_s11, 3 }
   0x5   : > { %s1391_s12 = smov (%p33_p1, %s31_s12), 0  ;;  %p152_p3 = pnand %p956_p0, %p151_p2 }
   0x6   : > { %p184_p4 = scmp.lt.s32.totalorder (!%p152_p3), %s1133_s9, 1  ;;  %v1143_v0 = vmov (!%p152_p3), 0.0   ;;  %vm1144_vm0 = vmmov (!%p152_p3), 0   ;;  %vm233_vm1 = vcmask (!%p152_p3), 64512   ;;  %vm210_vm2 = vcmask (!%p152_p3), 31744   ;;  %s1147_s20 = smov (!%p152_p3), 96  }
   0x7   : > { %155 = sbr.rel (%p152_p3) target bundleno = 1453 (0x5ad), region = 28  ;;  %993 = vmatprep.subr.bf16.mxu0 (!%p152_p3), %v1143_v0  ;;  %995 = vmatprep.mubr.msk.bf16.mxu0 (!%p152_p3), %vm1144_vm0, %v1143_v0  ;;  %v1145_v4 = vmov (!%p152_p3), -1e+30   ;;  %212 = vst.msk [vmem:[#allocation3] sm:$0xff] (!%p152_p3), %vm210_vm2, %v1143_v0  ;;  %v222_v5 = vlaneseq (!%p152_p3)  ;;  %v1146_v14 = vmov (!%p152_p3), 0   ;;  %s1148_s21 = smov (!%p152_p3), 120  }
   0x8   : > { %999 = vmatprep.subr.bf16.mxu1 (!%p152_p3), %v1143_v0  ;;  %1001 = vmatprep.mubr.msk.bf16.mxu1 (!%p152_p3), %vm1144_vm0, %v1143_v0  ;;  %211 = vst.msk [vmem:[#allocation2] sm:$0xff] (!%p152_p3), %vm210_vm2, %v1145_v4  ;;  %s1149_s22 = smov (!%p152_p3), 112   ;;  %s1150_s23 = smov (!%p152_p3), 104   ;;  %vm303_vm4 = vcmask (!%p152_p3), 7168   ;;  %vm315_vm5 = vcmask (!%p152_p3), 1043456   ;;  %v1151_v63 = vmov (!%p152_p3), 1  }
   0x9   : > { %v1221_v6 = vshrl.u32 (!%p152_p3), %v222_v5, 7  ;;  %v1223_v7 = vand.u32 (!%p152_p3), 127, %v222_v5  ;;  %1082 = vset.pattern.permute.xlu0 (!%p152_p3), %v1146_v14  ;;  %1083 = vset.pattern.permute.xlu1 (!%p152_p3), %v1151_v63  ;;  %vm449_vm6 = vcmask (!%p152_p3), 15368   ;;  %s1153_s24 = smov (!%p152_p3), 88   ;;  %vm596_vm7 = vcmask (!%p152_p3), 23568   ;;  %s1155_s25 = smov (!%p152_p3), 80  }
   0xa   : > { %vm743_vm8 = vcmask (!%p152_p3), 31768   ;;  %s1156_s26 = smov (!%p152_p3), 72   ;;  %vm213_vm9 = vcmask (!%p152_p3), 261120   ;;  %s1157_s27 = smov (!%p152_p3), 8   ;;  %vm513_vm10 = vcmask (!%p152_p3), 130112   ;;  %vm660_vm11 = vcmask (!%p152_p3), 195712  }
   0xb   : > { %vm230_vm3 = vcmp.le.s32.totalorder (!%p152_p3), %v1223_v7, %v1221_v6  ;;  %214 = vst.msk [vmem:[#allocation4] sm:$0xff] (!%p152_p3), %vm213_vm9, %v1143_v0  ;;  %s1158_s28 = smov (!%p152_p3), 16   ;;  %s1159_s29 = smov (!%p152_p3), 24   ;;  %vm807_vm12 = vcmask (!%p152_p3), 261312   ;;  %vm858_vm13 = vcmask (!%p152_p3), 257024  }
   0xe   : > { %s1393_s9 = smov (!%p184_p4, %s1133_s9), 1 }
   0xf   : > { %s1199_s13 = sshll.u32 %s1393_s9, 2  ;;  %v1247_v22 = vld [vmem:[#allocation2] sm:$0xff] }
  0x10   : > { %s1205_s16 = scalar_lea.vmem %s1386_s1, %s1199_s13  ;;  %s1212_s19 = scalar_lea.vmem %s1385_s0, %s1199_s13 }
  0x11   : > { %v232_v1 = vld [vmem:[%s1205_s16] sm:$0xf]  ;;  %s204_s4 = scalar_lea.vmem %s1387_s2, %s1199_s13 }
  0x12   : > { %v238_v2 = vsel %vm233_vm1, %v232_v1, 0  ;;  %v231_v3 = vld [vmem:[%s1212_s19] sm:$0xf]  ;;  %v961_v15 = vcombine.low %v232_v1, %v232_v1 }
  0x13   : > { %994 = vmatpush3.bf16.xpose.msra.mxu0 %v238_v2  ;;  %v1233_v16 = vld [vmem:[%s1205_s16] ss:$0 sps:$4 sm:$0xff]   ;;  %v1152_v2 = vmov 2  }
  0x14   : > { %1011 = vmatprep.subr.bf16.mxu0 %v1143_v0  ;;  %310 = vrot.lane.b32.xlu1 %v961_v15, %s1147_s20  ;;  %v1096_v17 = vld [vmem:[%s1212_s19] ss:$0 sps:$4 sm:$0xff]  }
  0x15   : > { %v1238_v18 = vld [vmem:[%s1205_s16] ss:$0 sps:$4 sm:$0xff]  }
  0x16   : > { %v1098_v19 = vld [vmem:[%s1212_s19] ss:$0 sps:$4 sm:$0xff]  }
  0x17   : > { %v1243_v20 = vld [vmem:[%s1205_s16] ss:$0 sps:$4 sm:$0xff]  }
  0x18   : > { %378 = vrot.lane.b32.xlu1 %v1233_v16, %s1148_s21  ;;  %v1100_v21 = vld [vmem:[%s1212_s19] ss:$0 sps:$4 sm:$0xff]  }
  0x1a   : > { %996 = vmatmul.mubr.msk.bf16.vlgmr.msra.gmra.mrb[0].mxu0 %vm233_vm1, %v231_v3 }
  0x1b   : > { %1013 = vmatprep.mubr.msk.bf16.mxu0 %vm1144_vm0, %v1143_v0 }
  0x1c   : > { %373 = vrot.lane.b32.xlu1 %v1096_v17, %s1148_s21 }
  0x20   : > { %525 = vrot.lane.b32.xlu1 %v1238_v18, %s1149_s22 }
  0x24   : > { %520 = vrot.lane.b32.xlu1 %v1098_v19, %s1149_s22 }
  0x28   : > { %672 = vrot.lane.b32.xlu1 %v1243_v20, %s1150_s23 }
  0x2c   : > { %667 = vrot.lane.b32.xlu1 %v1100_v21, %s1150_s23 }
  0x86   : > { %v311_v26 = vpop.permute.xlu1 %310 }
  0x87   : > { %v317_v27 = vsel %vm315_vm5, %v311_v26, 0 }
  0x88   : > { %1000 = vmatpush3.bf16.msra.mxu1 %v317_v27 }
  0x89   : > { %1005 = vmatprep.subr.bf16.mxu1 %v1143_v0 }
  0x8a   : > { %v379_v31 = vpop.permute.xlu1 %378 }
  0x8b   : > { %v384_v34 = vsel %vm233_vm1, %v379_v31, 0 }
  0x8e   : > { %v374_v32 = vpop.permute.xlu1 %373 }
  0x92   : > { %v526_v36 = vpop.permute.xlu1 %525 }
  0x93   : > { %v531_v38 = vsel %vm233_vm1, %v526_v36, 0 }
  0x96   : > { %v521_v37 = vpop.permute.xlu1 %520 }
  0x9a   : > { %v673_v39 = vpop.permute.xlu1 %672 }
  0x9b   : > { %v678_v40 = vsel %vm233_vm1, %v673_v39, 0 }
  0x9e   : > { %v668_v41 = vpop.permute.xlu1 %667 }
  0xed   : > { %v274_v8 = vpop.f32.mrb[0].mxu0 }
  0xee   : > { %v280_v9 = vsel %vm230_vm3, %v274_v8, -1e+30  ;;  %v997_v10 = vpop.f32.mrb[1].mxu0  ;;  %v1154_v8 = vmov 3  }
  0xef   : > { %v277_v11 = vpop.f32.mrb[2].mxu0  ;;  %v283_v12 = vsel %vm233_vm1, %v280_v9, -inf }
  0xf0   : > { %284 = vmax.xlane.f32.xlu0 %v283_v12  ;;  %v998_v13 = vpop.f32.mrb[3].mxu0 }
 0x17d   : > { %v285_v23 = vpop.xlane.xlu0 %284 }
 0x17e   : > { %v1250_v24 = vmax.f32 %v1247_v22, %v285_v23 }
 0x180   : > { %v287_v25 = vsub.f32 %v1247_v22, %v1250_v24  ;;  %305 = vst.msk [vmem:[#allocation2] sm:$0xff] %vm303_vm4, %v1250_v24  ;;  %292 = vperm.xlu0 %1082, %v1250_v24  }
 0x184   : > { %1084 = vset.pattern.permute.xlu0 %v1152_v2 }
 0x187   : > { %v427_v4 = vld [vmem:[#allocation2] sm:$0xff] }
 0x1ff   : > { %v293_v28 = vpop.permute.xlu0 %292 }
 0x200   : > { %v295_v29 = vsub.f32 %v280_v9, %v293_v28 }
 0x202   : > { %v296_v30 = vmul.f32 1.442695, %v295_v29 }
 0x204   : > { %1101 = vpow2.f32 %v296_v30 }
 0x20e   : > { %v1259_v33 = vpop.eup %1101 }
 0x20f   : > { %v306_v35 = vpack.c.bf16 %v1259_v33, %v1259_v33  ;;  %v299_v17 = vsel %vm233_vm1, %v1259_v33, 0.0 }
 0x211   : > { %1002 = vmatmul.mubr.msk.bf16.vlgmr.msra.gmra.mrb[0].mxu1 %vm233_vm1, %v306_v35 }
 0x212   : > { %1006 = vmatpush3.bf16.xpose.msra.mxu1 %v384_v34  ;;  %1007 = vmatprep.mubr.msk.bf16.mxu1 %vm1144_vm0, %v1143_v0 }
 0x213   : > { %1017 = vmatprep.subr.bf16.mxu1 %v1143_v0 }
 0x219   : > { %1008 = vmatmul.mubr.msk.bf16.vlgmr.msra.gmra.mrb[4].mxu1 %vm233_vm1, %v374_v32 }
 0x21a   : > { %1018 = vmatpush3.bf16.xpose.msra.mxu1 %v531_v38  ;;  %1019 = vmatprep.mubr.msk.bf16.mxu1 %vm1144_vm0, %v1143_v0 }
 0x21b   : > { %1029 = vmatprep.subr.bf16.mxu1 %v1143_v0 }
 0x221   : > { %1020 = vmatmul.mubr.msk.bf16.vlgmr.msra.gmra.mrb[8].mxu1 %vm233_vm1, %v521_v37 }
 0x222   : > { %1030 = vmatpush3.bf16.xpose.msra.mxu1 %v678_v40  ;;  %1031 = vmatprep.mubr.msk.bf16.mxu1 %vm1144_vm0, %v1143_v0 }
 0x229   : > { %1032 = vmatmul.mubr.msk.bf16.vlgmr.msra.gmra.mrb[12].mxu1 %vm233_vm1, %v668_v41 }
 0x2e4   : > { %v1278_v42 = vpop.f32.mrb[0].mxu1 }
 0x2e5   : > { %v1003_v43 = vpop.f32.mrb[1].mxu1 }
 0x2e6   : > { %v356_v44 = vpop.f32.mrb[2].mxu1 }
 0x2e7   : > { %v1004_v45 = vpop.f32.mrb[3].mxu1 }
 0x2ec   : > { %v420_v46 = vpop.f32.mrb[4].mxu1 }
 0x2ed   : > { %v426_v47 = vsel %vm230_vm3, %v420_v46, -1e+30  ;;  %v1009_v48 = vpop.f32.mrb[5].mxu1 }
 0x2ee   : > { %v423_v49 = vpop.f32.mrb[6].mxu1  ;;  %v429_v50 = vsel %vm233_vm1, %v426_v47, -inf  ;;  %v288_v48 = vmul.f32 1.442695, %v287_v25 }
 0x2ef   : > { %430 = vmax.xlane.f32.xlu1 %v429_v50  ;;  %v1010_v51 = vpop.f32.mrb[7].mxu1  ;;  %v282_v50 = vld [vmem:[#allocation3] sm:$0xff] }
 0x2f4   : > { %v567_v52 = vpop.f32.mrb[8].mxu1 }
 0x2f5   : > { %v573_v53 = vsel %vm230_vm3, %v567_v52, -1e+30  ;;  %v1021_v54 = vpop.f32.mrb[9].mxu1 }
 0x2f6   : > { %v570_v55 = vpop.f32.mrb[10].mxu1  ;;  %v576_v56 = vsel %vm233_vm1, %v573_v53, -inf }
 0x2f7   : > { %577 = vmax.xlane.f32.xlu0 %v576_v56  ;;  %v1022_v57 = vpop.f32.mrb[11].mxu1 }
 0x2fc   : > { %v714_v58 = vpop.f32.mrb[12].mxu1 }
 0x2fd   : > { %v1291_v59 = vsel %vm230_vm3, %v714_v58, -1e+30  ;;  %v1033_v60 = vpop.f32.mrb[13].mxu1 }
 0x2fe   : > { %v717_v61 = vpop.f32.mrb[14].mxu1  ;;  %v723_v62 = vsel %vm233_vm1, %v1291_v59, -inf }
 0x2ff   : > { %v1034_v1 = vpop.f32.mrb[15].mxu1  ;;  %724 = vmax.xlane.f32.xlu1 %v723_v62 }
 0x37c   : > { %v431_v3 = vpop.xlane.xlu1 %430 }
 0x37d   : > { %v432_v5 = vmax.f32 %v427_v4, %v431_v3  ;;  %v359_v3 = vld [vmem:[#allocation4] sm:$0xff] }
 0x37f   : > { %v433_v6 = vsub.f32 %v427_v4, %v432_v5  ;;  %451 = vst.msk [vmem:[#allocation2] sm:$0xff] %vm449_vm6, %v432_v5  ;;  %438 = vperm.xlu1 %1083, %v432_v5  }
 0x381   : > { %v434_v35 = vmul.f32 1.442695, %v433_v6 }
 0x383   : > { %453 = vrot.lane.b32.xlu1 %v1233_v16, %s1153_s24 }
 0x384   : > { %v578_v7 = vpop.xlane.xlu0 %577  ;;  %1085 = vset.pattern.permute.xlu1 %v1154_v8 }
 0x386   : > { %v1300_v9 = vld [vmem:[#allocation2] sm:$0xff] }
 0x387   : > { %v1303_v10 = vmax.f32 %v1300_v9, %v578_v7 }
 0x389   : > { %v580_v11 = vsub.f32 %v1300_v9, %v1303_v10  ;;  %598 = vst.msk [vmem:[#allocation2] sm:$0xff] %vm596_vm7, %v1303_v10  ;;  %585 = vperm.xlu0 %1084, %v1303_v10  }
 0x38b   : > { %v581_v22 = vmul.f32 1.442695, %v580_v11 }
 0x38c   : > { %v725_v12 = vpop.xlane.xlu1 %724 }
 0x38d   : > { %1087 = vset.pattern.permute.xlu0 %v1151_v63 }
 0x390   : > { %v1311_v13 = vld [vmem:[#allocation2] sm:$0xff] }
 0x391   : > { %v1314_v15 = vmax.f32 %v1311_v13, %v725_v12 }
 0x393   : > { %v727_v16 = vsub.f32 %v1311_v13, %v1314_v15  ;;  %745 = vst.msk [vmem:[#allocation2] sm:$0xff] %vm743_vm8, %v1314_v15  ;;  %732 = vperm.xlu1 %1085, %v1314_v15  }
 0x397   : > { %600 = vrot.lane.b32.xlu1 %v1238_v18, %s1155_s25 }
 0x398   : > { %1086 = vset.pattern.permute.xlu1 %v1146_v14 }
 0x39b   : > { %747 = vrot.lane.b32.xlu1 %v1243_v20, %s1156_s26 }
 0x3bf   : > { %300 = vadd.xlane.f32.xlu1 %v299_v17 }
 0x3fe   : > { %v439_v19 = vpop.permute.xlu1 %438 }
 0x3ff   : > { %v441_v21 = vsub.f32 %v426_v47, %v439_v19 }
 0x401   : > { %v442_v23 = vmul.f32 1.442695, %v441_v21 }
 0x402   : > { %v454_v26 = vpop.permute.xlu1 %453 }
 0x403   : > { %1103 = vpow2.f32 %v442_v23  ;;  %v459_v27 = vsel %vm315_vm5, %v454_v26, 0 }
 0x404   : > { %1012 = vmatpush3.bf16.msra.mxu0 %v459_v27 }
 0x405   : > { %1023 = vmatprep.subr.bf16.mxu0 %v1143_v0 }
 0x408   : > { %v586_v18 = vpop.permute.xlu0 %585 }
 0x409   : > { %v588_v28 = vsub.f32 %v573_v53, %v586_v18 }
 0x40b   : > { %v589_v29 = vmul.f32 1.442695, %v588_v28 }
 0x40d   : > { %v1104_v30 = vpop.eup %1103  ;;  %1105 = vpow2.f32 %v589_v29 }
 0x40e   : > { %v445_v20 = vsel %vm233_vm1, %v1104_v30, 0.0  ;;  %v452_v31 = vpack.c.bf16 %v1104_v30, %v1104_v30 }
 0x40f   : > { %446 = vadd.xlane.f32.xlu0 %v445_v20 }
 0x410   : > { %1014 = vmatmul.mubr.msk.bf16.vlgmr.msra.gmra.mrb[4].mxu0 %vm233_vm1, %v452_v31 }
 0x411   : > { %1025 = vmatprep.mubr.msk.bf16.mxu0 %vm1144_vm0, %v1143_v0 }
 0x412   : > { %v733_v32 = vpop.permute.xlu1 %732 }
 0x413   : > { %v735_v33 = vsub.f32 %v1291_v59, %v733_v32 }
 0x415   : > { %v736_v34 = vmul.f32 1.442695, %v735_v33 }
 0x416   : > { %v601_v36 = vpop.permute.xlu1 %600 }
 0x417   : > { %v1106_v37 = vpop.eup %1105  ;;  %1107 = vpow2.f32 %v736_v34  ;;  %v606_v38 = vsel %vm315_vm5, %v601_v36, 0 }
 0x418   : > { %1024 = vmatpush3.bf16.msra.mxu0 %v606_v38  ;;  %v592_v39 = vsel %vm233_vm1, %v1106_v37, 0.0  ;;  %v599_v40 = vpack.c.bf16 %v1106_v37, %v1106_v37  ;;  %1109 = vpow2.f32 %v434_v35 }
 0x419   : > { %593 = vadd.xlane.f32.xlu1 %v592_v39  ;;  %1035 = vmatprep.subr.bf16.mxu0 %v1143_v0  ;;  %1111 = vpow2.f32 %v288_v48 }
 0x41a   : > { %v748_v41 = vpop.permute.xlu1 %747  ;;  %1113 = vpow2.f32 %v581_v22 }
 0x41b   : > { %1026 = vmatmul.mubr.msk.bf16.vlgmr.msra.gmra.mrb[8].mxu0 %vm233_vm1, %v599_v40  ;;  %v753_v43 = vsel %vm315_vm5, %v748_v41, 0 }
 0x41c   : > { %1036 = vmatpush3.bf16.msra.mxu0 %v753_v43  ;;  %1037 = vmatprep.mubr.msk.bf16.mxu0 %vm1144_vm0, %v1143_v0  ;;  %v728_v0 = vmul.f32 1.442695, %v727_v16 }
 0x41e   : > { %1115 = vpow2.f32 %v728_v0 }
 0x421   : > { %v1108_v44 = vpop.eup %1107 }
 0x422   : > { %v739_v45 = vsel %vm233_vm1, %v1108_v44, 0.0  ;;  %v746_v46 = vpack.c.bf16 %v1108_v44, %v1108_v44  ;;  %v1110_v47 = vpop.eup %1109 }
 0x423   : > { %740 = vadd.xlane.f32.xlu1 %v739_v45  ;;  %v1112_v49 = vpop.eup %1111 }
 0x424   : > { %1038 = vmatmul.mubr.msk.bf16.vlgmr.msra.gmra.mrb[12].mxu0 %vm233_vm1, %v746_v46  ;;  %v298_v51 = vmul.f32 %v1112_v49, %v282_v50  ;;  %v1114_v56 = vpop.eup %1113 }
 0x425   : > { %504 = vperm.xlu0 %1087, %v1110_v47  }
 0x428   : > { %v1116_v62 = vpop.eup %1115 }
 0x429   : > { %1094 = vset.pattern.permute.xlu0 %v1154_v8 }
 0x434   : > { %362 = vperm.xlu1 %1086, %v1112_v49  }
 0x438   : > { %1088 = vset.pattern.permute.xlu1 %v1152_v2 }
 0x44c   : > { %v301_v52 = vpop.xlane.xlu1 %300 }
 0x44d   : > { %v302_v53 = vadd.f32 %v301_v52, %v298_v51 }
 0x44f   : > { %304 = vst.msk [vmem:[#allocation3] sm:$0xff] %vm303_vm4, %v302_v53 }
 0x456   : > { %v428_v24 = vld [vmem:[#allocation3] sm:$0xff] }
 0x457   : > { %v444_v25 = vmul.f32 %v1110_v47, %v428_v24 }
 0x49c   : > { %v447_v54 = vpop.xlane.xlu0 %446 }
 0x49d   : > { %v448_v55 = vadd.f32 %v447_v54, %v444_v25 }
 0x49f   : > { %450 = vst.msk [vmem:[#allocation3] sm:$0xff] %vm449_vm6, %v448_v55 }
 0x4a4   : > { %v505_v29 = vpop.permute.xlu0 %504 }
 0x4a6   : > { %v575_v57 = vld [vmem:[#allocation3] sm:$0xff]  ;;  %v594_v59 = vpop.xlane.xlu1 %593 }
 0x4a7   : > { %v591_v58 = vmul.f32 %v1114_v56, %v575_v57 }
 0x4a9   : > { %v595_v60 = vadd.f32 %v594_v59, %v591_v58 }
 0x4ab   : > { %597 = vst.msk [vmem:[#allocation3] sm:$0xff] %vm596_vm7, %v595_v60 }
 0x4b0   : > { %v741_v61 = vpop.xlane.xlu1 %740 }
 0x4b2   : > { %v722_v1 = vld [vmem:[#allocation3] sm:$0xff] }
 0x4b3   : > { %v738_v4 = vmul.f32 %v1116_v62, %v722_v1 }
 0x4b4   : > { %v363_v5 = vpop.permute.xlu1 %362 }
 0x4b5   : > { %v742_v6 = vadd.f32 %v741_v61, %v738_v4  ;;  %v365_v7 = vmul.f32 %v363_v5, %v359_v3 }
 0x4b7   : > { %744 = vst.msk [vmem:[#allocation3] sm:$0xff] %vm743_vm8, %v742_v6  ;;  %v366_v9 = vadd.f32 %v365_v7, %v1278_v42 }
 0x4b9   : > { %367 = vst.msk [vmem:[#allocation4] sm:$0xff] %vm233_vm1, %v366_v9 }
 0x4be   : > { %v812_v16 = vld [vmem:[#allocation3] sm:$0xff] }
 0x4bf   : > { %1117 = vrcp.f32 %v812_v16 }
 0x4c0   : > { %v501_v28 = vld [vmem:[#allocation4] sm:$0xff] }
 0x4c1   : > { %v507_v30 = vmul.f32 %v505_v29, %v501_v28 }
 0x4c9   : > { %v1118_v18 = vpop.eup %1117 }
 0x4e3   : > { %v495_v10 = vpop.f32.mrb[4].mxu0 }
 0x4e4   : > { %509 = vrot.lane.b32.xlu1 %v495_v10, %s1157_s27  ;;  %v1015_v11 = vpop.f32.mrb[5].mxu0 }
 0x4e5   : > { %v498_v12 = vpop.f32.mrb[6].mxu0 }
 0x4e6   : > { %v1016_v13 = vpop.f32.mrb[7].mxu0 }
 0x4e8   : > { %651 = vperm.xlu1 %1088, %v1114_v56  }
 0x4ec   : > { %1089 = vset.pattern.permute.xlu1 %v1154_v8 }
 0x4ee   : > { %v642_v15 = vpop.f32.mrb[8].mxu0 }
 0x4ef   : > { %656 = vrot.lane.b32.xlu1 %v642_v15, %s1158_s28  ;;  %v1027_v17 = vpop.f32.mrb[9].mxu0 }
 0x4f0   : > { %v645_v19 = vpop.f32.mrb[10].mxu0 }
 0x4f1   : > { %v1028_v21 = vpop.f32.mrb[11].mxu0 }
 0x4f3   : > { %798 = vperm.xlu1 %1089, %v1116_v62  }
 0x4f7   : > { %v789_v42 = vpop.f32.mrb[12].mxu0  ;;  %1090 = vset.pattern.permute.xlu1 %v1146_v14 }
 0x4f8   : > { %803 = vrot.lane.b32.xlu1 %v789_v42, %s1159_s29  ;;  %v1039_v23 = vpop.f32.mrb[13].mxu0 }
 0x4f9   : > { %v792_v26 = vpop.f32.mrb[14].mxu0 }
 0x4fa   : > { %v1040_v27 = vpop.f32.mrb[15].mxu0 }
 0x4fc   : > { %817 = vperm.xlu1 %1090, %v1118_v18  }
 0x500   : > { %1091 = vset.pattern.permute.xlu1 %v1151_v63 }
 0x501   : > { %828 = vperm.xlu1 %1091, %v1118_v18  }
 0x505   : > { %1092 = vset.pattern.permute.xlu1 %v1152_v2 }
 0x506   : > { %839 = vperm.xlu1 %1092, %v1118_v18  }
 0x50a   : > { %1093 = vset.pattern.permute.xlu1 %v1154_v8 }
 0x50b   : > { %850 = vperm.xlu1 %1093, %v1118_v18  }
 0x556   : > { %v510_v14 = vpop.permute.xlu1 %509 }
 0x557   : > { %v512_v20 = vadd.f32 %v510_v14, %v507_v30 }
 0x559   : > { %514 = vst.msk [vmem:[#allocation4] sm:$0xff] %vm513_vm10, %v512_v20 }
 0x560   : > { %v648_v32 = vld [vmem:[#allocation4] sm:$0xff] }
 0x567   : > { %v652_v31 = vpop.permute.xlu1 %651 }
 0x568   : > { %v654_v33 = vmul.f32 %v652_v31, %v648_v32 }
 0x56b   : > { %v657_v63 = vpop.permute.xlu1 %656 }
 0x56c   : > { %v659_v34 = vadd.f32 %v657_v63, %v654_v33 }
 0x56e   : > { %661 = vst.msk [vmem:[#allocation4] sm:$0xff] %vm660_vm11, %v659_v34 }
 0x572   : > { %v799_v2 = vpop.permute.xlu1 %798 }
 0x575   : > { %v795_v35 = vld [vmem:[#allocation4] sm:$0xff] }
 0x576   : > { %v801_v8 = vmul.f32 %v799_v2, %v795_v35  ;;  %v804_v36 = vpop.permute.xlu1 %803 }
 0x578   : > { %v806_v37 = vadd.f32 %v804_v36, %v801_v8 }
 0x57a   : > { %808 = vst.msk [vmem:[#allocation4] sm:$0xff] %vm807_vm12, %v806_v37 }
 0x57b   : > { %v818_v39 = vpop.permute.xlu1 %817 }
 0x580   : > { %v829_v43 = vpop.permute.xlu1 %828 }
 0x581   : > { %v814_v38 = vld [vmem:[#allocation4] sm:$0xff] }
 0x582   : > { %v820_v40 = vmul.f32 %v818_v39, %v814_v38 }
 0x584   : > { %822 = vst.msk [vmem:[#allocation4] sm:$0xff] %vm233_vm1, %v820_v40 }
 0x585   : > { %v840_v46 = vpop.permute.xlu1 %839 }
 0x58a   : > { %v851_v49 = vpop.permute.xlu1 %850 }
 0x58b   : > { %v825_v41 = vld [vmem:[#allocation4] sm:$0xff] }
 0x58c   : > { %v831_v44 = vmul.f32 %v829_v43, %v825_v41 }
 0x58e   : > { %833 = vst.msk [vmem:[#allocation4] sm:$0xff] %vm513_vm10, %v831_v44 }
 0x595   : > { %v836_v45 = vld [vmem:[#allocation4] sm:$0xff] }
 0x596   : > { %v842_v47 = vmul.f32 %v840_v46, %v836_v45 }
 0x598   : > { %844 = vst.msk [vmem:[#allocation4] sm:$0xff] %vm660_vm11, %v842_v47 }
 0x59f   : > { %v847_v48 = vld [vmem:[#allocation4] sm:$0xff] }
 0x5a0   : > { %v853_v50 = vmul.f32 %v851_v49, %v847_v48 }
 0x5a2   : > { %855 = vst.msk [vmem:[#allocation4] sm:$0xff] %vm807_vm12, %v853_v50 }
 0x5a9   : > { %v856_v51 = vld [vmem:[#allocation4] sm:$0xff] }
 0x5aa   : > { %v857_v52 = vpack.c.bf16 %v856_v51, %v856_v51 }
 0x5ac   : > { %859 = vst.msk [vmem:[%s204_s4] sm:$0xf] %vm858_vm13, %v857_v52 }
 0x5ad PF: > { %s12_s11 = sadd.s32 1, %s1141_s11   ;;  %s1388_s9 = smov %s1137_s10 }
 0x5ae   : > { %p9_p5 = scmp.ge.s32.totalorder %s12_s11, 4   ;;  %s1389_s10 = smov %s1391_s12 }
 0x5b0   :  { %11 = sbr.rel (!%p9_p5) target bundleno = 2 (0x2), region = 73 }

// kernel: _lambda_.77
= control target key start
LH: loop header
LB: loop body
LE: loop exit
PB: predicated region body
PF: predicated region fallthrough
CT: control target
= control target key end

     0   :  { %v241_v0 = vmov 0.0   ;;  %vm242_vm0 = vmmov 0   ;;  %s296_s1 = inlined_call_operand.vmem [shape: bf16[128,128], index: 1, kind: input, shape index: {}]   ;;  %s297_s0 = inlined_call_operand.vmem [shape: bf16[16,128], index: 0, kind: input, shape index: {}]   ;;  %s298_s2 = inlined_call_operand.vmem [shape: f32[1,128], index: 2, kind: input, shape index: {}]   ;;  %s299_s3 = inlined_call_operand.vmem [shape: bf16[16,128], index: 3, kind: output, shape index: {}]  }
   0x1   :  { %206 = vmatprep.subr.bf16.mxu0 %v241_v0  ;;  %v228_v1 = vld [vmem:[%s296_s1] sm:$0xff]   ;;  %222 = vmatprep.mubr.msk.bf16.mxu0 %vm242_vm0, %v241_v0  ;;  %v229_v2 = vld [vmem:[%s296_s1 + $0x8] sm:$0xff]   ;;  %v230_v3 = vld [vmem:[%s296_s1 + $0x10] sm:$0xff]  }
   0x2   :  { %207 = vmatpush3.bf16.msra.mxu0 %v228_v1  ;;  %v231_v4 = vld [vmem:[%s296_s1 + $0x18] sm:$0xff]   ;;  %v232_v5 = vld [vmem:[%s296_s1 + $0x20] sm:$0xff]   ;;  %v233_v6 = vld [vmem:[%s296_s1 + $0x28] sm:$0xff]  }
   0x3   :  { %208 = vmatprep.subr.bf16.mxu0 %v241_v0  ;;  %v234_v7 = vld [vmem:[%s296_s1 + $0x30] sm:$0xff]   ;;  %v235_v8 = vld [vmem:[%s296_s1 + $0x38] sm:$0xff]   ;;  %v236_v9 = vld [vmem:[%s297_s0] sm:$0xff]  }
   0x4   :  { %v187_v10 = vld [vmem:[%s298_s2] ss:$0 sm:$0xff] }
   0x6   :  { %209 = vmatpush3.bf16.msra.mxu0 %v229_v2 }
   0x7   :  { %210 = vmatprep.subr.bf16.mxu0 %v241_v0 }
   0xa   :  { %211 = vmatpush3.bf16.msra.mxu0 %v230_v3 }
   0xb   :  { %212 = vmatprep.subr.bf16.mxu0 %v241_v0 }
   0xe   :  { %213 = vmatpush3.bf16.msra.mxu0 %v231_v4 }
   0xf   :  { %214 = vmatprep.subr.bf16.mxu0 %v241_v0 }
  0x12   :  { %215 = vmatpush3.bf16.msra.mxu0 %v232_v5 }
  0x13   :  { %216 = vmatprep.subr.bf16.mxu0 %v241_v0 }
  0x16   :  { %217 = vmatpush3.bf16.msra.mxu0 %v233_v6 }
  0x17   :  { %218 = vmatprep.subr.bf16.mxu0 %v241_v0 }
  0x1a   :  { %219 = vmatpush3.bf16.msra.mxu0 %v234_v7 }
  0x1b   :  { %220 = vmatprep.subr.bf16.mxu0 %v241_v0 }
  0x1e   :  { %221 = vmatpush3.bf16.msra.mxu0 %v235_v8 }
  0x21   :  { %223 = vmatmul.mubr.bf16.vlgmr.msra.gmra.mrb[0].mxu0 %v236_v9 }
  0xf4   :  { %v129_v11 = vpop.f32.mrb[0].mxu0 }
  0xf5   :  { %v152_v12 = vadd.f32 %v187_v10, %v129_v11  ;;  %v224_v13 = vpop.f32.mrb[1].mxu0 }
  0xf6   :  { %v132_v14 = vpop.f32.mrb[2].mxu0 }
  0xf7   :  { %v156_v15 = vmul.f32 0.70710677, %v152_v12  ;;  %v153_v16 = vadd.f32 %v187_v10, %v132_v14  ;;  %v225_v17 = vpop.f32.mrb[3].mxu0  ;;  %v154_v22 = vmul.f32 0.5, %v152_v12 }
  0xf9   :  { %237 = verf.f32 %v156_v15  ;;  %v157_v18 = vmul.f32 0.70710677, %v153_v16  ;;  %v155_v23 = vmul.f32 0.5, %v153_v16 }
  0xfb   :  { %239 = verf.f32 %v157_v18 }
 0x103   :  { %v238_v19 = vpop.eup %237 }
 0x104   :  { %v160_v20 = vadd.f32 1.0, %v238_v19 }
 0x105   :  { %v240_v21 = vpop.eup %239 }
 0x106   :  { %v161_v24 = vadd.f32 1.0, %v240_v21  ;;  %v162_v25 = vmul.f32 %v160_v20, %v154_v22 }
 0x108   :  { %v163_v26 = vmul.f32 %v161_v24, %v155_v23 }
 0x10a   :  { %v195_v27 = vpack.c.bf16 %v163_v26, %v162_v25 }
 0x10c   :  { %196 = vst [vmem:[%s299_s3] sm:$0xff] %v195_v27  }

// kernel: _lambda_.93
= control target key start
LH: loop header
LB: loop body
LE: loop exit
PB: predicated region body
PF: predicated region fallthrough
CT: control target
= control target key end

     0   :  { %v240_v1 = vmov 0.0   ;;  %vm76_vm0 = vcmask 261120   ;;  %vm241_vm1 = vmmov 0   ;;  %s308_s0 = inlined_call_operand.vmem [shape: bf16[16,32], index: 0, kind: input, shape index: {}]   ;;  %s309_s1 = inlined_call_operand.vmem [shape: bf16[128,32], index: 1, kind: input, shape index: {}]   ;;  %s310_s2 = inlined_call_operand.hbm [shape: f32[16,128], index: 2, kind: output, shape index: {}]  }
   0x1   :  { %v207_v0 = vld [vmem:[%s309_s1] sm:$0xff]   ;;  %182 = vmatprep.subr.bf16.mxu0 %v240_v1  ;;  %v208_v3 = vld [vmem:[%s309_s1 + $0x8] sm:$0xff]   ;;  %198 = vmatprep.mubr.msk.bf16.mxu0 %vm241_vm1, %v240_v1 }
   0x2   :  { %v81_v2 = vsel %vm76_vm0, %v207_v0, 0  ;;  %v84_v4 = vsel %vm76_vm0, %v208_v3, 0 }
   0x3   :  { %183 = vmatpush3.bf16.xpose.msra.mxu0 %v81_v2 }
   0x4   :  { %184 = vmatprep.subr.bf16.mxu0 %v240_v1 }
   0x5   :  { %7 = vsyncpa [#allocation3], 0  ;;  %v209_v5 = vld [vmem:[%s309_s1 + $0x10] sm:$0xff]   ;;  %v210_v7 = vld [vmem:[%s309_s1 + $0x18] sm:$0xff]   ;;  %s242_s27 = smov [#allocation2]  }
   0x6   :  { %v87_v6 = vsel %vm76_vm0, %v209_v5, 0  ;;  %v90_v8 = vsel %vm76_vm0, %v210_v7, 0  ;;  %v211_v9 = vld [vmem:[%s309_s1 + $0x20] sm:$0xff]   ;;  %v212_v11 = vld [vmem:[%s309_s1 + $0x28] sm:$0xff]   ;;  %v213_v13 = vld [vmem:[%s309_s1 + $0x30] sm:$0xff]   ;;  %s152_s28 = sshll.u32 %s242_s27, 4  ;;  %s153_s28 = int_to_ptr.vmem [resolvable:$true] %s152_s28 }
   0x7   :  { %v93_v10 = vsel %vm76_vm0, %v211_v9, 0  ;;  %v96_v12 = vsel %vm76_vm0, %v212_v11, 0  ;;  %v99_v14 = vsel %vm76_vm0, %v213_v13, 0  ;;  %v214_v15 = vld [vmem:[%s309_s1 + $0x38] sm:$0xff]   ;;  %v215_v17 = vld [vmem:[%s308_s0] sm:$0xff]   ;;  %s216_s29 = scalar_lea.vmem %s153_s28, 256  ;;  %p221_p1 = scmp.lt.s32.totalorder %s153_s28, %s153_s28 }
   0x8   :  { %v102_v16 = vsel %vm76_vm0, %v214_v15, 0  ;;  %p217_p0 = scmp.ne.s32.totalorder %s153_s28, %s216_s29  ;;  %p222_p2 = scmp.lt.s32.totalorder %s216_s29, %s216_s29 }
   0xa   :  { %p223_p3 = por %p222_p2, %p221_p1 }
   0xb   :  { %185 = vmatpush3.bf16.xpose.msra.mxu0 %v84_v4 }
   0xc   :  { %186 = vmatprep.subr.bf16.mxu0 %v240_v1  ;;  %p224_p4 = pnand %p223_p3, %p217_p0 }
  0x13   :  { %187 = vmatpush3.bf16.xpose.msra.mxu0 %v87_v6 }
  0x14   :  { %188 = vmatprep.subr.bf16.mxu0 %v240_v1 }
  0x1b   :  { %189 = vmatpush3.bf16.xpose.msra.mxu0 %v90_v8 }
  0x1c   :  { %190 = vmatprep.subr.bf16.mxu0 %v240_v1 }
  0x23   :  { %191 = vmatpush3.bf16.xpose.msra.mxu0 %v93_v10 }
  0x24   :  { %192 = vmatprep.subr.bf16.mxu0 %v240_v1 }
  0x2b   :  { %193 = vmatpush3.bf16.xpose.msra.mxu0 %v96_v12 }
  0x2c   :  { %194 = vmatprep.subr.bf16.mxu0 %v240_v1 }
  0x33   :  { %195 = vmatpush3.bf16.xpose.msra.mxu0 %v99_v14 }
  0x34   :  { %196 = vmatprep.subr.bf16.mxu0 %v240_v1 }
  0x3b   :  { %197 = vmatpush3.bf16.xpose.msra.mxu0 %v102_v16 }
  0x42   :  { %199 = vmatmul.mubr.msk.bf16.vlgmr.msra.gmra.mrb[0].mxu0 %vm76_vm0, %v215_v17 }
 0x115   :  { %v138_v18 = vpop.f32.mrb[0].mxu0 }
 0x116   :  { %145 = vst [vmem:[#allocation2] sm:$0xff] %v138_v18  ;;  %v200_v19 = vpop.f32.mrb[1].mxu0 }
 0x117   :  { %v141_v20 = vpop.f32.mrb[2].mxu0 }
 0x118   :  { %146 = vst [vmem:[#allocation2 + $0x8] sm:$0xff] %v141_v20  ;;  %v201_v21 = vpop.f32.mrb[3].mxu0 }
 0x119   :  { %227 = shalt.err (!%p224_p4)
}
 0x11a   :  { %s228_s30 = scalar_lea.hbm %s310_s2, 256 }
 0x11b   :  { %p229_p5 = scmp.ne.s32.totalorder %s310_s2, %s228_s30  ;;  %p232_p6 = scmp.lt.u32.totalorder %s228_s30, %s310_s2 }
 0x11d   :  { %p234_p7 = pnand %p232_p6, %p229_p5 }
 0x11f   :  { %237 = shalt.err (!%p234_p7)
}
 0x120   :  { %s243_s7 = smov 128   ;;  %s244_s8 = smov 8  }
 0x121   :  { %158 = dma.vmem_to_hbm [thread:$0]  %s153_s28, 256, %s310_s2, [#allocation3], %s243_s7, %s243_s7, %s244_s8  }
 0x122   :  { %238 = dma.done.wait [#allocation3], 256  }
 0x123   :  { %239 = vsyncadd [#allocation3], 4294967040 }
 0x124   :  { %162 = vsyncpa [#allocation3], 1 }

// kernel: _lambda_.74
= control target key start
LH: loop header
LB: loop body
LE: loop exit
PB: predicated region body
PF: predicated region fallthrough
CT: control target
= control target key end

     0   :  { %s1169_s9 = smov 0   ;;  %s1171_s10 = smov 0   ;;  %s1356_s0 = inlined_call_operand.vmem [shape: bf16[2,8,32], index: 0, kind: input, shape index: {}]   ;;  %s1357_s1 = inlined_call_operand.vmem [shape: bf16[2,16,64], index: 1, kind: input, shape index: {}]   ;;  %s1358_s2 = inlined_call_operand.vmem [shape: bf16[2,8,32], index: 2, kind: output, shape index: {}]  }
   0x1   :  { %s1173_s11 = smov 0  }
   0x2 LB: > { %s31_s12 = sadd.s32 1, %s1131_s10  ;;  %p947_p0 = scmp.ge.s32.totalorder %s1135_s11, 1  ;;  %s1135_s11 = sphi %s1173_s11, %s12_s11   ;;  %s1131_s10 = sphi %s1171_s10, %s1360_s10   ;;  %s1127_s9 = sphi %s1169_s9, %s1359_s9  }
   0x3   : > { %p33_p1 = scmp.ge.s32.totalorder %s31_s12, 2  ;;  %p154_p2 = scmp.lt.s32.totalorder %s1135_s11, 3 }
   0x5   : > { %s1362_s12 = smov (%p33_p1, %s31_s12), 0  ;;  %p155_p3 = pnand %p947_p0, %p154_p2 }
   0x6   : > { %p189_p4 = scmp.lt.s32.totalorder (!%p155_p3), %s1127_s9, 1  ;;  %v1137_v0 = vmov (!%p155_p3), 0.0   ;;  %vm1138_vm0 = vmmov (!%p155_p3), 0   ;;  %vm231_vm1 = vcmask (!%p155_p3), 64512   ;;  %vm218_vm2 = vcmask (!%p155_p3), 31744   ;;  %s1141_s21 = smov (!%p155_p3), 96  }
   0x7   : > { %158 = sbr.rel (%p155_p3) target bundleno = 1451 (0x5ab), region = 28  ;;  %986 = vmatprep.subr.bf16.mxu0 (!%p155_p3), %v1137_v0  ;;  %988 = vmatprep.mubr.msk.bf16.mxu0 (!%p155_p3), %vm1138_vm0, %v1137_v0  ;;  %v1139_v4 = vmov (!%p155_p3), -1e+30   ;;  %220 = vst.msk [vmem:[#allocation3] sm:$0xff] (!%p155_p3), %vm218_vm2, %v1137_v0  ;;  %vm280_vm3 = vcmask (!%p155_p3), 130048   ;;  %v1140_v10 = vmov (!%p155_p3), 0  }
   0x8   : > { %992 = vmatprep.subr.bf16.mxu1 (!%p155_p3), %v1137_v0  ;;  %994 = vmatprep.mubr.msk.bf16.mxu1 (!%p155_p3), %vm1138_vm0, %v1137_v0  ;;  %219 = vst.msk [vmem:[#allocation2] sm:$0xff] (!%p155_p3), %vm218_vm2, %v1139_v4  ;;  %s1142_s22 = smov (!%p155_p3), 120   ;;  %s1143_s23 = smov (!%p155_p3), 112   ;;  %vm301_vm4 = vcmask (!%p155_p3), 7168   ;;  %v1145_v53 = vmov (!%p155_p3), 1   ;;  %v1146_v56 = vmov (!%p155_p3), 2  }
   0x9   : > { %1075 = vset.pattern.permute.xlu0 (!%p155_p3), %v1140_v10  ;;  %s1144_s24 = smov (!%p155_p3), 104   ;;  %1076 = vset.pattern.permute.xlu1 (!%p155_p3), %v1145_v53  ;;  %vm443_vm5 = vcmask (!%p155_p3), 15368   ;;  %s1147_s25 = smov (!%p155_p3), 88   ;;  %v1148_v62 = vmov (!%p155_p3), 3   ;;  %vm590_vm6 = vcmask (!%p155_p3), 23568   ;;  %vm737_vm7 = vcmask (!%p155_p3), 31768  }
   0xa   : > { %s1149_s26 = smov (!%p155_p3), 80   ;;  %s1150_s27 = smov (!%p155_p3), 72   ;;  %vm221_vm8 = vcmask (!%p155_p3), 261120   ;;  %vm505_vm9 = vcmask (!%p155_p3), 130112   ;;  %vm652_vm10 = vcmask (!%p155_p3), 195712   ;;  %vm799_vm11 = vcmask (!%p155_p3), 261312  }
   0xb   : > { %222 = vst.msk [vmem:[#allocation4] sm:$0xff] (!%p155_p3), %vm221_vm8, %v1137_v0  ;;  %s1151_s28 = smov (!%p155_p3), 8   ;;  %s1152_s29 = smov (!%p155_p3), 16   ;;  %vm846_vm12 = vcmask (!%p155_p3), 257024  }
   0xc   : > { %s1153_s30 = smov (!%p155_p3), 24  }
   0xe   : > { %s1364_s9 = smov (!%p189_p4, %s1127_s9), 1 }
   0xf   : > { %s969_s13 = sshll.u32 %s1364_s9, 3  ;;  %s948_s14 = sshll.u32 %s1364_s9, 2  ;;  %v1234_v17 = vld [vmem:[#allocation2] sm:$0xff] }
  0x10   : > { %s1200_s17 = scalar_lea.vmem %s1357_s1, %s969_s13  ;;  %s1208_s20 = scalar_lea.vmem %s1356_s0, %s948_s14 }
  0x11   : > { %v1088_v1 = vld [vmem:[%s1200_s17] sm:$0xff]   ;;  %s212_s5 = scalar_lea.vmem %s1358_s2, %s948_s14 }
  0x12   : > { %v236_v2 = vsel %vm231_vm1, %v1088_v1, 0  ;;  %v223_v3 = vld [vmem:[%s1208_s20] sm:$0xf]  ;;  %305 = vrot.lane.b32.xlu1 %v1088_v1, %s1141_s21 }
  0x13   : > { %987 = vmatpush3.bf16.xpose.msra.mxu0 %v236_v2  ;;  %v1220_v11 = vld [vmem:[%s1200_s17] sm:$0xff]  }
  0x14   : > { %1004 = vmatprep.subr.bf16.mxu0 %v1137_v0  ;;  %v1090_v12 = vld [vmem:[%s1208_s20] ss:$0 sps:$4 sm:$0xff]  }
  0x15   : > { %v1225_v13 = vld [vmem:[%s1200_s17] sm:$0xff]  }
  0x16   : > { %373 = vrot.lane.b32.xlu1 %v1220_v11, %s1142_s22  ;;  %v1092_v14 = vld [vmem:[%s1208_s20] ss:$0 sps:$4 sm:$0xff]  }
  0x17   : > { %v1230_v15 = vld [vmem:[%s1200_s17] sm:$0xff]  }
  0x18   : > { %v1094_v16 = vld [vmem:[%s1208_s20] ss:$0 sps:$4 sm:$0xff]  }
  0x1a   : > { %989 = vmatmul.mubr.msk.bf16.vlgmr.msra.gmra.mrb[0].mxu0 %vm231_vm1, %v223_v3  ;;  %366 = vrot.lane.b32.xlu1 %v1090_v12, %s1142_s22 }
  0x1b   : > { %1006 = vmatprep.mubr.msk.bf16.mxu0 %vm1138_vm0, %v1137_v0 }
  0x1e   : > { %520 = vrot.lane.b32.xlu1 %v1225_v13, %s1143_s23 }
  0x22   : > { %513 = vrot.lane.b32.xlu1 %v1092_v14, %s1143_s23 }
  0x26   : > { %667 = vrot.lane.b32.xlu1 %v1230_v15, %s1144_s24 }
  0x2a   : > { %660 = vrot.lane.b32.xlu1 %v1094_v16, %s1144_s24 }
  0x84   : > { %v306_v21 = vpop.permute.xlu1 %305 }
  0x85   : > { %993 = vmatpush3.bf16.msra.mxu1 %v306_v21 }
  0x86   : > { %998 = vmatprep.subr.bf16.mxu1 %v1137_v0 }
  0x88   : > { %v374_v25 = vpop.permute.xlu1 %373 }
  0x89   : > { %v379_v28 = vsel %vm231_vm1, %v374_v25, 0 }
  0x8c   : > { %v367_v26 = vpop.permute.xlu1 %366 }
  0x90   : > { %v521_v30 = vpop.permute.xlu1 %520 }
  0x91   : > { %v526_v32 = vsel %vm231_vm1, %v521_v30, 0 }
  0x94   : > { %v514_v31 = vpop.permute.xlu1 %513 }
  0x98   : > { %v668_v33 = vpop.permute.xlu1 %667 }
  0x99   : > { %v673_v34 = vsel %vm231_vm1, %v668_v33, 0 }
  0x9c   : > { %v661_v35 = vpop.permute.xlu1 %660 }
  0xed   : > { %v272_v5 = vpop.f32.mrb[0].mxu0 }
  0xee   : > { %v990_v6 = vpop.f32.mrb[1].mxu0  ;;  %v281_v7 = vsel %vm280_vm3, %v272_v5, -inf }
  0xef   : > { %282 = vmax.xlane.f32.xlu0 %v281_v7  ;;  %v275_v8 = vpop.f32.mrb[2].mxu0 }
  0xf0   : > { %v991_v9 = vpop.f32.mrb[3].mxu0 }
 0x17c   : > { %v283_v18 = vpop.xlane.xlu0 %282 }
 0x17d   : > { %v1237_v19 = vmax.f32 %v1234_v17, %v283_v18 }
 0x17f   : > { %v285_v20 = vsub.f32 %v1234_v17, %v1237_v19  ;;  %303 = vst.msk [vmem:[#allocation2] sm:$0xff] %vm301_vm4, %v1237_v19  ;;  %290 = vperm.xlu0 %1075, %v1237_v19  }
 0x183   : > { %1077 = vset.pattern.permute.xlu0 %v1146_v56 }
 0x186   : > { %v421_v58 = vld [vmem:[#allocation2] sm:$0xff] }
 0x1fe   : > { %v291_v22 = vpop.permute.xlu0 %290 }
 0x1ff   : > { %v293_v23 = vsub.f32 %v272_v5, %v291_v22 }
 0x201   : > { %v294_v24 = vmul.f32 1.442695, %v293_v23 }
 0x203   : > { %1095 = vpow2.f32 %v294_v24 }
 0x20d   : > { %v1245_v27 = vpop.eup %1095 }
 0x20e   : > { %v304_v29 = vpack.c.bf16 %v1245_v27, %v1245_v27  ;;  %v297_v7 = vsel %vm280_vm3, %v1245_v27, 0.0 }
 0x210   : > { %995 = vmatmul.mubr.msk.bf16.vlgmr.msra.gmra.mrb[0].mxu1 %vm280_vm3, %v304_v29 }
 0x211   : > { %999 = vmatpush3.bf16.xpose.msra.mxu1 %v379_v28  ;;  %1000 = vmatprep.mubr.msk.bf16.mxu1 %vm1138_vm0, %v1137_v0 }
 0x212   : > { %1010 = vmatprep.subr.bf16.mxu1 %v1137_v0 }
 0x218   : > { %1001 = vmatmul.mubr.msk.bf16.vlgmr.msra.gmra.mrb[4].mxu1 %vm231_vm1, %v367_v26 }
 0x219   : > { %1011 = vmatpush3.bf16.xpose.msra.mxu1 %v526_v32  ;;  %1012 = vmatprep.mubr.msk.bf16.mxu1 %vm1138_vm0, %v1137_v0 }
 0x21a   : > { %1022 = vmatprep.subr.bf16.mxu1 %v1137_v0 }
 0x220   : > { %1013 = vmatmul.mubr.msk.bf16.vlgmr.msra.gmra.mrb[8].mxu1 %vm231_vm1, %v514_v31 }
 0x221   : > { %1023 = vmatpush3.bf16.xpose.msra.mxu1 %v673_v34  ;;  %1024 = vmatprep.mubr.msk.bf16.mxu1 %vm1138_vm0, %v1137_v0 }
 0x228   : > { %1025 = vmatmul.mubr.msk.bf16.vlgmr.msra.gmra.mrb[12].mxu1 %vm231_vm1, %v661_v35  ;;  %v286_v35 = vmul.f32 1.442695, %v285_v20 }
 0x2e3   : > { %v1264_v36 = vpop.f32.mrb[0].mxu1 }
 0x2e4   : > { %v996_v37 = vpop.f32.mrb[1].mxu1 }
 0x2e5   : > { %v348_v38 = vpop.f32.mrb[2].mxu1 }
 0x2e6   : > { %v997_v39 = vpop.f32.mrb[3].mxu1  ;;  %v279_v38 = vld [vmem:[#allocation3] sm:$0xff] }
 0x2eb   : > { %v415_v40 = vpop.f32.mrb[4].mxu1 }
 0x2ec   : > { %v1002_v41 = vpop.f32.mrb[5].mxu1  ;;  %v423_v42 = vsel %vm280_vm3, %v415_v40, -inf }
 0x2ed   : > { %424 = vmax.xlane.f32.xlu1 %v423_v42  ;;  %v418_v43 = vpop.f32.mrb[6].mxu1 }
 0x2ee   : > { %v1003_v44 = vpop.f32.mrb[7].mxu1 }
 0x2f3   : > { %v562_v45 = vpop.f32.mrb[8].mxu1 }
 0x2f4   : > { %v1014_v46 = vpop.f32.mrb[9].mxu1  ;;  %v570_v47 = vsel %vm280_vm3, %v562_v45, -inf }
 0x2f5   : > { %571 = vmax.xlane.f32.xlu0 %v570_v47  ;;  %v565_v48 = vpop.f32.mrb[10].mxu1 }
 0x2f6   : > { %v1015_v49 = vpop.f32.mrb[11].mxu1 }
 0x2fb   : > { %v709_v50 = vpop.f32.mrb[12].mxu1 }
 0x2fc   : > { %v1026_v51 = vpop.f32.mrb[13].mxu1  ;;  %v717_v52 = vsel %vm280_vm3, %v709_v50, -inf }
 0x2fd   : > { %v712_v54 = vpop.f32.mrb[14].mxu1  ;;  %718 = vmax.xlane.f32.xlu1 %v717_v52  ;;  %v351_v52 = vld [vmem:[#allocation4] sm:$0xff] }
 0x2fe   : > { %v1027_v55 = vpop.f32.mrb[15].mxu1 }
 0x37a   : > { %v425_v57 = vpop.xlane.xlu1 %424 }
 0x37b   : > { %v426_v59 = vmax.f32 %v421_v58, %v425_v57 }
 0x37d   : > { %v427_v60 = vsub.f32 %v421_v58, %v426_v59  ;;  %445 = vst.msk [vmem:[#allocation2] sm:$0xff] %vm443_vm5, %v426_v59  ;;  %432 = vperm.xlu1 %1076, %v426_v59  }
 0x37f   : > { %v428_v25 = vmul.f32 1.442695, %v427_v60 }
 0x381   : > { %447 = vrot.lane.b32.xlu1 %v1220_v11, %s1147_s25 }
 0x382   : > { %v572_v61 = vpop.xlane.xlu0 %571  ;;  %1078 = vset.pattern.permute.xlu1 %v1148_v62 }
 0x384   : > { %v1274_v63 = vld [vmem:[#allocation2] sm:$0xff] }
 0x385   : > { %v1277_v1 = vmax.f32 %v1274_v63, %v572_v61 }
 0x387   : > { %v574_v2 = vsub.f32 %v1274_v63, %v1277_v1  ;;  %592 = vst.msk [vmem:[#allocation2] sm:$0xff] %vm590_vm6, %v1277_v1  ;;  %579 = vperm.xlu0 %1077, %v1277_v1  }
 0x389   : > { %v575_v17 = vmul.f32 1.442695, %v574_v2 }
 0x38a   : > { %v719_v3 = vpop.xlane.xlu1 %718 }
 0x38b   : > { %1080 = vset.pattern.permute.xlu0 %v1145_v53 }
 0x38e   : > { %v1285_v4 = vld [vmem:[#allocation2] sm:$0xff] }
 0x38f   : > { %v1288_v5 = vmax.f32 %v1285_v4, %v719_v3 }
 0x391   : > { %v721_v6 = vsub.f32 %v1285_v4, %v1288_v5  ;;  %739 = vst.msk [vmem:[#allocation2] sm:$0xff] %vm737_vm7, %v1288_v5  ;;  %726 = vperm.xlu1 %1078, %v1288_v5  }
 0x395   : > { %594 = vrot.lane.b32.xlu1 %v1225_v13, %s1149_s26 }
 0x396   : > { %1079 = vset.pattern.permute.xlu1 %v1140_v10 }
 0x399   : > { %741 = vrot.lane.b32.xlu1 %v1230_v15, %s1150_s27 }
 0x3bd   : > { %298 = vadd.xlane.f32.xlu1 %v297_v7 }
 0x3fc   : > { %v433_v8 = vpop.permute.xlu1 %432 }
 0x3fd   : > { %v435_v9 = vsub.f32 %v415_v40, %v433_v8 }
 0x3ff   : > { %v436_v11 = vmul.f32 1.442695, %v435_v9 }
 0x400   : > { %v448_v12 = vpop.permute.xlu1 %447 }
 0x401   : > { %1097 = vpow2.f32 %v436_v11  ;;  %1005 = vmatpush3.bf16.msra.mxu0 %v448_v12 }
 0x402   : > { %1016 = vmatprep.subr.bf16.mxu0 %v1137_v0 }
 0x406   : > { %v580_v14 = vpop.permute.xlu0 %579 }
 0x407   : > { %v582_v16 = vsub.f32 %v562_v45, %v580_v14 }
 0x409   : > { %v583_v13 = vmul.f32 1.442695, %v582_v16 }
 0x40b   : > { %v1098_v18 = vpop.eup %1097  ;;  %1099 = vpow2.f32 %v583_v13 }
 0x40c   : > { %v439_v21 = vsel %vm280_vm3, %v1098_v18, 0.0  ;;  %v446_v15 = vpack.c.bf16 %v1098_v18, %v1098_v18 }
 0x40d   : > { %440 = vadd.xlane.f32.xlu0 %v439_v21 }
 0x40e   : > { %1007 = vmatmul.mubr.msk.bf16.vlgmr.msra.gmra.mrb[4].mxu0 %vm280_vm3, %v446_v15 }
 0x40f   : > { %1018 = vmatprep.mubr.msk.bf16.mxu0 %vm1138_vm0, %v1137_v0 }
 0x410   : > { %v727_v22 = vpop.permute.xlu1 %726 }
 0x411   : > { %v729_v23 = vsub.f32 %v709_v50, %v727_v22 }
 0x413   : > { %v730_v24 = vmul.f32 1.442695, %v729_v23 }
 0x414   : > { %v595_v26 = vpop.permute.xlu1 %594 }
 0x415   : > { %v1100_v27 = vpop.eup %1099  ;;  %1101 = vpow2.f32 %v730_v24  ;;  %1017 = vmatpush3.bf16.msra.mxu0 %v595_v26 }
 0x416   : > { %v586_v28 = vsel %vm280_vm3, %v1100_v27, 0.0  ;;  %v593_v29 = vpack.c.bf16 %v1100_v27, %v1100_v27  ;;  %1028 = vmatprep.subr.bf16.mxu0 %v1137_v0  ;;  %1103 = vpow2.f32 %v428_v25 }
 0x417   : > { %587 = vadd.xlane.f32.xlu1 %v586_v28  ;;  %1105 = vpow2.f32 %v286_v35 }
 0x418   : > { %1019 = vmatmul.mubr.msk.bf16.vlgmr.msra.gmra.mrb[8].mxu0 %vm280_vm3, %v593_v29  ;;  %v742_v30 = vpop.permute.xlu1 %741  ;;  %1107 = vpow2.f32 %v575_v17 }
 0x419   : > { %1029 = vmatpush3.bf16.msra.mxu0 %v742_v30  ;;  %1030 = vmatprep.mubr.msk.bf16.mxu0 %vm1138_vm0, %v1137_v0  ;;  %v722_v0 = vmul.f32 1.442695, %v721_v6 }
 0x41b   : > { %1109 = vpow2.f32 %v722_v0 }
 0x41f   : > { %v1102_v31 = vpop.eup %1101 }
 0x420   : > { %v733_v32 = vsel %vm280_vm3, %v1102_v31, 0.0  ;;  %v740_v33 = vpack.c.bf16 %v1102_v31, %v1102_v31  ;;  %v1104_v34 = vpop.eup %1103 }
 0x421   : > { %734 = vadd.xlane.f32.xlu1 %v733_v32  ;;  %v1106_v37 = vpop.eup %1105 }
 0x422   : > { %1031 = vmatmul.mubr.msk.bf16.vlgmr.msra.gmra.mrb[12].mxu0 %vm280_vm3, %v740_v33  ;;  %v296_v39 = vmul.f32 %v1106_v37, %v279_v38  ;;  %v1108_v44 = vpop.eup %1107 }
 0x423   : > { %496 = vperm.xlu0 %1080, %v1104_v34  }
 0x425   : > { %v1110_v50 = vpop.eup %1109 }
 0x427   : > { %1087 = vset.pattern.permute.xlu0 %v1148_v62 }
 0x432   : > { %354 = vperm.xlu1 %1079, %v1106_v37  }
 0x436   : > { %1081 = vset.pattern.permute.xlu1 %v1146_v56 }
 0x44a   : > { %v299_v40 = vpop.xlane.xlu1 %298 }
 0x44b   : > { %v300_v41 = vadd.f32 %v299_v40, %v296_v39 }
 0x44d   : > { %302 = vst.msk [vmem:[#allocation3] sm:$0xff] %vm301_vm4, %v300_v41 }
 0x454   : > { %v422_v19 = vld [vmem:[#allocation3] sm:$0xff] }
 0x455   : > { %v438_v20 = vmul.f32 %v1104_v34, %v422_v19 }
 0x49a   : > { %v441_v42 = vpop.xlane.xlu0 %440 }
 0x49b   : > { %v442_v43 = vadd.f32 %v441_v42, %v438_v20 }
 0x49d   : > { %444 = vst.msk [vmem:[#allocation3] sm:$0xff] %vm443_vm5, %v442_v43 }
 0x4a2   : > { %v497_v14 = vpop.permute.xlu0 %496 }
 0x4a4   : > { %v569_v45 = vld [vmem:[#allocation3] sm:$0xff]  ;;  %v588_v47 = vpop.xlane.xlu1 %587 }
 0x4a5   : > { %v585_v46 = vmul.f32 %v1108_v44, %v569_v45 }
 0x4a7   : > { %v589_v48 = vadd.f32 %v588_v47, %v585_v46 }
 0x4a9   : > { %591 = vst.msk [vmem:[#allocation3] sm:$0xff] %vm590_vm6, %v589_v48 }
 0x4ae   : > { %v735_v49 = vpop.xlane.xlu1 %734 }
 0x4b0   : > { %v716_v51 = vld [vmem:[#allocation3] sm:$0xff] }
 0x4b1   : > { %v732_v54 = vmul.f32 %v1110_v50, %v716_v51 }
 0x4b2   : > { %v355_v55 = vpop.permute.xlu1 %354 }
 0x4b3   : > { %v736_v57 = vadd.f32 %v735_v49, %v732_v54  ;;  %v357_v58 = vmul.f32 %v355_v55, %v351_v52 }
 0x4b5   : > { %738 = vst.msk [vmem:[#allocation3] sm:$0xff] %vm737_vm7, %v736_v57  ;;  %v358_v59 = vadd.f32 %v357_v58, %v1264_v36 }
 0x4b7   : > { %359 = vst.msk [vmem:[#allocation4] sm:$0xff] %vm231_vm1, %v358_v59 }
 0x4bc   : > { %v804_v4 = vld [vmem:[#allocation3] sm:$0xff] }
 0x4bd   : > { %1111 = vrcp.f32 %v804_v4 }
 0x4be   : > { %v493_v12 = vld [vmem:[#allocation4] sm:$0xff] }
 0x4c7   : > { %v1112_v11 = vpop.eup %1111 }
 0x4e1   : > { %v487_v60 = vpop.f32.mrb[4].mxu0 }
 0x4e2   : > { %501 = vrot.lane.b32.xlu1 %v487_v60, %s1151_s28  ;;  %v1008_v61 = vpop.f32.mrb[5].mxu0 }
 0x4e3   : > { %v490_v63 = vpop.f32.mrb[6].mxu0 }
 0x4e4   : > { %v1009_v1 = vpop.f32.mrb[7].mxu0 }
 0x4e6   : > { %643 = vperm.xlu1 %1081, %v1108_v44  }
 0x4ea   : > { %1082 = vset.pattern.permute.xlu1 %v1148_v62 }
 0x4eb   : > { %v634_v2 = vpop.f32.mrb[8].mxu0 }
 0x4ec   : > { %648 = vrot.lane.b32.xlu1 %v634_v2, %s1152_s29  ;;  %v1020_v3 = vpop.f32.mrb[9].mxu0 }
 0x4ed   : > { %v637_v5 = vpop.f32.mrb[10].mxu0 }
 0x4ee   : > { %v1021_v6 = vpop.f32.mrb[11].mxu0 }
 0x4f0   : > { %790 = vperm.xlu1 %1082, %v1110_v50  }
 0x4f4   : > { %1083 = vset.pattern.permute.xlu1 %v1140_v10  ;;  %v499_v10 = vmul.f32 %v497_v14, %v493_v12 }
 0x4f5   : > { %v781_v36 = vpop.f32.mrb[12].mxu0 }
 0x4f6   : > { %795 = vrot.lane.b32.xlu1 %v781_v36, %s1153_s30  ;;  %v1032_v7 = vpop.f32.mrb[13].mxu0 }
 0x4f7   : > { %v784_v8 = vpop.f32.mrb[14].mxu0 }
 0x4f8   : > { %v1033_v9 = vpop.f32.mrb[15].mxu0 }
 0x4fa   : > { %809 = vperm.xlu1 %1083, %v1112_v11  }
 0x4fe   : > { %1084 = vset.pattern.permute.xlu1 %v1145_v53 }
 0x4ff   : > { %819 = vperm.xlu1 %1084, %v1112_v11  }
 0x503   : > { %1085 = vset.pattern.permute.xlu1 %v1146_v56 }
 0x504   : > { %829 = vperm.xlu1 %1085, %v1112_v11  }
 0x508   : > { %1086 = vset.pattern.permute.xlu1 %v1148_v62 }
 0x509   : > { %839 = vperm.xlu1 %1086, %v1112_v11  }
 0x554   : > { %v502_v16 = vpop.permute.xlu1 %501 }
 0x555   : > { %v504_v13 = vadd.f32 %v502_v16, %v499_v10 }
 0x557   : > { %506 = vst.msk [vmem:[#allocation4] sm:$0xff] %vm505_vm9, %v504_v13 }
 0x55e   : > { %v640_v21 = vld [vmem:[#allocation4] sm:$0xff] }
 0x565   : > { %v644_v18 = vpop.permute.xlu1 %643 }
 0x566   : > { %v646_v15 = vmul.f32 %v644_v18, %v640_v21 }
 0x569   : > { %v649_v53 = vpop.permute.xlu1 %648 }
 0x56a   : > { %v651_v22 = vadd.f32 %v649_v53, %v646_v15 }
 0x56c   : > { %653 = vst.msk [vmem:[#allocation4] sm:$0xff] %vm652_vm10, %v651_v22 }
 0x56f   : > { %v791_v56 = vpop.permute.xlu1 %790 }
 0x573   : > { %v787_v23 = vld [vmem:[#allocation4] sm:$0xff]  ;;  %v796_v24 = vpop.permute.xlu1 %795 }
 0x574   : > { %v793_v62 = vmul.f32 %v791_v56, %v787_v23 }
 0x576   : > { %v798_v25 = vadd.f32 %v796_v24, %v793_v62 }
 0x578   : > { %800 = vst.msk [vmem:[#allocation4] sm:$0xff] %vm799_vm11, %v798_v25 }
 0x579   : > { %v810_v27 = vpop.permute.xlu1 %809 }
 0x57e   : > { %v820_v30 = vpop.permute.xlu1 %819 }
 0x57f   : > { %v806_v26 = vld [vmem:[#allocation4] sm:$0xff] }
 0x580   : > { %v812_v28 = vmul.f32 %v810_v27, %v806_v26 }
 0x582   : > { %813 = vst.msk [vmem:[#allocation4] sm:$0xff] %vm231_vm1, %v812_v28 }
 0x583   : > { %v830_v33 = vpop.permute.xlu1 %829 }
 0x588   : > { %v840_v37 = vpop.permute.xlu1 %839 }
 0x589   : > { %v816_v29 = vld [vmem:[#allocation4] sm:$0xff] }
 0x58a   : > { %v822_v31 = vmul.f32 %v820_v30, %v816_v29 }
 0x58c   : > { %823 = vst.msk [vmem:[#allocation4] sm:$0xff] %vm505_vm9, %v822_v31 }
 0x593   : > { %v826_v32 = vld [vmem:[#allocation4] sm:$0xff] }
 0x594   : > { %v832_v34 = vmul.f32 %v830_v33, %v826_v32 }
 0x596   : > { %833 = vst.msk [vmem:[#allocation4] sm:$0xff] %vm652_vm10, %v832_v34 }
 0x59d   : > { %v836_v35 = vld [vmem:[#allocation4] sm:$0xff] }
 0x59e   : > { %v842_v38 = vmul.f32 %v840_v37, %v836_v35 }
 0x5a0   : > { %843 = vst.msk [vmem:[#allocation4] sm:$0xff] %vm799_vm11, %v842_v38 }
 0x5a7   : > { %v844_v39 = vld [vmem:[#allocation4] sm:$0xff] }
 0x5a8   : > { %v845_v40 = vpack.c.bf16 %v844_v39, %v844_v39 }
 0x5aa   : > { %847 = vst.msk [vmem:[%s212_s5] sm:$0xf] %vm846_vm12, %v845_v40 }
 0x5ab PF: > { %s12_s11 = sadd.s32 1, %s1135_s11   ;;  %s1359_s9 = smov %s1131_s10 }
 0x5ac   : > { %p9_p5 = scmp.ge.s32.totalorder %s12_s11, 4   ;;  %s1360_s10 = smov %s1362_s12 }
 0x5ae   :  { %11 = sbr.rel (!%p9_p5) target bundleno = 2 (0x2), region = 69 }

</bundles_post_ra>
